<compile_context>
chip_gen: v7x
topology: tpu7x:2x2x1
jax: 0.10.0
libtpu: 0.0.40
codegen_flags: <defaults>
</compile_context>

<pallas_src>
import numpy as np
import jax
import jax.numpy as jnp
from jax import lax
from jax.experimental import pallas as pl
from jax.experimental.pallas import tpu as pltpu


# ------------------------------ fused kernel --------------------------------

def _net_kernel(x_ref, m1_ref, s1_ref, b1_ref, rp1_ref, cp1_ref,
                m2_ref, s2_ref, b2_ref, rp2_ref, cp2_ref,
                a1_ref, bf1_ref, wf2_ref, bf2_ref, o_ref):
    f32 = jnp.float32
    x = x_ref[...]                                                  # (28, 28)

    # ---- conv1 (5x5, 1->6) + bias + ReLU.  Activation layout: row = c*24+i
    # (sublanes), col = output column j (lanes).  Column shifts via 0/1
    # selector matmuls; kernel-row shifts + channel mixing folded into m1.
    acc1 = None
    for dj in range(5):
        xs = jnp.dot(x, s1_ref[dj], preferred_element_type=f32)        # (28, 24)
        part = jnp.dot(m1_ref[dj], xs, preferred_element_type=f32)     # (144, 24)
        acc1 = part if acc1 is None else acc1 + part
    y1 = jnp.maximum(acc1 + b1_ref[...], 0.0)                          # (144, 24)

    # ---- 2x2 max-pool: even/odd row selections (matmul) + VPU max, then cols.
    r1 = jnp.maximum(jnp.dot(rp1_ref[0], y1, preferred_element_type=f32),
                     jnp.dot(rp1_ref[1], y1, preferred_element_type=f32))   # (72, 24)
    p1 = jnp.maximum(jnp.dot(r1, cp1_ref[0], preferred_element_type=f32),
                     jnp.dot(r1, cp1_ref[1], preferred_element_type=f32))   # (72, 12)

    # ---- conv2 (5x5, 6->16) + bias + ReLU, same scheme.
    acc2 = None
    for dj in range(5):
        ps = jnp.dot(p1, s2_ref[dj], preferred_element_type=f32)       # (72, 8)
        part = jnp.dot(m2_ref[dj], ps, preferred_element_type=f32)     # (128, 8)
        acc2 = part if acc2 is None else acc2 + part
    y2 = jnp.maximum(acc2 + b2_ref[...], 0.0)                          # (128, 8)

    # ---- 2x2 max-pool.
    r2 = jnp.maximum(jnp.dot(rp2_ref[0], y2, preferred_element_type=f32),
                     jnp.dot(rp2_ref[1], y2, preferred_element_type=f32))   # (64, 8)
    p2 = jnp.maximum(jnp.dot(r2, cp2_ref[0], preferred_element_type=f32),
                     jnp.dot(r2, cp2_ref[1], preferred_element_type=f32))   # (64, 4)

    # ---- fc1 + ReLU.  The torch (c, h, w) flatten is baked into a1 at trace
    # time; the contraction over the 4 pooled columns uses an iota mask + lane
    # reduction (no skinny N=1 matmuls).
    # TODO(synk): Dropout2d before the flatten treated as identity (eval mode).
    lane_w = lax.broadcasted_iota(jnp.int32, (64, 4), 1)
    h4 = None
    for w in range(4):
        g = jnp.dot(a1_ref[w], p2, preferred_element_type=f32)         # (64, 4)
        g = jnp.where(lane_w == w, g, 0.0)
        h4 = g if h4 is None else h4 + g
    h = jnp.sum(h4, axis=1, keepdims=True)                             # (64, 1)
    h = jnp.maximum(h + bf1_ref[...], 0.0)

    # ---- fc2 (2 outputs): elementwise mul + cross-sublane (XLU) reductions.
    t0 = jnp.sum(wf2_ref[0] * h, axis=0, keepdims=True) + bf2_ref[0]   # (1, 1)
    t1 = jnp.sum(wf2_ref[1] * h, axis=0, keepdims=True) + bf2_ref[1]   # (1, 1)

    # ---- quantum head: <Z> of |0> -H- RY(t0) - RX(t1)  =  -sin(t0)*cos(t1).
    z = -jnp.sin(t0) * jnp.cos(t1)                                     # (1, 1)

    # torch.cat((x, 1 - x), -1).unsqueeze(0)  ->  [[z, 1 - z]]
    lane = lax.broadcasted_iota(jnp.int32, (1, 2), 1)
    o_ref[...] = jnp.where(lane == 0, z, 1.0 - z)


# ------------------- trace-time constant selector builders ------------------

def _conv_row_selector(h_out, k, h_in):
    """T[i, d, r] = 1 iff r == i + d  (folds the kernel-row shift into matmul)."""
    t = np.zeros((h_out, k, h_in), np.float32)
    for i in range(h_out):
        for d in range(k):
            t[i, d, i + d] = 1.0
    return t


def _col_shift_selectors(w_in, k, w_out):
    """S[dj][j_in, j_out] = 1 iff j_in == j_out + dj  (x @ S[dj] shifts cols)."""
    s = np.zeros((k, w_in, w_out), np.float32)
    for dj in range(k):
        for j in range(w_out):
            s[dj, j + dj, j] = 1.0
    return s


def _pool_row_selectors(channels, h_in):
    """Even/odd row selectors for a 2x2 pool on a (channels*h_in, W) map."""
    h_out = h_in // 2
    sel = np.zeros((2, channels * h_out, channels * h_in), np.float32)
    for c in range(channels):
        for i in range(h_out):
            sel[0, c * h_out + i, c * h_in + 2 * i] = 1.0
            sel[1, c * h_out + i, c * h_in + 2 * i + 1] = 1.0
    return sel


def _pool_col_selectors(w_in):
    w_out = w_in // 2
    sel = np.zeros((2, w_in, w_out), np.float32)
    for j in range(w_out):
        sel[0, 2 * j, j] = 1.0
        sel[1, 2 * j + 1, j] = 1.0
    return sel


# --------------------------------- wrapper ----------------------------------

def net_forward(x_nchw, params):
    """Forward pass of Net (eval mode) as a single fused Pallas TPU kernel."""
    (w1, b1, w2, b2, wf1, bf1, wf2, bf2) = params
    x2d = x_nchw[0, 0].astype(jnp.float32)                         # (28, 28)

    # ---- trace-time constants (pure numpy) --------------------------------
    rowsel1 = jnp.asarray(_conv_row_selector(24, 5, 28))           # (24, 5, 28)
    rowsel2 = jnp.asarray(_conv_row_selector(8, 5, 12))            # (8, 5, 12)
    s1 = jnp.asarray(_col_shift_selectors(28, 5, 24))              # (5, 28, 24)
    s2 = jnp.asarray(_col_shift_selectors(12, 5, 8))               # (5, 12, 8)
    rp1 = jnp.asarray(_pool_row_selectors(6, 24))                  # (2, 72, 144)
    cp1 = jnp.asarray(_pool_col_selectors(24))                     # (2, 24, 12)
    rp2 = jnp.asarray(_pool_row_selectors(16, 8))                  # (2, 64, 128)
    cp2 = jnp.asarray(_pool_col_selectors(8))                      # (2, 8, 4)

    # ---- one-time weight repack (tiny XLA ops outside the kernel) ---------
    # m1[dj][c*24 + i, r] = w1[c, 0, r - i, dj]
    m1 = jnp.einsum('cdj,idr->jcir', w1[:, 0], rowsel1).reshape(5, 6 * 24, 28)
    # m2[dj][o*8 + i, ci*12 + r] = w2[o, ci, r - i, dj]
    m2 = jnp.einsum('ocdj,idr->joicr', w2, rowsel2).reshape(5, 16 * 8, 6 * 12)
    b1col = jnp.repeat(b1, 24).reshape(144, 1)
    b2col = jnp.repeat(b2, 8).reshape(128, 1)
    # a1[w][o, c*4 + h] = wf1[o, c*16 + h*4 + w]   (torch flatten baked in)
    a1 = jnp.transpose(wf1.reshape(64, 16, 4, 4), (3, 0, 1, 2)).reshape(4, 64, 64)
    bf1col = bf1.reshape(64, 1)
    wf2cols = wf2.reshape(2, 64, 1)                                # fc2 rows as columns
    bf2cols = bf2.reshape(2, 1, 1)

    vmem = lambda: pl.BlockSpec(memory_space=pltpu.MemorySpace.VMEM)
    return pl.pallas_call(
        _net_kernel,
        out_shape=jax.ShapeDtypeStruct((1, 2), jnp.float32),
        in_specs=[vmem() for _ in range(15)],
        out_specs=vmem(),
    )(x2d, m1, s1, b1col, rp1, cp1, m2, s2, b2col, rp2, cp2,
      a1, bf1col, wf2cols, bf2cols)


# ------------------------------ pure-JAX reference ---------------------------

def reference_forward(x_nchw, params):
    """Pure-JAX reference reproducing Net.forward (eval mode)."""
    (w1, b1, w2, b2, wf1, bf1, wf2, bf2) = params
    dn = ('NCHW', 'OIHW', 'NCHW')
    y = lax.conv_general_dilated(x_nchw, w1, (1, 1), 'VALID', dimension_numbers=dn)
    y = jnp.maximum(y + b1[None, :, None, None], 0.0)
    y = lax.reduce_window(y, -jnp.inf, lax.max, (1, 1, 2, 2), (1, 1, 2, 2), 'VALID')
    y = lax.conv_general_dilated(y, w2, (1, 1), 'VALID', dimension_numbers=dn)
    y = jnp.maximum(y + b2[None, :, None, None], 0.0)
    y = lax.reduce_window(y, -jnp.inf, lax.max, (1, 1, 2, 2), (1, 1, 2, 2), 'VALID')
    v = y.reshape(1, -1)
    h = jnp.maximum(v @ wf1.T + bf1, 0.0)
    t = (h @ wf2.T + bf2).reshape(-1)
    z = -jnp.sin(t[0]) * jnp.cos(t[1])
    return jnp.stack([z, 1.0 - z]).reshape(1, 2)


# ----------------------------------- main ------------------------------------

def _make_params(key):
    ks = jax.random.split(key, 8)

    def u(k, shape, fan_in):
        b = 1.0 / np.sqrt(fan_in)
        return jax.random.uniform(k, shape, jnp.float32, -b, b)

    w1 = u(ks[0], (6, 1, 5, 5), 25)      # Conv2d(1, 6, 5)
    b1 = u(ks[1], (6,), 25)
    w2 = u(ks[2], (16, 6, 5, 5), 150)    # Conv2d(6, 16, 5)
    b2 = u(ks[3], (16,), 150)
    wf1 = u(ks[4], (64, 256), 256)       # Linear(256, 64)
    bf1 = u(ks[5], (64,), 256)
    wf2 = u(ks[6], (2, 64), 64)          # Linear(64, 2)
    bf2 = u(ks[7], (2,), 64)
    return (w1, b1, w2, b2, wf1, bf1, wf2, bf2)


if __name__ == "__main__":
    root = jax.random.PRNGKey(0)
    k_params, k_x = jax.random.split(root)
    params = _make_params(k_params)
    x = jax.random.normal(k_x, (1, 1, 28, 28), jnp.float32)

    out = jax.block_until_ready(jax.jit(net_forward)(x, params))
    ref = jax.block_until_ready(reference_forward(x, params))

    assert out.shape == (1, 2), f"bad output shape {out.shape}"
    if not np.allclose(np.asarray(out), np.asarray(ref), atol=3e-2, rtol=3e-2):
        raise AssertionError(f"mismatch: pallas={np.asarray(out)} ref={np.asarray(ref)}")
    print("KERNEL_OK")
</pallas_src>

<mosaic_0001>
module attributes {stable_mosaic.version = 11 : i64} {
  func.func @_net_kernel(%arg0: memref<28x28xf32, #tpu.memory_space<vmem>>, %arg1: memref<5x144x28xf32, #tpu.memory_space<vmem>>, %arg2: memref<5x28x24xf32, #tpu.memory_space<vmem>>, %arg3: memref<144x1xf32, #tpu.memory_space<vmem>>, %arg4: memref<2x72x144xf32, #tpu.memory_space<vmem>>, %arg5: memref<2x24x12xf32, #tpu.memory_space<vmem>>, %arg6: memref<5x128x72xf32, #tpu.memory_space<vmem>>, %arg7: memref<5x12x8xf32, #tpu.memory_space<vmem>>, %arg8: memref<128x1xf32, #tpu.memory_space<vmem>>, %arg9: memref<2x64x128xf32, #tpu.memory_space<vmem>>, %arg10: memref<2x8x4xf32, #tpu.memory_space<vmem>>, %arg11: memref<4x64x64xf32, #tpu.memory_space<vmem>>, %arg12: memref<64x1xf32, #tpu.memory_space<vmem>>, %arg13: memref<2x64x1xf32, #tpu.memory_space<vmem>>, %arg14: memref<2x1x1xf32, #tpu.memory_space<vmem>>, %arg15: memref<1x2xf32, #tpu.memory_space<vmem>>) attributes {dimension_semantics = [], scalar_prefetch = 0 : i64, scratch_operands = 0 : i64, tpu.core_type = #tpu.core_type<tc>} {
    %c0 = arith.constant 0 : index
    %c0_0 = arith.constant 0 : index
    %0 = vector.load %arg0[%c0, %c0_0] : memref<28x28xf32, #tpu.memory_space<vmem>>, vector<28x28xf32>
    %c0_1 = arith.constant 0 : index
    %c0_2 = arith.constant 0 : index
    %c0_3 = arith.constant 0 : index
    %1 = vector.load %arg2[%c0_1, %c0_2, %c0_3] : memref<5x28x24xf32, #tpu.memory_space<vmem>>, vector<1x28x24xf32>
    %2 = vector.shape_cast %1 : vector<1x28x24xf32> to vector<28x24xf32>
    %cst = arith.constant dense<0.000000e+00> : vector<28x24xf32>
    %3 = tpu.matmul %0, %2, %cst {dimension_numbers = #tpu.dot_dimension_numbers<[1], [0], [0], [1], [0, 0, 1, 1], [], []>} : vector<28x28xf32>, vector<28x24xf32>, vector<28x24xf32> -> vector<28x24xf32>
    %c0_4 = arith.constant 0 : index
    %c0_5 = arith.constant 0 : index
    %c0_6 = arith.constant 0 : index
    %4 = vector.load %arg1[%c0_4, %c0_5, %c0_6] : memref<5x144x28xf32, #tpu.memory_space<vmem>>, vector<1x144x28xf32>
    %5 = vector.shape_cast %4 : vector<1x144x28xf32> to vector<144x28xf32>
    %cst_7 = arith.constant dense<0.000000e+00> : vector<144x24xf32>
    %6 = tpu.matmul %5, %3, %cst_7 {dimension_numbers = #tpu.dot_dimension_numbers<[1], [0], [0], [1], [0, 0, 1, 1], [], []>} : vector<144x28xf32>, vector<28x24xf32>, vector<144x24xf32> -> vector<144x24xf32>
    %c1 = arith.constant 1 : index
    %c0_8 = arith.constant 0 : index
    %c0_9 = arith.constant 0 : index
    %7 = vector.load %arg2[%c1, %c0_8, %c0_9] : memref<5x28x24xf32, #tpu.memory_space<vmem>>, vector<1x28x24xf32>
    %8 = vector.shape_cast %7 : vector<1x28x24xf32> to vector<28x24xf32>
    %cst_10 = arith.constant dense<0.000000e+00> : vector<28x24xf32>
    %9 = tpu.matmul %0, %8, %cst_10 {dimension_numbers = #tpu.dot_dimension_numbers<[1], [0], [0], [1], [0, 0, 1, 1], [], []>} : vector<28x28xf32>, vector<28x24xf32>, vector<28x24xf32> -> vector<28x24xf32>
    %c1_11 = arith.constant 1 : index
    %c0_12 = arith.constant 0 : index
    %c0_13 = arith.constant 0 : index
    %10 = vector.load %arg1[%c1_11, %c0_12, %c0_13] : memref<5x144x28xf32, #tpu.memory_space<vmem>>, vector<1x144x28xf32>
    %11 = vector.shape_cast %10 : vector<1x144x28xf32> to vector<144x28xf32>
    %cst_14 = arith.constant dense<0.000000e+00> : vector<144x24xf32>
    %12 = tpu.matmul %11, %9, %cst_14 {dimension_numbers = #tpu.dot_dimension_numbers<[1], [0], [0], [1], [0, 0, 1, 1], [], []>} : vector<144x28xf32>, vector<28x24xf32>, vector<144x24xf32> -> vector<144x24xf32>
    %13 = arith.addf %6, %12 : vector<144x24xf32>
    %c2 = arith.constant 2 : index
    %c0_15 = arith.constant 0 : index
    %c0_16 = arith.constant 0 : index
    %14 = vector.load %arg2[%c2, %c0_15, %c0_16] : memref<5x28x24xf32, #tpu.memory_space<vmem>>, vector<1x28x24xf32>
    %15 = vector.shape_cast %14 : vector<1x28x24xf32> to vector<28x24xf32>
    %cst_17 = arith.constant dense<0.000000e+00> : vector<28x24xf32>
    %16 = tpu.matmul %0, %15, %cst_17 {dimension_numbers = #tpu.dot_dimension_numbers<[1], [0], [0], [1], [0, 0, 1, 1], [], []>} : vector<28x28xf32>, vector<28x24xf32>, vector<28x24xf32> -> vector<28x24xf32>
    %c2_18 = arith.constant 2 : index
    %c0_19 = arith.constant 0 : index
    %c0_20 = arith.constant 0 : index
    %17 = vector.load %arg1[%c2_18, %c0_19, %c0_20] : memref<5x144x28xf32, #tpu.memory_space<vmem>>, vector<1x144x28xf32>
    %18 = vector.shape_cast %17 : vector<1x144x28xf32> to vector<144x28xf32>
    %cst_21 = arith.constant dense<0.000000e+00> : vector<144x24xf32>
    %19 = tpu.matmul %18, %16, %cst_21 {dimension_numbers = #tpu.dot_dimension_numbers<[1], [0], [0], [1], [0, 0, 1, 1], [], []>} : vector<144x28xf32>, vector<28x24xf32>, vector<144x24xf32> -> vector<144x24xf32>
    %20 = arith.addf %13, %19 : vector<144x24xf32>
    %c3 = arith.constant 3 : index
    %c0_22 = arith.constant 0 : index
    %c0_23 = arith.constant 0 : index
    %21 = vector.load %arg2[%c3, %c0_22, %c0_23] : memref<5x28x24xf32, #tpu.memory_space<vmem>>, vector<1x28x24xf32>
    %22 = vector.shape_cast %21 : vector<1x28x24xf32> to vector<28x24xf32>
    %cst_24 = arith.constant dense<0.000000e+00> : vector<28x24xf32>
    %23 = tpu.matmul %0, %22, %cst_24 {dimension_numbers = #tpu.dot_dimension_numbers<[1], [0], [0], [1], [0, 0, 1, 1], [], []>} : vector<28x28xf32>, vector<28x24xf32>, vector<28x24xf32> -> vector<28x24xf32>
    %c3_25 = arith.constant 3 : index
    %c0_26 = arith.constant 0 : index
    %c0_27 = arith.constant 0 : index
    %24 = vector.load %arg1[%c3_25, %c0_26, %c0_27] : memref<5x144x28xf32, #tpu.memory_space<vmem>>, vector<1x144x28xf32>
    %25 = vector.shape_cast %24 : vector<1x144x28xf32> to vector<144x28xf32>
    %cst_28 = arith.constant dense<0.000000e+00> : vector<144x24xf32>
    %26 = tpu.matmul %25, %23, %cst_28 {dimension_numbers = #tpu.dot_dimension_numbers<[1], [0], [0], [1], [0, 0, 1, 1], [], []>} : vector<144x28xf32>, vector<28x24xf32>, vector<144x24xf32> -> vector<144x24xf32>
    %27 = arith.addf %20, %26 : vector<144x24xf32>
    %c4 = arith.constant 4 : index
    %c0_29 = arith.constant 0 : index
    %c0_30 = arith.constant 0 : index
    %28 = vector.load %arg2[%c4, %c0_29, %c0_30] : memref<5x28x24xf32, #tpu.memory_space<vmem>>, vector<1x28x24xf32>
    %29 = vector.shape_cast %28 : vector<1x28x24xf32> to vector<28x24xf32>
    %cst_31 = arith.constant dense<0.000000e+00> : vector<28x24xf32>
    %30 = tpu.matmul %0, %29, %cst_31 {dimension_numbers = #tpu.dot_dimension_numbers<[1], [0], [0], [1], [0, 0, 1, 1], [], []>} : vector<28x28xf32>, vector<28x24xf32>, vector<28x24xf32> -> vector<28x24xf32>
    %c4_32 = arith.constant 4 : index
    %c0_33 = arith.constant 0 : index
    %c0_34 = arith.constant 0 : index
    %31 = vector.load %arg1[%c4_32, %c0_33, %c0_34] : memref<5x144x28xf32, #tpu.memory_space<vmem>>, vector<1x144x28xf32>
    %32 = vector.shape_cast %31 : vector<1x144x28xf32> to vector<144x28xf32>
    %cst_35 = arith.constant dense<0.000000e+00> : vector<144x24xf32>
    %33 = tpu.matmul %32, %30, %cst_35 {dimension_numbers = #tpu.dot_dimension_numbers<[1], [0], [0], [1], [0, 0, 1, 1], [], []>} : vector<144x28xf32>, vector<28x24xf32>, vector<144x24xf32> -> vector<144x24xf32>
    %34 = arith.addf %27, %33 : vector<144x24xf32>
    %c0_36 = arith.constant 0 : index
    %c0_37 = arith.constant 0 : index
    %35 = vector.load %arg3[%c0_36, %c0_37] : memref<144x1xf32, #tpu.memory_space<vmem>>, vector<144x1xf32>
    %36 = vector.broadcast %35 : vector<144x1xf32> to vector<144x24xf32>
    %37 = arith.addf %34, %36 : vector<144x24xf32>
    %cst_38 = arith.constant 0.000000e+00 : f32
    %38 = vector.broadcast %cst_38 : f32 to vector<144x24xf32>
    %39 = arith.maximumf %37, %38 : vector<144x24xf32>
    %c0_39 = arith.constant 0 : index
    %c0_40 = arith.constant 0 : index
    %c0_41 = arith.constant 0 : index
    %40 = vector.load %arg4[%c0_39, %c0_40, %c0_41] : memref<2x72x144xf32, #tpu.memory_space<vmem>>, vector<1x72x144xf32>
    %41 = vector.shape_cast %40 : vector<1x72x144xf32> to vector<72x144xf32>
    %cst_42 = arith.constant dense<0.000000e+00> : vector<72x24xf32>
    %42 = tpu.matmul %41, %39, %cst_42 {dimension_numbers = #tpu.dot_dimension_numbers<[1], [0], [0], [1], [0, 0, 1, 1], [], []>} : vector<72x144xf32>, vector<144x24xf32>, vector<72x24xf32> -> vector<72x24xf32>
    %c1_43 = arith.constant 1 : index
    %c0_44 = arith.constant 0 : index
    %c0_45 = arith.constant 0 : index
    %43 = vector.load %arg4[%c1_43, %c0_44, %c0_45] : memref<2x72x144xf32, #tpu.memory_space<vmem>>, vector<1x72x144xf32>
    %44 = vector.shape_cast %43 : vector<1x72x144xf32> to vector<72x144xf32>
    %cst_46 = arith.constant dense<0.000000e+00> : vector<72x24xf32>
    %45 = tpu.matmul %44, %39, %cst_46 {dimension_numbers = #tpu.dot_dimension_numbers<[1], [0], [0], [1], [0, 0, 1, 1], [], []>} : vector<72x144xf32>, vector<144x24xf32>, vector<72x24xf32> -> vector<72x24xf32>
    %46 = arith.maximumf %42, %45 : vector<72x24xf32>
    %c0_47 = arith.constant 0 : index
    %c0_48 = arith.constant 0 : index
    %c0_49 = arith.constant 0 : index
    %47 = vector.load %arg5[%c0_47, %c0_48, %c0_49] : memref<2x24x12xf32, #tpu.memory_space<vmem>>, vector<1x24x12xf32>
    %48 = vector.shape_cast %47 : vector<1x24x12xf32> to vector<24x12xf32>
    %cst_50 = arith.constant dense<0.000000e+00> : vector<72x12xf32>
    %49 = tpu.matmul %46, %48, %cst_50 {dimension_numbers = #tpu.dot_dimension_numbers<[1], [0], [0], [1], [0, 0, 1, 1], [], []>} : vector<72x24xf32>, vector<24x12xf32>, vector<72x12xf32> -> vector<72x12xf32>
    %c1_51 = arith.constant 1 : index
    %c0_52 = arith.constant 0 : index
    %c0_53 = arith.constant 0 : index
    %50 = vector.load %arg5[%c1_51, %c0_52, %c0_53] : memref<2x24x12xf32, #tpu.memory_space<vmem>>, vector<1x24x12xf32>
    %51 = vector.shape_cast %50 : vector<1x24x12xf32> to vector<24x12xf32>
    %cst_54 = arith.constant dense<0.000000e+00> : vector<72x12xf32>
    %52 = tpu.matmul %46, %51, %cst_54 {dimension_numbers = #tpu.dot_dimension_numbers<[1], [0], [0], [1], [0, 0, 1, 1], [], []>} : vector<72x24xf32>, vector<24x12xf32>, vector<72x12xf32> -> vector<72x12xf32>
    %53 = arith.maximumf %49, %52 : vector<72x12xf32>
    %c0_55 = arith.constant 0 : index
    %c0_56 = arith.constant 0 : index
    %c0_57 = arith.constant 0 : index
    %54 = vector.load %arg7[%c0_55, %c0_56, %c0_57] : memref<5x12x8xf32, #tpu.memory_space<vmem>>, vector<1x12x8xf32>
    %55 = vector.shape_cast %54 : vector<1x12x8xf32> to vector<12x8xf32>
    %cst_58 = arith.constant dense<0.000000e+00> : vector<72x8xf32>
    %56 = tpu.matmul %53, %55, %cst_58 {dimension_numbers = #tpu.dot_dimension_numbers<[1], [0], [0], [1], [0, 0, 1, 1], [], []>} : vector<72x12xf32>, vector<12x8xf32>, vector<72x8xf32> -> vector<72x8xf32>
    %c0_59 = arith.constant 0 : index
    %c0_60 = arith.constant 0 : index
    %c0_61 = arith.constant 0 : index
    %57 = vector.load %arg6[%c0_59, %c0_60, %c0_61] : memref<5x128x72xf32, #tpu.memory_space<vmem>>, vector<1x128x72xf32>
    %58 = vector.shape_cast %57 : vector<1x128x72xf32> to vector<128x72xf32>
    %cst_62 = arith.constant dense<0.000000e+00> : vector<128x8xf32>
    %59 = tpu.matmul %58, %56, %cst_62 {dimension_numbers = #tpu.dot_dimension_numbers<[1], [0], [0], [1], [0, 0, 1, 1], [], []>} : vector<128x72xf32>, vector<72x8xf32>, vector<128x8xf32> -> vector<128x8xf32>
    %c1_63 = arith.constant 1 : index
    %c0_64 = arith.constant 0 : index
    %c0_65 = arith.constant 0 : index
    %60 = vector.load %arg7[%c1_63, %c0_64, %c0_65] : memref<5x12x8xf32, #tpu.memory_space<vmem>>, vector<1x12x8xf32>
    %61 = vector.shape_cast %60 : vector<1x12x8xf32> to vector<12x8xf32>
    %cst_66 = arith.constant dense<0.000000e+00> : vector<72x8xf32>
    %62 = tpu.matmul %53, %61, %cst_66 {dimension_numbers = #tpu.dot_dimension_numbers<[1], [0], [0], [1], [0, 0, 1, 1], [], []>} : vector<72x12xf32>, vector<12x8xf32>, vector<72x8xf32> -> vector<72x8xf32>
    %c1_67 = arith.constant 1 : index
    %c0_68 = arith.constant 0 : index
    %c0_69 = arith.constant 0 : index
    %63 = vector.load %arg6[%c1_67, %c0_68, %c0_69] : memref<5x128x72xf32, #tpu.memory_space<vmem>>, vector<1x128x72xf32>
    %64 = vector.shape_cast %63 : vector<1x128x72xf32> to vector<128x72xf32>
    %cst_70 = arith.constant dense<0.000000e+00> : vector<128x8xf32>
    %65 = tpu.matmul %64, %62, %cst_70 {dimension_numbers = #tpu.dot_dimension_numbers<[1], [0], [0], [1], [0, 0, 1, 1], [], []>} : vector<128x72xf32>, vector<72x8xf32>, vector<128x8xf32> -> vector<128x8xf32>
    %66 = arith.addf %59, %65 : vector<128x8xf32>
    %c2_71 = arith.constant 2 : index
    %c0_72 = arith.constant 0 : index
    %c0_73 = arith.constant 0 : index
    %67 = vector.load %arg7[%c2_71, %c0_72, %c0_73] : memref<5x12x8xf32, #tpu.memory_space<vmem>>, vector<1x12x8xf32>
    %68 = vector.shape_cast %67 : vector<1x12x8xf32> to vector<12x8xf32>
    %cst_74 = arith.constant dense<0.000000e+00> : vector<72x8xf32>
    %69 = tpu.matmul %53, %68, %cst_74 {dimension_numbers = #tpu.dot_dimension_numbers<[1], [0], [0], [1], [0, 0, 1, 1], [], []>} : vector<72x12xf32>, vector<12x8xf32>, vector<72x8xf32> -> vector<72x8xf32>
    %c2_75 = arith.constant 2 : index
    %c0_76 = arith.constant 0 : index
    %c0_77 = arith.constant 0 : index
    %70 = vector.load %arg6[%c2_75, %c0_76, %c0_77] : memref<5x128x72xf32, #tpu.memory_space<vmem>>, vector<1x128x72xf32>
    %71 = vector.shape_cast %70 : vector<1x128x72xf32> to vector<128x72xf32>
    %cst_78 = arith.constant dense<0.000000e+00> : vector<128x8xf32>
    %72 = tpu.matmul %71, %69, %cst_78 {dimension_numbers = #tpu.dot_dimension_numbers<[1], [0], [0], [1], [0, 0, 1, 1], [], []>} : vector<128x72xf32>, vector<72x8xf32>, vector<128x8xf32> -> vector<128x8xf32>
    %73 = arith.addf %66, %72 : vector<128x8xf32>
    %c3_79 = arith.constant 3 : index
    %c0_80 = arith.constant 0 : index
    %c0_81 = arith.constant 0 : index
    %74 = vector.load %arg7[%c3_79, %c0_80, %c0_81] : memref<5x12x8xf32, #tpu.memory_space<vmem>>, vector<1x12x8xf32>
    %75 = vector.shape_cast %74 : vector<1x12x8xf32> to vector<12x8xf32>
    %cst_82 = arith.constant dense<0.000000e+00> : vector<72x8xf32>
    %76 = tpu.matmul %53, %75, %cst_82 {dimension_numbers = #tpu.dot_dimension_numbers<[1], [0], [0], [1], [0, 0, 1, 1], [], []>} : vector<72x12xf32>, vector<12x8xf32>, vector<72x8xf32> -> vector<72x8xf32>
    %c3_83 = arith.constant 3 : index
    %c0_84 = arith.constant 0 : index
    %c0_85 = arith.constant 0 : index
    %77 = vector.load %arg6[%c3_83, %c0_84, %c0_85] : memref<5x128x72xf32, #tpu.memory_space<vmem>>, vector<1x128x72xf32>
    %78 = vector.shape_cast %77 : vector<1x128x72xf32> to vector<128x72xf32>
    %cst_86 = arith.constant dense<0.000000e+00> : vector<128x8xf32>
    %79 = tpu.matmul %78, %76, %cst_86 {dimension_numbers = #tpu.dot_dimension_numbers<[1], [0], [0], [1], [0, 0, 1, 1], [], []>} : vector<128x72xf32>, vector<72x8xf32>, vector<128x8xf32> -> vector<128x8xf32>
    %80 = arith.addf %73, %79 : vector<128x8xf32>
    %c4_87 = arith.constant 4 : index
    %c0_88 = arith.constant 0 : index
    %c0_89 = arith.constant 0 : index
    %81 = vector.load %arg7[%c4_87, %c0_88, %c0_89] : memref<5x12x8xf32, #tpu.memory_space<vmem>>, vector<1x12x8xf32>
    %82 = vector.shape_cast %81 : vector<1x12x8xf32> to vector<12x8xf32>
    %cst_90 = arith.constant dense<0.000000e+00> : vector<72x8xf32>
    %83 = tpu.matmul %53, %82, %cst_90 {dimension_numbers = #tpu.dot_dimension_numbers<[1], [0], [0], [1], [0, 0, 1, 1], [], []>} : vector<72x12xf32>, vector<12x8xf32>, vector<72x8xf32> -> vector<72x8xf32>
    %c4_91 = arith.constant 4 : index
    %c0_92 = arith.constant 0 : index
    %c0_93 = arith.constant 0 : index
    %84 = vector.load %arg6[%c4_91, %c0_92, %c0_93] : memref<5x128x72xf32, #tpu.memory_space<vmem>>, vector<1x128x72xf32>
    %85 = vector.shape_cast %84 : vector<1x128x72xf32> to vector<128x72xf32>
    %cst_94 = arith.constant dense<0.000000e+00> : vector<128x8xf32>
    %86 = tpu.matmul %85, %83, %cst_94 {dimension_numbers = #tpu.dot_dimension_numbers<[1], [0], [0], [1], [0, 0, 1, 1], [], []>} : vector<128x72xf32>, vector<72x8xf32>, vector<128x8xf32> -> vector<128x8xf32>
    %87 = arith.addf %80, %86 : vector<128x8xf32>
    %c0_95 = arith.constant 0 : index
    %c0_96 = arith.constant 0 : index
    %88 = vector.load %arg8[%c0_95, %c0_96] : memref<128x1xf32, #tpu.memory_space<vmem>>, vector<128x1xf32>
    %89 = vector.broadcast %88 : vector<128x1xf32> to vector<128x8xf32>
    %90 = arith.addf %87, %89 : vector<128x8xf32>
    %cst_97 = arith.constant 0.000000e+00 : f32
    %91 = vector.broadcast %cst_97 : f32 to vector<128x8xf32>
    %92 = arith.maximumf %90, %91 : vector<128x8xf32>
    %c0_98 = arith.constant 0 : index
    %c0_99 = arith.constant 0 : index
    %c0_100 = arith.constant 0 : index
    %93 = vector.load %arg9[%c0_98, %c0_99, %c0_100] : memref<2x64x128xf32, #tpu.memory_space<vmem>>, vector<1x64x128xf32>
    %94 = vector.shape_cast %93 : vector<1x64x128xf32> to vector<64x128xf32>
    %cst_101 = arith.constant dense<0.000000e+00> : vector<64x8xf32>
    %95 = tpu.matmul %94, %92, %cst_101 {dimension_numbers = #tpu.dot_dimension_numbers<[1], [0], [0], [1], [0, 0, 1, 1], [], []>} : vector<64x128xf32>, vector<128x8xf32>, vector<64x8xf32> -> vector<64x8xf32>
    %c1_102 = arith.constant 1 : index
    %c0_103 = arith.constant 0 : index
    %c0_104 = arith.constant 0 : index
    %96 = vector.load %arg9[%c1_102, %c0_103, %c0_104] : memref<2x64x128xf32, #tpu.memory_space<vmem>>, vector<1x64x128xf32>
    %97 = vector.shape_cast %96 : vector<1x64x128xf32> to vector<64x128xf32>
    %cst_105 = arith.constant dense<0.000000e+00> : vector<64x8xf32>
    %98 = tpu.matmul %97, %92, %cst_105 {dimension_numbers = #tpu.dot_dimension_numbers<[1], [0], [0], [1], [0, 0, 1, 1], [], []>} : vector<64x128xf32>, vector<128x8xf32>, vector<64x8xf32> -> vector<64x8xf32>
    %99 = arith.maximumf %95, %98 : vector<64x8xf32>
    %c0_106 = arith.constant 0 : index
    %c0_107 = arith.constant 0 : index
    %c0_108 = arith.constant 0 : index
    %100 = vector.load %arg10[%c0_106, %c0_107, %c0_108] : memref<2x8x4xf32, #tpu.memory_space<vmem>>, vector<1x8x4xf32>
    %101 = vector.shape_cast %100 : vector<1x8x4xf32> to vector<8x4xf32>
    %cst_109 = arith.constant dense<0.000000e+00> : vector<64x4xf32>
    %102 = tpu.matmul %99, %101, %cst_109 {dimension_numbers = #tpu.dot_dimension_numbers<[1], [0], [0], [1], [0, 0, 1, 1], [], []>} : vector<64x8xf32>, vector<8x4xf32>, vector<64x4xf32> -> vector<64x4xf32>
    %c1_110 = arith.constant 1 : index
    %c0_111 = arith.constant 0 : index
    %c0_112 = arith.constant 0 : index
    %103 = vector.load %arg10[%c1_110, %c0_111, %c0_112] : memref<2x8x4xf32, #tpu.memory_space<vmem>>, vector<1x8x4xf32>
    %104 = vector.shape_cast %103 : vector<1x8x4xf32> to vector<8x4xf32>
    %cst_113 = arith.constant dense<0.000000e+00> : vector<64x4xf32>
    %105 = tpu.matmul %99, %104, %cst_113 {dimension_numbers = #tpu.dot_dimension_numbers<[1], [0], [0], [1], [0, 0, 1, 1], [], []>} : vector<64x8xf32>, vector<8x4xf32>, vector<64x4xf32> -> vector<64x4xf32>
    %106 = arith.maximumf %102, %105 : vector<64x4xf32>
    %107 = tpu.iota {dimensions = array<i32: 1>} : vector<64x4xi32>
    %c0_114 = arith.constant 0 : index
    %c0_115 = arith.constant 0 : index
    %c0_116 = arith.constant 0 : index
    %108 = vector.load %arg11[%c0_114, %c0_115, %c0_116] : memref<4x64x64xf32, #tpu.memory_space<vmem>>, vector<1x64x64xf32>
    %109 = vector.shape_cast %108 : vector<1x64x64xf32> to vector<64x64xf32>
    %cst_117 = arith.constant dense<0.000000e+00> : vector<64x4xf32>
    %110 = tpu.matmul %109, %106, %cst_117 {dimension_numbers = #tpu.dot_dimension_numbers<[1], [0], [0], [1], [0, 0, 1, 1], [], []>} : vector<64x64xf32>, vector<64x4xf32>, vector<64x4xf32> -> vector<64x4xf32>
    %c0_i32 = arith.constant 0 : i32
    %111 = vector.broadcast %c0_i32 : i32 to vector<64x4xi32>
    %112 = arith.cmpi eq, %107, %111 : vector<64x4xi32>
    %cst_118 = arith.constant 0.000000e+00 : f32
    %113 = vector.broadcast %cst_118 : f32 to vector<64x4xf32>
    %114 = arith.select %112, %110, %113 : vector<64x4xi1>, vector<64x4xf32>
    %c1_119 = arith.constant 1 : index
    %c0_120 = arith.constant 0 : index
    %c0_121 = arith.constant 0 : index
    %115 = vector.load %arg11[%c1_119, %c0_120, %c0_121] : memref<4x64x64xf32, #tpu.memory_space<vmem>>, vector<1x64x64xf32>
    %116 = vector.shape_cast %115 : vector<1x64x64xf32> to vector<64x64xf32>
    %cst_122 = arith.constant dense<0.000000e+00> : vector<64x4xf32>
    %117 = tpu.matmul %116, %106, %cst_122 {dimension_numbers = #tpu.dot_dimension_numbers<[1], [0], [0], [1], [0, 0, 1, 1], [], []>} : vector<64x64xf32>, vector<64x4xf32>, vector<64x4xf32> -> vector<64x4xf32>
    %c1_i32 = arith.constant 1 : i32
    %118 = vector.broadcast %c1_i32 : i32 to vector<64x4xi32>
    %119 = arith.cmpi eq, %107, %118 : vector<64x4xi32>
    %cst_123 = arith.constant 0.000000e+00 : f32
    %120 = vector.broadcast %cst_123 : f32 to vector<64x4xf32>
    %121 = arith.select %119, %117, %120 : vector<64x4xi1>, vector<64x4xf32>
    %122 = arith.addf %114, %121 : vector<64x4xf32>
    %c2_124 = arith.constant 2 : index
    %c0_125 = arith.constant 0 : index
    %c0_126 = arith.constant 0 : index
    %123 = vector.load %arg11[%c2_124, %c0_125, %c0_126] : memref<4x64x64xf32, #tpu.memory_space<vmem>>, vector<1x64x64xf32>
    %124 = vector.shape_cast %123 : vector<1x64x64xf32> to vector<64x64xf32>
    %cst_127 = arith.constant dense<0.000000e+00> : vector<64x4xf32>
    %125 = tpu.matmul %124, %106, %cst_127 {dimension_numbers = #tpu.dot_dimension_numbers<[1], [0], [0], [1], [0, 0, 1, 1], [], []>} : vector<64x64xf32>, vector<64x4xf32>, vector<64x4xf32> -> vector<64x4xf32>
    %c2_i32 = arith.constant 2 : i32
    %126 = vector.broadcast %c2_i32 : i32 to vector<64x4xi32>
    %127 = arith.cmpi eq, %107, %126 : vector<64x4xi32>
    %cst_128 = arith.constant 0.000000e+00 : f32
    %128 = vector.broadcast %cst_128 : f32 to vector<64x4xf32>
    %129 = arith.select %127, %125, %128 : vector<64x4xi1>, vector<64x4xf32>
    %130 = arith.addf %122, %129 : vector<64x4xf32>
    %c3_129 = arith.constant 3 : index
    %c0_130 = arith.constant 0 : index
    %c0_131 = arith.constant 0 : index
    %131 = vector.load %arg11[%c3_129, %c0_130, %c0_131] : memref<4x64x64xf32, #tpu.memory_space<vmem>>, vector<1x64x64xf32>
    %132 = vector.shape_cast %131 : vector<1x64x64xf32> to vector<64x64xf32>
    %cst_132 = arith.constant dense<0.000000e+00> : vector<64x4xf32>
    %133 = tpu.matmul %132, %106, %cst_132 {dimension_numbers = #tpu.dot_dimension_numbers<[1], [0], [0], [1], [0, 0, 1, 1], [], []>} : vector<64x64xf32>, vector<64x4xf32>, vector<64x4xf32> -> vector<64x4xf32>
    %c3_i32 = arith.constant 3 : i32
    %134 = vector.broadcast %c3_i32 : i32 to vector<64x4xi32>
    %135 = arith.cmpi eq, %107, %134 : vector<64x4xi32>
    %cst_133 = arith.constant 0.000000e+00 : f32
    %136 = vector.broadcast %cst_133 : f32 to vector<64x4xf32>
    %137 = arith.select %135, %133, %136 : vector<64x4xi1>, vector<64x4xf32>
    %138 = arith.addf %130, %137 : vector<64x4xf32>
    %cst_134 = arith.constant dense<0.000000e+00> : vector<64xf32>
    %139 = vector.multi_reduction <add>, %138, %cst_134 [1] : vector<64x4xf32> to vector<64xf32>
    %140 = vector.shape_cast %139 : vector<64xf32> to vector<64x1xf32>
    %c0_135 = arith.constant 0 : index
    %c0_136 = arith.constant 0 : index
    %141 = vector.load %arg12[%c0_135, %c0_136] : memref<64x1xf32, #tpu.memory_space<vmem>>, vector<64x1xf32>
    %142 = arith.addf %140, %141 : vector<64x1xf32>
    %cst_137 = arith.constant 0.000000e+00 : f32
    %143 = vector.broadcast %cst_137 : f32 to vector<64x1xf32>
    %144 = arith.maximumf %142, %143 : vector<64x1xf32>
    %c0_138 = arith.constant 0 : index
    %c0_139 = arith.constant 0 : index
    %c0_140 = arith.constant 0 : index
    %145 = vector.load %arg13[%c0_138, %c0_139, %c0_140] : memref<2x64x1xf32, #tpu.memory_space<vmem>>, vector<1x64x1xf32>
    %146 = vector.shape_cast %145 : vector<1x64x1xf32> to vector<64x1xf32>
    %147 = arith.mulf %146, %144 : vector<64x1xf32>
    %cst_141 = arith.constant dense<0.000000e+00> : vector<1xf32>
    %148 = vector.multi_reduction <add>, %147, %cst_141 [0] : vector<64x1xf32> to vector<1xf32>
    %149 = vector.shape_cast %148 : vector<1xf32> to vector<1x1xf32>
    %c0_142 = arith.constant 0 : index
    %c0_143 = arith.constant 0 : index
    %c0_144 = arith.constant 0 : index
    %150 = vector.load %arg14[%c0_142, %c0_143, %c0_144] : memref<2x1x1xf32, #tpu.memory_space<vmem>>, vector<1x1x1xf32>
    %151 = vector.shape_cast %150 : vector<1x1x1xf32> to vector<1x1xf32>
    %152 = arith.addf %149, %151 : vector<1x1xf32>
    %c1_145 = arith.constant 1 : index
    %c0_146 = arith.constant 0 : index
    %c0_147 = arith.constant 0 : index
    %153 = vector.load %arg13[%c1_145, %c0_146, %c0_147] : memref<2x64x1xf32, #tpu.memory_space<vmem>>, vector<1x64x1xf32>
    %154 = vector.shape_cast %153 : vector<1x64x1xf32> to vector<64x1xf32>
    %155 = arith.mulf %154, %144 : vector<64x1xf32>
    %cst_148 = arith.constant dense<0.000000e+00> : vector<1xf32>
    %156 = vector.multi_reduction <add>, %155, %cst_148 [0] : vector<64x1xf32> to vector<1xf32>
    %157 = vector.shape_cast %156 : vector<1xf32> to vector<1x1xf32>
    %c1_149 = arith.constant 1 : index
    %c0_150 = arith.constant 0 : index
    %c0_151 = arith.constant 0 : index
    %158 = vector.load %arg14[%c1_149, %c0_150, %c0_151] : memref<2x1x1xf32, #tpu.memory_space<vmem>>, vector<1x1x1xf32>
    %159 = vector.shape_cast %158 : vector<1x1x1xf32> to vector<1x1xf32>
    %160 = arith.addf %157, %159 : vector<1x1xf32>
    %161 = math.sin %152 : vector<1x1xf32>
    %cst_152 = arith.constant 0.000000e+00 : f32
    %162 = vector.broadcast %cst_152 : f32 to vector<1x1xf32>
    %163 = arith.subf %162, %161 : vector<1x1xf32>
    %164 = math.cos %160 : vector<1x1xf32>
    %165 = arith.mulf %163, %164 : vector<1x1xf32>
    %166 = tpu.iota {dimensions = array<i32: 1>} : vector<1x2xi32>
    %c0_i32_153 = arith.constant 0 : i32
    %167 = vector.broadcast %c0_i32_153 : i32 to vector<1x2xi32>
    %168 = arith.cmpi eq, %166, %167 : vector<1x2xi32>
    %cst_154 = arith.constant 1.000000e+00 : f32
    %169 = vector.broadcast %cst_154 : f32 to vector<1x1xf32>
    %170 = arith.subf %169, %165 : vector<1x1xf32>
    %171 = vector.shape_cast %165 : vector<1x1xf32> to vector<1x1xf32>
    %172 = vector.broadcast %171 : vector<1x1xf32> to vector<1x2xf32>
    %173 = vector.shape_cast %170 : vector<1x1xf32> to vector<1x1xf32>
    %174 = vector.broadcast %173 : vector<1x1xf32> to vector<1x2xf32>
    %175 = arith.select %168, %172, %174 : vector<1x2xi1>, vector<1x2xf32>
    %c0_155 = arith.constant 0 : index
    %c0_156 = arith.constant 0 : index
    %176 = vector.load %arg15[%c0_155, %c0_156] : memref<1x2xf32, #tpu.memory_space<vmem>>, vector<1x2xf32>
    tpu.vector_store %arg15[%c0_155, %c0_156], %175 {strides = array<i32>} : memref<1x2xf32, #tpu.memory_space<vmem>>, vector<1x2xf32>,
    return
  }
}

</mosaic_0001>

<bundles_post_ra>
// kernel: net_forward.1
= control target key start
LH: loop header
LB: loop body
LE: loop exit
PB: predicated region body
PF: predicated region fallthrough
CT: control target
= control target key end

     0   :  { %vm72_vm0 = vcmask 1043456   ;;  %vm59_vm1 = vcmask 228352   ;;  %vm8296_vm2 = vmmov 1   ;;  %s10295_s0 = inlined_call_operand.vmem [shape: f32[28,28], index: 0, kind: input, shape index: {}]   ;;  %s10296_s1 = inlined_call_operand.vmem [shape: f32[5,144,28], index: 1, kind: input, shape index: {}]   ;;  %s10297_s2 = inlined_call_operand.vmem [shape: f32[5,28,24], index: 2, kind: input, shape index: {}]   ;;  %s10298_s3 = inlined_call_operand.vmem [shape: f32[144,1], index: 3, kind: input, shape index: {}]   ;;  %s10299_s4 = inlined_call_operand.vmem [shape: f32[2,72,144], index: 4, kind: input, shape index: {}]   ;;  %s10300_s5 = inlined_call_operand.vmem [shape: f32[2,24,12], index: 5, kind: input, shape index: {}]   ;;  %s10301_s6 = inlined_call_operand.vmem [shape: f32[5,128,72], index: 6, kind: input, shape index: {}]   ;;  %s10302_s7 = inlined_call_operand.vmem [shape: f32[5,12,8], index: 7, kind: input, shape index: {}]   ;;  %s10303_s8 = inlined_call_operand.vmem [shape: f32[128,1], index: 8, kind: input, shape index: {}]   ;;  %s10304_s9 = inlined_call_operand.vmem [shape: f32[2,64,128], index: 9, kind: input, shape index: {}]   ;;  %s10305_s10 = inlined_call_operand.vmem [shape: f32[2,8,4], index: 10, kind: input, shape index: {}]   ;;  %s10306_s11 = inlined_call_operand.vmem [shape: f32[4,64,64], index: 11, kind: input, shape index: {}]   ;;  %s10307_s12 = inlined_call_operand.vmem [shape: f32[64,1], index: 12, kind: input, shape index: {}]   ;;  %s10308_s13 = inlined_call_operand.vmem [shape: f32[2,64,1], index: 13, kind: input, shape index: {}]   ;;  %s10309_s14 = inlined_call_operand.vmem [shape: f32[2,1,1], index: 14, kind: input, shape index: {}]   ;;  %s10310_s15 = inlined_call_operand.hbm [shape: f32[1,2], index: 15, kind: output, shape index: {}]  }
   0x1   :  { %v55_v0 = vld [vmem:[%s10297_s2] sm:$0xff]  ;;  %v56_v1 = vld [vmem:[%s10297_s2 + $0x8] sm:$0xff]  ;;  %v57_v2 = vld [vmem:[%s10297_s2 + $0x10] sm:$0xff] }
   0x2   :  { %v7718_v3 = vpack.c.bf16 %v56_v1, %v55_v0  ;;  %v58_v4 = vld [vmem:[%s10297_s2 + $0x18] sm:$0xf]  ;;  %v8403_v5 = vld [vmem:[%s10295_s0] sm:$0xff]  ;;  %vm8405_vm3 = vmpackc.low %vm72_vm0, %vm8296_vm2 }
   0x3   :  { %v7722_v6 = vpack.c.bf16 %v58_v4, %v57_v2  ;;  %6822 = vmatprep.mubr.msk.f32.mxu0 %vm59_vm1, %v8403_v5  ;;  %v5770_v8 = vld [vmem:[%s10297_s2 + $0x20] sm:$0xff]  ;;  %v5771_v9 = vld [vmem:[%s10297_s2 + $0x28] sm:$0xff]  ;;  %6920 = vmatprep.mubr.msk.f32.mxu1 %vm59_vm1, %v8403_v5  ;;  %v5837_v14 = vld [vmem:[%s10297_s2 + $0x50] sm:$0xff] }
   0x4   :  { %7719 = vmatprep.subr.bf16.mxu0 %v7718_v3  ;;  %v5835_v10 = vld [vmem:[%s10297_s2 + $0x40] sm:$0xff]  ;;  %v5836_v11 = vld [vmem:[%s10297_s2 + $0x48] sm:$0xff]  ;;  %v7728_v12 = vpack.c.bf16 %v5771_v9, %v5770_v8  ;;  %v5838_v15 = vld [vmem:[%s10297_s2 + $0x58] sm:$0xf] }
   0x5   :  { %7721 = vmatpush3.bf16.msra.mxu0 %v7718_v3  ;;  %v7758_v13 = vpack.c.bf16 %v5836_v11, %v5835_v10  ;;  %v5772_v16 = vld [vmem:[%s10297_s2 + $0x30] sm:$0xff]  ;;  %v5773_v17 = vld [vmem:[%s10297_s2 + $0x38] sm:$0xf]  ;;  %v7762_v18 = vpack.c.bf16 %v5838_v15, %v5837_v14  ;;  %v5881_v19 = vld [vmem:[%s10297_s2 + $0x60] sm:$0xff] }
   0x6   :  { %7724 = vmatprep.subr.msk.bf16.mxu0 %vm8405_vm3, %v7722_v6  ;;  %v5882_v20 = vld [vmem:[%s10297_s2 + $0x68] sm:$0xff] }
   0x7   :  { %7759 = vmatprep.subr.bf16.mxu1 %v7758_v13  ;;  %v52_v21 = vld [vmem:[%s10295_s0 + $0x8] sm:$0xff] }
   0x8   :  { %7761 = vmatpush3.bf16.msra.mxu1 %v7758_v13 }
   0x9   :  { %7727 = vmatpush3.bf16.msk.msra.mxu0 %vm8405_vm3, %v7722_v6 }
   0xa   :  { %20 = vsyncpa [#allocation3], 0  ;;  %7729 = vmatprep.subr.bf16.mxu0 %v7728_v12  ;;  %v53_v22 = vld [vmem:[%s10295_s0 + $0x10] sm:$0xff]  ;;  %v7732_v23 = vpack.c.bf16 %v5773_v17, %v5772_v16  ;;  %7764 = vmatprep.subr.msk.bf16.mxu1 %vm8405_vm3, %v7762_v18  ;;  %v7778_v24 = vpack.c.bf16 %v5882_v20, %v5881_v19  ;;  %v54_v25 = vld [vmem:[%s10295_s0 + $0x18] sm:$0xf]  ;;  %vm1903_vm4 = vcmask 130048  }
   0xb   :  { %v5883_v26 = vld [vmem:[%s10297_s2 + $0x70] sm:$0xff]  ;;  %v5884_v27 = vld [vmem:[%s10297_s2 + $0x78] sm:$0xf]  ;;  %v5927_v29 = vld [vmem:[%s10297_s2 + $0x80] sm:$0xff]  ;;  %vm8300_vm5 = vmmov 0   ;;  %vm2209_vm6 = vcmask 195584  }
   0xc   :  { %6823 = vmatmul.mubr.msk.f32.vlgmr.msra.gmra.mrb[0].mxu0 %vm59_vm1, %v52_v21  ;;  %7767 = vmatpush3.bf16.msk.msra.mxu1 %vm8405_vm3, %v7762_v18  ;;  %v7782_v28 = vpack.c.bf16 %v5884_v27, %v5883_v26  ;;  %v5928_v30 = vld [vmem:[%s10297_s2 + $0x88] sm:$0xff]  ;;  %v5929_v32 = vld [vmem:[%s10297_s2 + $0x90] sm:$0xff]  ;;  %v5930_v33 = vld [vmem:[%s10297_s2 + $0x98] sm:$0xf]  ;;  %vm2472_vm7 = vcmask 97280   ;;  %vm2762_vm8 = vcmask 588800  }
   0xd   :  { %7731 = vmatpush3.bf16.msra.mxu0 %v7728_v12  ;;  %6825 = vmatprep.mubr.msk.f32.mxu0 %vm59_vm1, %v53_v22  ;;  %v7798_v31 = vpack.c.bf16 %v5928_v30, %v5927_v29  ;;  %v7802_v34 = vpack.c.bf16 %v5930_v33, %v5929_v32  ;;  %v5779_v35 = vld [vmem:[%s10296_s1 + $0x90] sm:$0xff]  ;;  %v5780_v57 = vld [vmem:[%s10296_s1 + $0x98] sm:$0xff]  ;;  %v5781_v58 = vld [vmem:[%s10296_s1 + $0xa0] sm:$0xff]  ;;  %vm4539_vm9 = vcmask 64512   ;;  %vm4794_vm10 = vcmask 523264  }
   0xe   :  { %7734 = vmatprep.subr.msk.bf16.mxu0 %vm8405_vm3, %v7732_v23  ;;  %7779 = vmatprep.subr.bf16.mxu1 %v7778_v24  ;;  %v5782_v62 = vld [vmem:[%s10296_s1 + $0xa8] sm:$0xff]  ;;  %v5783_v63 = vld [vmem:[%s10296_s1 + $0xb0] sm:$0xff]  ;;  %v5784_v3 = vld [vmem:[%s10296_s1 + $0xb8] sm:$0xff]  ;;  %vm5398_vm15 = vcmask 31744   ;;  %vm5463_vm0 = vcmask 7168  }
   0xf   :  { %6921 = vmatmul.mubr.msk.f32.vlgmr.msra.gmra.mrb[0].mxu1 %vm59_vm1, %v52_v21  ;;  %v5785_v4 = vld [vmem:[%s10296_s1 + $0xc0] sm:$0xff]  ;;  %v5786_v9 = vld [vmem:[%s10296_s1 + $0xc8] sm:$0xff]  ;;  %v5787_v10 = vld [vmem:[%s10296_s1 + $0xd0] sm:$0xff] }
  0x10   :  { %6826 = vmatmul.mubr.msk.f32.gmra.mrb[2].mxu0 %vm59_vm1, %v54_v25  ;;  %6923 = vmatprep.mubr.msk.f32.mxu1 %vm59_vm1, %v53_v22  ;;  %v5788_v11 = vld [vmem:[%s10296_s1 + $0xd8] sm:$0xff]  ;;  %v5789_v12 = vld [vmem:[%s10296_s1 + $0xe0] sm:$0xff]  ;;  %v5790_v13 = vld [vmem:[%s10296_s1 + $0xe8] sm:$0xff] }
  0x11   :  { %7737 = vmatpush3.bf16.msk.msra.mxu0 %vm8405_vm3, %v7732_v23  ;;  %6836 = vmatprep.mubr.msk.f32.mxu0 %vm59_vm1, %v8403_v5  ;;  %v5791_v14 = vld [vmem:[%s10296_s1 + $0xf0] sm:$0xff]  ;;  %v5792_v15 = vld [vmem:[%s10296_s1 + $0xf8] sm:$0xff]  ;;  %v5793_v16 = vld [vmem:[%s10296_s1 + $0x100] sm:$0xff] }
  0x12   :  { %7781 = vmatpush3.bf16.msra.mxu1 %v7778_v24  ;;  %v5794_v17 = vld [vmem:[%s10296_s1 + $0x108] sm:$0xff]  ;;  %v5795_v18 = vld [vmem:[%s10296_s1 + $0x110] sm:$0xff]  ;;  %v5796_v19 = vld [vmem:[%s10296_s1 + $0x118] sm:$0xff] }
  0x13   :  { %7784 = vmatprep.subr.msk.bf16.mxu1 %vm8405_vm3, %v7782_v28  ;;  %6924 = vmatmul.mubr.msk.f32.gmra.mrb[2].mxu1 %vm59_vm1, %v54_v25  ;;  %v161_v20 = vld [vmem:[%s10296_s1] sm:$0xff]  ;;  %v162_v23 = vld [vmem:[%s10296_s1 + $0x8] sm:$0xff]  ;;  %v163_v24 = vld [vmem:[%s10296_s1 + $0x10] sm:$0xff] }
  0x14   :  { %6837 = vmatmul.mubr.msk.f32.vlgmr.msra.gmra.mrb[4].mxu0 %vm59_vm1, %v52_v21  ;;  %6969 = vmatprep.mubr.msk.f32.mxu1 %vm59_vm1, %v8403_v5  ;;  %v1742_v26 = vld [vmem:[%s10298_s3 + $0x8] sm:$0xff]  ;;  %v164_v27 = vld [vmem:[%s10296_s1 + $0x18] sm:$0xff]  ;;  %v1745_v30 = vld [vmem:[%s10298_s3 + $0x20] sm:$0xff] }
  0x15   :  { %6839 = vmatprep.mubr.msk.f32.mxu0 %vm59_vm1, %v53_v22  ;;  %v1744_v29 = vld [vmem:[%s10298_s3 + $0x18] sm:$0xff]  ;;  %v167_v32 = vld [vmem:[%s10296_s1 + $0x30] sm:$0xff]  ;;  %v1746_v33 = vld [vmem:[%s10298_s3 + $0x28] sm:$0xff] }
  0x16   :  { %7787 = vmatpush3.bf16.msk.msra.mxu1 %vm8405_vm3, %v7782_v28  ;;  %v165_v28 = vld [vmem:[%s10296_s1 + $0x20] sm:$0xff] }
  0x17   :  { %7799 = vmatprep.subr.bf16.mxu1 %v7798_v31  ;;  %v6052_v7 = vld [vmem:[%s10301_s6 + $0x80] sm:$0xff] }
  0x18   :  { %6840 = vmatmul.mubr.msk.f32.gmra.mrb[6].mxu0 %vm59_vm1, %v54_v25 }
  0x19   :  { %6970 = vmatmul.mubr.msk.f32.vlgmr.msra.gmra.mrb[4].mxu1 %vm59_vm1, %v52_v21  ;;  %6850 = vmatprep.mubr.msk.f32.mxu0 %vm59_vm1, %v5779_v35  ;;  %v168_v35 = vld [vmem:[%s10296_s1 + $0x38] sm:$0xff] }
  0x1a   :  { %6972 = vmatprep.mubr.msk.f32.mxu1 %vm59_vm1, %v53_v22  ;;  %7801 = vmatpush3.bf16.msra.mxu1 %v7798_v31  ;;  %v166_v31 = vld [vmem:[%s10296_s1 + $0x28] sm:$0xff] }
  0x1b   :  { %7804 = vmatprep.subr.msk.bf16.mxu1 %vm8405_vm3, %v7802_v34 }
  0x1d   :  { %6973 = vmatmul.mubr.msk.f32.gmra.mrb[6].mxu1 %vm59_vm1, %v54_v25 }
  0x1e   :  { %7807 = vmatpush3.bf16.msk.msra.mxu1 %vm8405_vm3, %v7802_v34  ;;  %7018 = vmatprep.mubr.msk.f32.mxu1 %vm59_vm1, %v8403_v5  ;;  %v1747_v34 = vld [vmem:[%s10298_s3 + $0x30] sm:$0xff] }
  0x21   :  { %7019 = vmatmul.mubr.msk.f32.vlgmr.msra.gmra.mrb[8].mxu1 %vm59_vm1, %v52_v21  ;;  %v8297_v21 = vmov 0  }
  0x22   :  { %7021 = vmatprep.mubr.msk.f32.mxu1 %vm59_vm1, %v53_v22  ;;  %8262 = vset.pattern.permute.xlu0 %v8297_v21  ;;  %v1741_v22 = vld [vmem:[%s10298_s3] sm:$0xff] }
  0x23   :  { %8263 = vset.pattern.permute.xlu1 %v8297_v21  ;;  %1761 = vperm.xlu0 %8262, %v1741_v22   ;;  %v4187_v21 = vld [vmem:[%s10303_s8 + $0x60] sm:$0xff]  ;;  %v5857_v22 = vld [vmem:[%s10296_s1 + $0x188] sm:$0xff] }
  0x25   :  { %7022 = vmatmul.mubr.msk.f32.gmra.mrb[10].mxu1 %vm59_vm1, %v54_v25  ;;  %v1743_v25 = vld [vmem:[%s10298_s3 + $0x10] sm:$0xff] }
  0x26   :  { %1771 = vperm.xlu1 %8263, %v1743_v25   ;;  %v4189_v25 = vld [vmem:[%s10303_s8 + $0x70] sm:$0xff] }
  0x27   :  { %1766 = vperm.xlu0 %8262, %v1742_v26   ;;  %v5859_v26 = vld [vmem:[%s10296_s1 + $0x198] sm:$0xff] }
  0x2a   :  { %1776 = vperm.xlu1 %8263, %v1744_v29   ;;  %v5861_v29 = vld [vmem:[%s10296_s1 + $0x1a8] sm:$0xff] }
  0x2b   :  { %1781 = vperm.xlu0 %8262, %v1745_v30   ;;  %v5890_v30 = vld [vmem:[%s10296_s1 + $0x1b0] sm:$0xff] }
  0x2e   :  { %1786 = vperm.xlu1 %8263, %v1746_v33   ;;  %v5893_v33 = vld [vmem:[%s10296_s1 + $0x1c8] sm:$0xff] }
  0x2f   :  { %1791 = vperm.xlu0 %8262, %v1747_v34   ;;  %v5894_v34 = vld [vmem:[%s10296_s1 + $0x1d0] sm:$0xff] }
  0xdf   :  { %v6824_v36 = vpop.f32.mrb[0].mxu0 }
  0xe0   :  { %v142_v37 = vpop.f32.mrb[1].mxu0 }
  0xe1   :  { %v7748_v38 = vpack.c.bf16 %v6824_v36, %v142_v37  ;;  %v169_v36 = vld [vmem:[%s10296_s1 + $0x40] sm:$0xff]  ;;  %v1748_v37 = vld [vmem:[%s10298_s3 + $0x38] sm:$0xff] }
  0xe2   :  { %v6922_v42 = vpop.f32.mrb[0].mxu1  ;;  %1796 = vperm.xlu1 %8263, %v1748_v37   ;;  %v5898_v37 = vld [vmem:[%s10296_s1 + $0x1f0] sm:$0xff] }
  0xe3   :  { %v6827_v39 = vpop.f32.mrb[2].mxu0  ;;  %v789_v43 = vpop.f32.mrb[1].mxu1 }
  0xe4   :  { %v152_v40 = vpop.f32.mrb[3].mxu0  ;;  %v8515_v45 = vpack.c.bf16 %v6922_v42, %v789_v43  ;;  %v1751_v42 = vld [vmem:[%s10298_s3 + $0x50] sm:$0xff]  ;;  %v172_v43 = vld [vmem:[%s10296_s1 + $0x58] sm:$0xff] }
  0xe5   :  { %v7752_v41 = vpack.c.bf16 %v6827_v39, %v152_v40  ;;  %v170_v39 = vld [vmem:[%s10296_s1 + $0x48] sm:$0xff]  ;;  %v171_v40 = vld [vmem:[%s10296_s1 + $0x50] sm:$0xff] }
  0xe6   :  { %v6925_v48 = vpop.f32.mrb[2].mxu1 }
  0xe7   :  { %v6838_v44 = vpop.f32.mrb[4].mxu0  ;;  %v799_v49 = vpop.f32.mrb[3].mxu1 }
  0xe8   :  { %v253_v46 = vpop.f32.mrb[5].mxu0  ;;  %v8517_v51 = vpack.c.bf16 %v6925_v48, %v799_v49  ;;  %v175_v48 = vld [vmem:[%s10296_s1 + $0x70] sm:$0xff]  ;;  %v1754_v49 = vld [vmem:[%s10298_s3 + $0x68] sm:$0xff] }
  0xe9   :  { %v7738_v47 = vpack.c.bf16 %v6838_v44, %v253_v46  ;;  %v173_v44 = vld [vmem:[%s10296_s1 + $0x60] sm:$0xff] }
  0xea   :  { %v1753_v46 = vld [vmem:[%s10298_s3 + $0x60] sm:$0xff] }
  0xeb   :  { %v6841_v50 = vpop.f32.mrb[6].mxu0  ;;  %7739 = vmatprep.subr.bf16.mxu0 %v7738_v47 }
  0xec   :  { %v263_v52 = vpop.f32.mrb[7].mxu0  ;;  %7741 = vmatpush3.bf16.msra.mxu0 %v7738_v47  ;;  %v6971_v54 = vpop.f32.mrb[4].mxu1  ;;  %v174_v47 = vld [vmem:[%s10296_s1 + $0x68] sm:$0xff] }
  0xed   :  { %v7742_v53 = vpack.c.bf16 %v6841_v50, %v263_v52  ;;  %v1131_v55 = vpop.f32.mrb[5].mxu1  ;;  %v1755_v50 = vld [vmem:[%s10298_s3 + $0x70] sm:$0xff]  ;;  %v177_v52 = vld [vmem:[%s10296_s1 + $0x80] sm:$0xff] }
  0xee   :  { %v8521_v56 = vpack.c.bf16 %v6971_v54, %v1131_v55  ;;  %v1757_v54 = vld [vmem:[%s10298_s3 + $0x80] sm:$0xff]  ;;  %v178_v55 = vld [vmem:[%s10296_s1 + $0x88] sm:$0xff] }
  0xef   :  { %7744 = vmatprep.subr.msk.bf16.mxu0 %vm8405_vm3, %v7742_v53 }
  0xf0   :  { %7747 = vmatpush3.bf16.msk.msra.mxu0 %vm8405_vm3, %v7742_v53  ;;  %v6974_v59 = vpop.f32.mrb[6].mxu1  ;;  %v1756_v53 = vld [vmem:[%s10298_s3 + $0x78] sm:$0xff] }
  0xf1   :  { %7749 = vmatprep.subr.bf16.mxu0 %v7748_v38  ;;  %v1141_v60 = vpop.f32.mrb[7].mxu1 }
  0xf2   :  { %v8532_v61 = vpack.c.bf16 %v6974_v59, %v1141_v60  ;;  %v4175_v59 = vld [vmem:[%s10303_s8] sm:$0xff]  ;;  %v5845_v60 = vld [vmem:[%s10296_s1 + $0x128] sm:$0xff] }
  0xf3   :  { %6851 = vmatmul.mubr.msk.f32.vlgmr.msra.gmra.mrb[8].mxu0 %vm59_vm1, %v5780_v57  ;;  %v5844_v57 = vld [vmem:[%s10296_s1 + $0x120] sm:$0xff] }
  0xf4   :  { %7751 = vmatpush3.bf16.msra.mxu0 %v7748_v38  ;;  %6853 = vmatprep.mubr.msk.f32.mxu0 %vm59_vm1, %v5781_v58  ;;  %v7020_v0 = vpop.f32.mrb[8].mxu1  ;;  %v1749_v38 = vld [vmem:[%s10298_s3 + $0x40] sm:$0xff]  ;;  %v1758_v58 = vld [vmem:[%s10298_s3 + $0x88] sm:$0xff] }
  0xf5   :  { %7754 = vmatprep.subr.msk.bf16.mxu0 %vm8405_vm3, %v7752_v41  ;;  %v1473_v1 = vpop.f32.mrb[9].mxu1  ;;  %1801 = vperm.xlu0 %8262, %v1749_v38   ;;  %v5900_v38 = vld [vmem:[%s10296_s1 + $0x200] sm:$0xff] }
  0xf6   :  { %v8544_v2 = vpack.c.bf16 %v7020_v0, %v1473_v1  ;;  %v4177_v0 = vld [vmem:[%s10303_s8 + $0x10] sm:$0xff]  ;;  %v5847_v1 = vld [vmem:[%s10296_s1 + $0x138] sm:$0xff] }
  0xf7   :  { %6854 = vmatmul.mubr.msk.f32.gmra.mrb[10].mxu0 %vm59_vm1, %v5782_v62  ;;  %v5846_v62 = vld [vmem:[%s10296_s1 + $0x130] sm:$0xff] }
  0xf8   :  { %7757 = vmatpush3.bf16.msk.msra.mxu0 %vm8405_vm3, %v7752_v41  ;;  %6856 = vmatprep.mubr.msk.f32.mxu0 %vm59_vm1, %v5783_v63  ;;  %v7023_v5 = vpop.f32.mrb[10].mxu1  ;;  %v1750_v41 = vld [vmem:[%s10298_s3 + $0x48] sm:$0xff] }
  0xf9   :  { %7769 = vmatprep.subr.bf16.mxu0 %v8515_v45  ;;  %v1483_v6 = vpop.f32.mrb[11].mxu1  ;;  %1806 = vperm.xlu1 %8263, %v1750_v41   ;;  %v4176_v63 = vld [vmem:[%s10303_s8 + $0x8] sm:$0xff]  ;;  %v5903_v41 = vld [vmem:[%s10296_s1 + $0x218] sm:$0xff] }
  0xfa   :  { %v8557_v8 = vpack.c.bf16 %v7023_v5, %v1483_v6  ;;  %1811 = vperm.xlu0 %8262, %v1751_v42   ;;  %v5849_v5 = vld [vmem:[%s10296_s1 + $0x148] sm:$0xff]  ;;  %v5850_v6 = vld [vmem:[%s10296_s1 + $0x150] sm:$0xff]  ;;  %v5904_v42 = vld [vmem:[%s10296_s1 + $0x220] sm:$0xff] }
  0xfb   :  { %6857 = vmatmul.mubr.msk.f32.gmra.mrb[12].mxu0 %vm59_vm1, %v5784_v3  ;;  %v5848_v3 = vld [vmem:[%s10296_s1 + $0x140] sm:$0xff] }
  0xfc   :  { %6859 = vmatprep.mubr.msk.f32.mxu0 %vm59_vm1, %v5785_v4  ;;  %v4178_v4 = vld [vmem:[%s10303_s8 + $0x18] sm:$0xff] }
  0xfe   :  { %1821 = vperm.xlu0 %8262, %v1753_v46   ;;  %v5936_v46 = vld [vmem:[%s10296_s1 + $0x240] sm:$0xff] }
  0xff   :  { %6860 = vmatmul.mubr.msk.f32.gmra.mrb[14].mxu0 %vm59_vm1, %v5786_v9  ;;  %v4180_v9 = vld [vmem:[%s10303_s8 + $0x28] sm:$0xff] }
 0x100   :  { %6862 = vmatprep.mubr.msk.f32.mxu0 %vm59_vm1, %v5787_v10  ;;  %v4181_v10 = vld [vmem:[%s10303_s8 + $0x30] sm:$0xff] }
 0x102   :  { %1831 = vperm.xlu0 %8262, %v1755_v50   ;;  %v5940_v50 = vld [vmem:[%s10296_s1 + $0x260] sm:$0xff] }
 0x103   :  { %6863 = vmatmul.mubr.msk.f32.gmra.mrb[16].mxu0 %vm59_vm1, %v5788_v11  ;;  %v5852_v11 = vld [vmem:[%s10296_s1 + $0x160] sm:$0xff] }
 0x104   :  { %6865 = vmatprep.mubr.msk.f32.mxu0 %vm59_vm1, %v5789_v12  ;;  %v4182_v12 = vld [vmem:[%s10303_s8 + $0x38] sm:$0xff] }
 0x106   :  { %1841 = vperm.xlu0 %8262, %v1757_v54   ;;  %v5944_v54 = vld [vmem:[%s10296_s1 + $0x280] sm:$0xff] }
 0x107   :  { %6866 = vmatmul.mubr.msk.f32.gmra.mrb[18].mxu0 %vm59_vm1, %v5790_v13  ;;  %v4183_v13 = vld [vmem:[%s10303_s8 + $0x40] sm:$0xff] }
 0x108   :  { %6868 = vmatprep.mubr.msk.f32.mxu0 %vm59_vm1, %v5791_v14  ;;  %v5853_v14 = vld [vmem:[%s10296_s1 + $0x168] sm:$0xff] }
 0x10a   :  { %4193 = vperm.xlu0 %8262, %v4175_v59   ;;  %v5948_v59 = vld [vmem:[%s10296_s1 + $0x2a0] sm:$0xff] }
 0x10b   :  { %6869 = vmatmul.mubr.msk.f32.gmra.mrb[20].mxu0 %vm59_vm1, %v5792_v15  ;;  %v5854_v15 = vld [vmem:[%s10296_s1 + $0x170] sm:$0xff] }
 0x10c   :  { %6871 = vmatprep.mubr.msk.f32.mxu0 %vm59_vm1, %v5793_v16  ;;  %v4184_v16 = vld [vmem:[%s10303_s8 + $0x48] sm:$0xff] }
 0x10e   :  { %4203 = vperm.xlu0 %8262, %v4177_v0   ;;  %v5952_v0 = vld [vmem:[%s10296_s1 + $0x2c0] sm:$0xff] }
 0x10f   :  { %6872 = vmatmul.mubr.msk.f32.gmra.mrb[22].mxu0 %vm59_vm1, %v5794_v17  ;;  %v4185_v17 = vld [vmem:[%s10303_s8 + $0x50] sm:$0xff] }
 0x110   :  { %6874 = vmatprep.mubr.msk.f32.mxu0 %vm59_vm1, %v5795_v18  ;;  %v5855_v18 = vld [vmem:[%s10296_s1 + $0x178] sm:$0xff] }
 0x113   :  { %6875 = vmatmul.mubr.msk.f32.gmra.mrb[24].mxu0 %vm59_vm1, %v5796_v19  ;;  %v5856_v19 = vld [vmem:[%s10296_s1 + $0x180] sm:$0xff] }
 0x114   :  { %6885 = vmatprep.mubr.msk.f32.mxu0 %vm59_vm1, %v161_v20  ;;  %v4186_v20 = vld [vmem:[%s10303_s8 + $0x58] sm:$0xff] }
 0x117   :  { %6886 = vmatmul.mubr.msk.f32.vlgmr.msra.gmra.mrb[8].mxu0 %vm59_vm1, %v162_v23  ;;  %v5858_v23 = vld [vmem:[%s10296_s1 + $0x190] sm:$0xff] }
 0x118   :  { %6888 = vmatprep.mubr.msk.f32.mxu0 %vm59_vm1, %v163_v24  ;;  %7771 = vmatpush3.bf16.msra.mxu0 %v8515_v45  ;;  %v1752_v45 = vld [vmem:[%s10298_s3 + $0x58] sm:$0xff]  ;;  %v4188_v24 = vld [vmem:[%s10303_s8 + $0x68] sm:$0xff] }
 0x119   :  { %7774 = vmatprep.subr.msk.bf16.mxu0 %vm8405_vm3, %v8517_v51  ;;  %1816 = vperm.xlu1 %8263, %v1752_v45   ;;  %v5907_v45 = vld [vmem:[%s10296_s1 + $0x238] sm:$0xff] }
 0x11b   :  { %6889 = vmatmul.mubr.msk.f32.gmra.mrb[10].mxu0 %vm59_vm1, %v164_v27  ;;  %v5860_v27 = vld [vmem:[%s10296_s1 + $0x1a0] sm:$0xff] }
 0x11c   :  { %6891 = vmatprep.mubr.msk.f32.mxu0 %vm59_vm1, %v165_v28  ;;  %7777 = vmatpush3.bf16.msk.msra.mxu0 %vm8405_vm3, %v8517_v51  ;;  %v176_v51 = vld [vmem:[%s10296_s1 + $0x78] sm:$0xff] }
 0x11d   :  { %7789 = vmatprep.subr.bf16.mxu0 %v8521_v56  ;;  %1826 = vperm.xlu1 %8263, %v1754_v49   ;;  %v4190_v28 = vld [vmem:[%s10303_s8 + $0x78] sm:$0xff] }
 0x11e   :  { %v5939_v49 = vld [vmem:[%s10296_s1 + $0x258] sm:$0xff] }
 0x11f   :  { %6892 = vmatmul.mubr.msk.f32.gmra.mrb[12].mxu0 %vm59_vm1, %v166_v31  ;;  %v5891_v31 = vld [vmem:[%s10296_s1 + $0x1b8] sm:$0xff] }
 0x120   :  { %6894 = vmatprep.mubr.msk.f32.mxu0 %vm59_vm1, %v167_v32  ;;  %v5892_v32 = vld [vmem:[%s10296_s1 + $0x1c0] sm:$0xff] }
 0x121   :  { %1836 = vperm.xlu1 %8263, %v1756_v53   ;;  %v5943_v53 = vld [vmem:[%s10296_s1 + $0x278] sm:$0xff] }
 0x123   :  { %6895 = vmatmul.mubr.msk.f32.gmra.mrb[14].mxu0 %vm59_vm1, %v168_v35  ;;  %v5895_v35 = vld [vmem:[%s10296_s1 + $0x1d8] sm:$0xff] }
 0x124   :  { %6897 = vmatprep.mubr.msk.f32.mxu0 %vm59_vm1, %v169_v36  ;;  %v5897_v36 = vld [vmem:[%s10296_s1 + $0x1e8] sm:$0xff] }
 0x125   :  { %1846 = vperm.xlu1 %8263, %v1758_v58   ;;  %v5947_v58 = vld [vmem:[%s10296_s1 + $0x298] sm:$0xff] }
 0x127   :  { %6898 = vmatmul.mubr.msk.f32.gmra.mrb[16].mxu0 %vm59_vm1, %v170_v39  ;;  %v5901_v39 = vld [vmem:[%s10296_s1 + $0x208] sm:$0xff] }
 0x128   :  { %6900 = vmatprep.mubr.msk.f32.mxu0 %vm59_vm1, %v171_v40  ;;  %v5902_v40 = vld [vmem:[%s10296_s1 + $0x210] sm:$0xff] }
 0x129   :  { %4198 = vperm.xlu1 %8263, %v4176_v63   ;;  %v5951_v63 = vld [vmem:[%s10296_s1 + $0x2b8] sm:$0xff] }
 0x12b   :  { %6901 = vmatmul.mubr.msk.f32.gmra.mrb[18].mxu0 %vm59_vm1, %v172_v43  ;;  %v5905_v43 = vld [vmem:[%s10296_s1 + $0x228] sm:$0xff] }
 0x12c   :  { %6903 = vmatprep.mubr.msk.f32.mxu0 %vm59_vm1, %v173_v44  ;;  %v5906_v44 = vld [vmem:[%s10296_s1 + $0x230] sm:$0xff] }
 0x12d   :  { %4208 = vperm.xlu1 %8263, %v4178_v4   ;;  %v1886_v4 = vld [vmem:[%s10299_s4 + $0x8] sm:$0xff] }
 0x12e   :  { %5973 = vmatprep.mubr.msk.f32.mxu1 %vm1903_vm4, %v1886_v4 }
 0x12f   :  { %6904 = vmatmul.mubr.msk.f32.gmra.mrb[20].mxu0 %vm59_vm1, %v174_v47  ;;  %v5937_v47 = vld [vmem:[%s10296_s1 + $0x248] sm:$0xff] }
 0x130   :  { %6906 = vmatprep.mubr.msk.f32.mxu0 %vm59_vm1, %v175_v48  ;;  %v5938_v48 = vld [vmem:[%s10296_s1 + $0x250] sm:$0xff] }
 0x131   :  { %4218 = vperm.xlu1 %8263, %v4180_v9  }
 0x133   :  { %6907 = vmatmul.mubr.msk.f32.gmra.mrb[22].mxu0 %vm59_vm1, %v176_v51  ;;  %v5941_v51 = vld [vmem:[%s10296_s1 + $0x268] sm:$0xff] }
 0x134   :  { %6909 = vmatprep.mubr.msk.f32.mxu0 %vm59_vm1, %v177_v52  ;;  %v5942_v52 = vld [vmem:[%s10296_s1 + $0x270] sm:$0xff] }
 0x135   :  { %4228 = vperm.xlu1 %8263, %v4182_v12  }
 0x137   :  { %6910 = vmatmul.mubr.msk.f32.gmra.mrb[24].mxu0 %vm59_vm1, %v178_v55  ;;  %v5945_v55 = vld [vmem:[%s10296_s1 + $0x288] sm:$0xff] }
 0x138   :  { %6934 = vmatprep.mubr.msk.f32.mxu0 %vm59_vm1, %v5844_v57  ;;  %v5946_v57 = vld [vmem:[%s10296_s1 + $0x290] sm:$0xff] }
 0x139   :  { %4238 = vperm.xlu1 %8263, %v4184_v16  }
 0x13b   :  { %6935 = vmatmul.mubr.msk.f32.vlgmr.msra.gmra.mrb[8].mxu0 %vm59_vm1, %v5845_v60  ;;  %v5949_v60 = vld [vmem:[%s10296_s1 + $0x2a8] sm:$0xff] }
 0x13c   :  { %6937 = vmatprep.mubr.msk.f32.mxu0 %vm59_vm1, %v5846_v62  ;;  %7791 = vmatpush3.bf16.msra.mxu0 %v8521_v56  ;;  %v4179_v56 = vld [vmem:[%s10303_s8 + $0x20] sm:$0xff]  ;;  %v5950_v62 = vld [vmem:[%s10296_s1 + $0x2b0] sm:$0xff] }
 0x13d   :  { %7794 = vmatprep.subr.msk.bf16.mxu0 %vm8405_vm3, %v8532_v61  ;;  %4213 = vperm.xlu0 %8262, %v4179_v56   ;;  %v1772_v56 = vpop.permute.xlu1 %1771 }
 0x13e   :  { %4248 = vperm.xlu1 %8263, %v4186_v20  }
 0x13f   :  { %6938 = vmatmul.mubr.msk.f32.gmra.mrb[10].mxu0 %vm59_vm1, %v5847_v1  ;;  %v5953_v1 = vld [vmem:[%s10296_s1 + $0x2c8] sm:$0xff] }
 0x140   :  { %6940 = vmatprep.mubr.msk.f32.mxu0 %vm59_vm1, %v5848_v3  ;;  %7797 = vmatpush3.bf16.msk.msra.mxu0 %vm8405_vm3, %v8532_v61  ;;  %v5851_v61 = vld [vmem:[%s10296_s1 + $0x158] sm:$0xff]  ;;  %v8298_v3 = vmov 0.0|0.0  }
 0x141   :  { %7809 = vmatprep.subr.bf16.mxu0 %v8544_v2  ;;  %4223 = vperm.xlu0 %8262, %v4181_v10  }
 0x142   :  { %4258 = vperm.xlu1 %8263, %v4188_v24   ;;  %7818 = vmatprep.subr.bf16.mxu1 %v8298_v3 }
 0x143   :  { %6941 = vmatmul.mubr.msk.f32.gmra.mrb[12].mxu0 %vm59_vm1, %v5849_v5  ;;  %v1762_v5 = vpop.permute.xlu0 %1761 }
 0x144   :  { %6943 = vmatprep.mubr.msk.f32.mxu0 %vm59_vm1, %v5850_v6  ;;  %v1777_v6 = vpop.permute.xlu1 %1776 }
 0x145   :  { %4233 = vperm.xlu0 %8262, %v4183_v13  }
 0x146   :  { %4268 = vperm.xlu1 %8263, %v4190_v28  }
 0x147   :  { %6944 = vmatmul.mubr.msk.f32.gmra.mrb[14].mxu0 %vm59_vm1, %v5851_v61  ;;  %v1767_v9 = vpop.permute.xlu0 %1766 }
 0x148   :  { %6946 = vmatprep.mubr.msk.f32.mxu0 %vm59_vm1, %v5852_v11  ;;  %v1787_v10 = vpop.permute.xlu1 %1786 }
 0x149   :  { %4243 = vperm.xlu0 %8262, %v4185_v17  }
 0x14b   :  { %6947 = vmatmul.mubr.msk.f32.gmra.mrb[16].mxu0 %vm59_vm1, %v5853_v14  ;;  %v1782_v61 = vpop.permute.xlu0 %1781 }
 0x14c   :  { %6949 = vmatprep.mubr.msk.f32.mxu0 %vm59_vm1, %v5854_v15 }
 0x14d   :  { %4253 = vperm.xlu0 %8262, %v4187_v21  }
 0x14f   :  { %6950 = vmatmul.mubr.msk.f32.gmra.mrb[18].mxu0 %vm59_vm1, %v5855_v18  ;;  %v1792_v16 = vpop.permute.xlu0 %1791 }
 0x150   :  { %6952 = vmatprep.mubr.msk.f32.mxu0 %vm59_vm1, %v5856_v19 }
 0x151   :  { %4263 = vperm.xlu0 %8262, %v4189_v25  }
 0x153   :  { %6953 = vmatmul.mubr.msk.f32.gmra.mrb[20].mxu0 %vm59_vm1, %v5857_v22 }
 0x154   :  { %6955 = vmatprep.mubr.msk.f32.mxu0 %vm59_vm1, %v5858_v23 }
 0x157   :  { %6956 = vmatmul.mubr.msk.f32.gmra.mrb[22].mxu0 %vm59_vm1, %v5859_v26 }
 0x158   :  { %6958 = vmatprep.mubr.msk.f32.mxu0 %vm59_vm1, %v5860_v27 }
 0x15b   :  { %6959 = vmatmul.mubr.msk.f32.gmra.mrb[24].mxu0 %vm59_vm1, %v5861_v29 }
 0x15c   :  { %6983 = vmatprep.mubr.msk.f32.mxu0 %vm59_vm1, %v5890_v30 }
 0x15f   :  { %6984 = vmatmul.mubr.msk.f32.vlgmr.msra.gmra.mrb[8].mxu0 %vm59_vm1, %v5891_v31 }
 0x160   :  { %6986 = vmatprep.mubr.msk.f32.mxu0 %vm59_vm1, %v5892_v32  ;;  %7811 = vmatpush3.bf16.msra.mxu0 %v8544_v2  ;;  %v5896_v2 = vld [vmem:[%s10296_s1 + $0x1e0] sm:$0xff] }
 0x161   :  { %7814 = vmatprep.subr.msk.bf16.mxu0 %vm8405_vm3, %v8557_v8  ;;  %v1797_v14 = vpop.permute.xlu1 %1796 }
 0x163   :  { %6987 = vmatmul.mubr.msk.f32.gmra.mrb[10].mxu0 %vm59_vm1, %v5893_v33 }
 0x164   :  { %6989 = vmatprep.mubr.msk.f32.mxu0 %vm59_vm1, %v5894_v34  ;;  %7817 = vmatpush3.bf16.msk.msra.mxu0 %vm8405_vm3, %v8557_v8  ;;  %v5899_v8 = vld [vmem:[%s10296_s1 + $0x1f8] sm:$0xff] }
 0x165   :  { %7878 = vmatprep.subr.bf16.mxu0 %v8298_v3 }
 0x167   :  { %6990 = vmatmul.mubr.msk.f32.gmra.mrb[12].mxu0 %vm59_vm1, %v5895_v35 }
 0x168   :  { %6992 = vmatprep.mubr.msk.f32.mxu0 %vm59_vm1, %v5896_v2 }
 0x16b   :  { %6993 = vmatmul.mubr.msk.f32.gmra.mrb[14].mxu0 %vm59_vm1, %v5897_v36 }
 0x16c   :  { %6995 = vmatprep.mubr.msk.f32.mxu0 %vm59_vm1, %v5898_v37 }
 0x16f   :  { %6996 = vmatmul.mubr.msk.f32.gmra.mrb[16].mxu0 %vm59_vm1, %v5899_v8 }
 0x170   :  { %6998 = vmatprep.mubr.msk.f32.mxu0 %vm59_vm1, %v5900_v38 }
 0x173   :  { %6999 = vmatmul.mubr.msk.f32.gmra.mrb[18].mxu0 %vm59_vm1, %v5901_v39 }
 0x174   :  { %7001 = vmatprep.mubr.msk.f32.mxu0 %vm59_vm1, %v5902_v40  ;;  %v1802_v28 = vpop.permute.xlu0 %1801 }
 0x177   :  { %7002 = vmatmul.mubr.msk.f32.gmra.mrb[20].mxu0 %vm59_vm1, %v5903_v41 }
 0x178   :  { %7004 = vmatprep.mubr.msk.f32.mxu0 %vm59_vm1, %v5904_v42  ;;  %v1807_v25 = vpop.permute.xlu1 %1806 }
 0x179   :  { %v1812_v39 = vpop.permute.xlu0 %1811 }
 0x17b   :  { %7005 = vmatmul.mubr.msk.f32.gmra.mrb[22].mxu0 %vm59_vm1, %v5905_v43 }
 0x17c   :  { %7007 = vmatprep.mubr.msk.f32.mxu0 %vm59_vm1, %v5906_v44 }
 0x17f   :  { %7008 = vmatmul.mubr.msk.f32.gmra.mrb[24].mxu0 %vm59_vm1, %v5907_v45 }
 0x180   :  { %7032 = vmatprep.mubr.msk.f32.mxu0 %vm59_vm1, %v5936_v46 }
 0x183   :  { %7033 = vmatmul.mubr.msk.f32.vlgmr.msra.gmra.mrb[8].mxu0 %vm59_vm1, %v5937_v47 }
 0x184   :  { %7035 = vmatprep.mubr.msk.f32.mxu0 %vm59_vm1, %v5938_v48 }
 0x187   :  { %7036 = vmatmul.mubr.msk.f32.gmra.mrb[10].mxu0 %vm59_vm1, %v5939_v49 }
 0x188   :  { %7038 = vmatprep.mubr.msk.f32.mxu0 %vm59_vm1, %v5940_v50 }
 0x18b   :  { %7039 = vmatmul.mubr.msk.f32.gmra.mrb[12].mxu0 %vm59_vm1, %v5941_v51  ;;  %v1822_v51 = vpop.permute.xlu0 %1821 }
 0x18c   :  { %7041 = vmatprep.mubr.msk.f32.mxu0 %vm59_vm1, %v5942_v52 }
 0x18f   :  { %7042 = vmatmul.mubr.msk.f32.gmra.mrb[14].mxu0 %vm59_vm1, %v5943_v53  ;;  %v1832_v4 = vpop.permute.xlu0 %1831 }
 0x190   :  { %7044 = vmatprep.mubr.msk.f32.mxu0 %vm59_vm1, %v5944_v54 }
 0x193   :  { %7045 = vmatmul.mubr.msk.f32.gmra.mrb[16].mxu0 %vm59_vm1, %v5945_v55 }
 0x194   :  { %7047 = vmatprep.mubr.msk.f32.mxu0 %vm59_vm1, %v5946_v57 }
 0x197   :  { %7048 = vmatmul.mubr.msk.f32.gmra.mrb[18].mxu0 %vm59_vm1, %v5947_v58 }
 0x198   :  { %7050 = vmatprep.mubr.msk.f32.mxu0 %vm59_vm1, %v5948_v59  ;;  %v1817_v37 = vpop.permute.xlu1 %1816 }
 0x19b   :  { %7051 = vmatmul.mubr.msk.f32.gmra.mrb[20].mxu0 %vm59_vm1, %v5949_v60 }
 0x19c   :  { %7053 = vmatprep.mubr.msk.f32.mxu0 %vm59_vm1, %v5950_v62  ;;  %v1827_v48 = vpop.permute.xlu1 %1826 }
 0x19f   :  { %7054 = vmatmul.mubr.msk.f32.gmra.mrb[22].mxu0 %vm59_vm1, %v5951_v63 }
 0x1a0   :  { %7056 = vmatprep.mubr.msk.f32.mxu0 %vm59_vm1, %v5952_v0  ;;  %v1837_v63 = vpop.permute.xlu1 %1836 }
 0x1a3   :  { %7057 = vmatmul.mubr.msk.f32.gmra.mrb[24].mxu0 %vm59_vm1, %v5953_v1 }
 0x256   :  { %v7034_v11 = vpop.f32.mrb[8].mxu0 }
 0x257   :  { %v1850_v12 = vadd.f32 %v7034_v11, %v1767_v9  ;;  %v1634_v13 = vpop.f32.mrb[9].mxu0 }
 0x258   :  { %v1849_v15 = vadd.f32 %v1762_v5, %v1634_v13  ;;  %v1847_v13 = vpop.permute.xlu1 %1846 }
 0x259   :  { %v1868_v17 = vmax.f32 %v1850_v12, 0.0 }
 0x25a   :  { %v1867_v18 = vmax.f32 %v1849_v15, 0.0  ;;  %v7037_v19 = vpop.f32.mrb[10].mxu0 }
 0x25b   :  { %v1852_v20 = vadd.f32 %v7037_v19, %v1777_v6  ;;  %v1644_v21 = vpop.f32.mrb[11].mxu0 }
 0x25c   :  { %v9023_v22 = vpack.c.bf16 %v1868_v17, %v1867_v18  ;;  %v1851_v23 = vadd.f32 %v1772_v56, %v1644_v21 }
 0x25d   :  { %v1870_v24 = vmax.f32 %v1852_v20, 0.0 }
 0x25e   :  { %v1869_v26 = vmax.f32 %v1851_v23, 0.0  ;;  %v7040_v27 = vpop.f32.mrb[12].mxu0  ;;  %7820 = vmatpush1.bf16.msra.mxu1 %v9023_v22 }
 0x25f   :  { %v1854_v29 = vadd.f32 %v7040_v27, %v1787_v10  ;;  %v1654_v30 = vpop.f32.mrb[13].mxu0  ;;  %7821 = vmatprep.subr.bf16.mxu1 %v8298_v3  ;;  %v1887_v27 = vld [vmem:[%s10299_s4 + $0x10] sm:$0xff] }
 0x260   :  { %v9027_v31 = vpack.c.bf16 %v1870_v24, %v1869_v26  ;;  %v1853_v32 = vadd.f32 %v1782_v61, %v1654_v30  ;;  %v1888_v26 = vld [vmem:[%s10299_s4 + $0x18] sm:$0xff]  ;;  %v1891_v30 = vld [vmem:[%s10299_s4 + $0x30] sm:$0xff] }
 0x261   :  { %v1872_v33 = vmax.f32 %v1854_v29, 0.0  ;;  %v1892_v29 = vld [vmem:[%s10299_s4 + $0x38] sm:$0xff] }
 0x262   :  { %v1871_v34 = vmax.f32 %v1853_v32, 0.0  ;;  %v7043_v35 = vpop.f32.mrb[14].mxu0  ;;  %7823 = vmatpush1.bf16.msra.mxu1 %v9027_v31  ;;  %v1893_v32 = vld [vmem:[%s10299_s4 + $0x40] sm:$0xff] }
 0x263   :  { %v1856_v2 = vadd.f32 %v7043_v35, %v1797_v14  ;;  %v1664_v36 = vpop.f32.mrb[15].mxu0  ;;  %7824 = vmatprep.subr.bf16.mxu1 %v8298_v3  ;;  %v1898_v35 = vld [vmem:[%s10299_s4 + $0x68] sm:$0xff] }
 0x264   :  { %v9031_v8 = vpack.c.bf16 %v1872_v33, %v1871_v34  ;;  %v1855_v38 = vadd.f32 %v1792_v16, %v1664_v36  ;;  %v1842_v16 = vpop.permute.xlu0 %1841  ;;  %v1896_v33 = vld [vmem:[%s10299_s4 + $0x58] sm:$0xff]  ;;  %v1895_v34 = vld [vmem:[%s10299_s4 + $0x50] sm:$0xff] }
 0x265   :  { %v1874_v40 = vmax.f32 %v1856_v2, 0.0  ;;  %v1897_v2 = vld [vmem:[%s10299_s4 + $0x60] sm:$0xff]  ;;  %v1900_v36 = vld [vmem:[%s10299_s4 + $0x78] sm:$0xff] }
 0x266   :  { %v1873_v41 = vmax.f32 %v1855_v38, 0.0  ;;  %v7046_v42 = vpop.f32.mrb[16].mxu0  ;;  %7826 = vmatpush1.bf16.msra.mxu1 %v9031_v8  ;;  %v1901_v38 = vld [vmem:[%s10299_s4 + $0x80] sm:$0xff] }
 0x267   :  { %v1858_v43 = vadd.f32 %v7046_v42, %v1807_v25  ;;  %v1674_v44 = vpop.f32.mrb[17].mxu0  ;;  %7827 = vmatprep.subr.bf16.mxu1 %v8298_v3  ;;  %v1885_v25 = vld [vmem:[%s10299_s4] sm:$0xff] }
 0x268   :  { %v9035_v45 = vpack.c.bf16 %v1874_v40, %v1873_v41  ;;  %v1857_v46 = vadd.f32 %v1802_v28, %v1674_v44  ;;  %v1890_v28 = vld [vmem:[%s10299_s4 + $0x28] sm:$0xff]  ;;  %v5982_v40 = vld [vmem:[%s10299_s4 + $0x90] sm:$0xff]  ;;  %v5984_v42 = vld [vmem:[%s10299_s4 + $0xa0] sm:$0xff] }
 0x269   :  { %v1876_v47 = vmax.f32 %v1858_v43, 0.0  ;;  %v5985_v41 = vld [vmem:[%s10299_s4 + $0xa8] sm:$0xff]  ;;  %v5987_v43 = vld [vmem:[%s10299_s4 + $0xb8] sm:$0xff]  ;;  %v5986_v44 = vld [vmem:[%s10299_s4 + $0xb0] sm:$0xff] }
 0x26a   :  { %v1875_v49 = vmax.f32 %v1857_v46, 0.0  ;;  %v7049_v50 = vpop.f32.mrb[18].mxu0  ;;  %7829 = vmatpush1.bf16.msra.mxu1 %v9035_v45  ;;  %v5988_v46 = vld [vmem:[%s10299_s4 + $0xc0] sm:$0xff] }
 0x26b   :  { %v1860_v52 = vadd.f32 %v7049_v50, %v1817_v37  ;;  %v1684_v53 = vpop.f32.mrb[19].mxu0  ;;  %7830 = vmatprep.subr.bf16.mxu1 %v8298_v3  ;;  %v1899_v37 = vld [vmem:[%s10299_s4 + $0x70] sm:$0xff]  ;;  %v5992_v50 = vld [vmem:[%s10299_s4 + $0xe0] sm:$0xff] }
 0x26c   :  { %v9039_v54 = vpack.c.bf16 %v1876_v47, %v1875_v49  ;;  %v1859_v55 = vadd.f32 %v1812_v39, %v1684_v53  ;;  %v5983_v39 = vld [vmem:[%s10299_s4 + $0x98] sm:$0xff]  ;;  %v5993_v49 = vld [vmem:[%s10299_s4 + $0xe8] sm:$0xff] }
 0x26d   :  { %v1878_v57 = vmax.f32 %v1860_v52, 0.0  ;;  %v5991_v47 = vld [vmem:[%s10299_s4 + $0xd8] sm:$0xff]  ;;  %v5994_v52 = vld [vmem:[%s10299_s4 + $0xf0] sm:$0xff]  ;;  %v5997_v53 = vld [vmem:[%s10299_s4 + $0x108] sm:$0xff] }
 0x26e   :  { %v1877_v58 = vmax.f32 %v1859_v55, 0.0  ;;  %v7052_v59 = vpop.f32.mrb[20].mxu0  ;;  %7832 = vmatpush1.bf16.msra.mxu1 %v9039_v54  ;;  %v5999_v55 = vld [vmem:[%s10299_s4 + $0x118] sm:$0xff] }
 0x26f   :  { %v1862_v60 = vadd.f32 %v7052_v59, %v1827_v48  ;;  %v1694_v62 = vpop.f32.mrb[21].mxu0  ;;  %7833 = vmatprep.subr.bf16.mxu1 %v8298_v3  ;;  %v5990_v48 = vld [vmem:[%s10299_s4 + $0xd0] sm:$0xff]  ;;  %v2207_v59 = vld [vmem:[%s10300_s5 + $0x8] sm:$0xff] }
 0x270   :  { %v7834_v0 = vpack.c.bf16 %v1878_v57, %v1877_v58  ;;  %v1861_v1 = vadd.f32 %v1822_v51, %v1694_v62  ;;  %v5995_v51 = vld [vmem:[%s10299_s4 + $0xf8] sm:$0xff]  ;;  %v5998_v57 = vld [vmem:[%s10299_s4 + $0x110] sm:$0xff]  ;;  %v2206_v58 = vld [vmem:[%s10300_s5] sm:$0xff] }
 0x271   :  { %v1880_v56 = vmax.f32 %v1862_v60, 0.0  ;;  %v7873_v60 = vpack.c.bf16 %v2207_v59, %v2206_v58  ;;  %v2208_v62 = vld [vmem:[%s10300_s5 + $0x10] sm:$0xff] }
 0x272   :  { %v1879_v5 = vmax.f32 %v1861_v1, 0.0  ;;  %v7055_v6 = vpop.f32.mrb[22].mxu0  ;;  %7835 = vmatpush1.bf16.msra.mxu1 %v7834_v0 }
 0x273   :  { %v1864_v9 = vadd.f32 %v7055_v6, %v1837_v63  ;;  %v1704_v10 = vpop.f32.mrb[23].mxu0  ;;  %7836 = vmatprep.subr.bf16.mxu1 %v8298_v3  ;;  %v8299_v63 = vmov 0.0  }
 0x274   :  { %v7837_v61 = vpack.c.bf16 %v1880_v56, %v1879_v5  ;;  %v1863_v11 = vadd.f32 %v1832_v4, %v1704_v10  ;;  %7129 = vmatprep.mubr.msk.f32.mxu0 %vm8300_vm5, %v8299_v63 }
 0x275   :  { %v1882_v12 = vmax.f32 %v1864_v9, 0.0 }
 0x276   :  { %v1881_v14 = vmax.f32 %v1863_v11, 0.0  ;;  %v7058_v15 = vpop.f32.mrb[24].mxu0  ;;  %7838 = vmatpush1.bf16.msra.mxu1 %v7837_v61 }
 0x277   :  { %v1866_v17 = vadd.f32 %v7058_v15, %v1847_v13  ;;  %v1714_v18 = vpop.f32.mrb[25].mxu0  ;;  %7839 = vmatprep.subr.bf16.mxu1 %v8298_v3 }
 0x278   :  { %v7840_v19 = vpack.c.bf16 %v1882_v12, %v1881_v14  ;;  %v1865_v20 = vadd.f32 %v1842_v16, %v1714_v18 }
 0x279   :  { %v1884_v21 = vmax.f32 %v1866_v17, 0.0 }
 0x27a   :  { %v1883_v23 = vmax.f32 %v1865_v20, 0.0  ;;  %7841 = vmatpush1.bf16.msra.mxu1 %v7840_v19  ;;  %v6018_v20 = vld [vmem:[%s10300_s5 + $0x18] sm:$0xff] }
 0x27b   :  { %7842 = vmatprep.subr.bf16.mxu1 %v8298_v3 }
 0x27c   :  { %v7843_v24 = vpack.c.bf16 %v1884_v21, %v1883_v23  ;;  %v6019_v21 = vld [vmem:[%s10300_s5 + $0x20] sm:$0xff] }
 0x27e   :  { %7844 = vmatpush1.bf16.msra.mxu1 %v7843_v24 }
 0x27f   :  { %7845 = vmatprep.subr.bf16.mxu1 %v8298_v3 }
 0x281   :  { %1996 = vmatmul.mubr.f32.vlgmr.msra.gmra.mrb[12].mxu1 %v1885_v25 }
 0x282   :  { %7847 = vmatpush1.bf16.msra.mxu1 %v9023_v22  ;;  %5974 = vmatprep.mubr.msk.f32.mxu1 %vm1903_vm4, %v1888_v26  ;;  %v1889_v22 = vld [vmem:[%s10299_s4 + $0x20] sm:$0xff] }
 0x283   :  { %7848 = vmatprep.subr.bf16.mxu1 %v8298_v3 }
 0x285   :  { %2001 = vmatmul.mubr.f32.gmra.mrb[14].mxu1 %v1887_v27 }
 0x286   :  { %7850 = vmatpush1.bf16.msra.mxu1 %v9027_v31  ;;  %5975 = vmatprep.mubr.msk.f32.mxu1 %vm1903_vm4, %v1890_v28  ;;  %v1894_v31 = vld [vmem:[%s10299_s4 + $0x48] sm:$0xff] }
 0x287   :  { %7851 = vmatprep.subr.bf16.mxu1 %v8298_v3 }
 0x289   :  { %2006 = vmatmul.mubr.f32.gmra.mrb[16].mxu1 %v1889_v22 }
 0x28a   :  { %7853 = vmatpush1.bf16.msra.mxu1 %v9031_v8  ;;  %5976 = vmatprep.mubr.msk.f32.mxu1 %vm1903_vm4, %v1892_v29  ;;  %v1902_v8 = vld [vmem:[%s10299_s4 + $0x88] sm:$0xff] }
 0x28b   :  { %7854 = vmatprep.subr.bf16.mxu1 %v8298_v3  ;;  %v6020_v29 = vld [vmem:[%s10300_s5 + $0x28] sm:$0xff] }
 0x28d   :  { %2011 = vmatmul.mubr.f32.gmra.mrb[18].mxu1 %v1891_v30 }
 0x28e   :  { %7856 = vmatpush1.bf16.msra.mxu1 %v9035_v45  ;;  %5977 = vmatprep.mubr.msk.f32.mxu1 %vm1903_vm4, %v1894_v31  ;;  %v5989_v45 = vld [vmem:[%s10299_s4 + $0xc8] sm:$0xff] }
 0x28f   :  { %7857 = vmatprep.subr.bf16.mxu1 %v8298_v3 }
 0x291   :  { %2016 = vmatmul.mubr.f32.gmra.mrb[20].mxu1 %v1893_v32 }
 0x292   :  { %7859 = vmatpush1.bf16.msra.mxu1 %v9039_v54  ;;  %5978 = vmatprep.mubr.msk.f32.mxu1 %vm1903_vm4, %v1896_v33  ;;  %v5996_v54 = vld [vmem:[%s10299_s4 + $0x100] sm:$0xff] }
 0x293   :  { %7860 = vmatprep.subr.bf16.mxu1 %v8298_v3 }
 0x295   :  { %2021 = vmatmul.mubr.f32.gmra.mrb[22].mxu1 %v1895_v34 }
 0x296   :  { %7862 = vmatpush1.bf16.msra.mxu1 %v7834_v0  ;;  %5979 = vmatprep.mubr.msk.f32.mxu1 %vm1903_vm4, %v1898_v35 }
 0x297   :  { %7863 = vmatprep.subr.bf16.mxu1 %v8298_v3 }
 0x299   :  { %2026 = vmatmul.mubr.f32.gmra.mrb[24].mxu1 %v1897_v2 }
 0x29a   :  { %7865 = vmatpush1.bf16.msra.mxu1 %v7837_v61  ;;  %5980 = vmatprep.mubr.msk.f32.mxu1 %vm1903_vm4, %v1900_v36 }
 0x29b   :  { %7866 = vmatprep.subr.bf16.mxu1 %v8298_v3 }
 0x29d   :  { %2031 = vmatmul.mubr.f32.gmra.mrb[26].mxu1 %v1899_v37 }
 0x29e   :  { %7868 = vmatpush1.bf16.msra.mxu1 %v7840_v19  ;;  %5981 = vmatprep.mubr.msk.f32.mxu1 %vm1903_vm4, %v1902_v8 }
 0x29f   :  { %7869 = vmatprep.subr.bf16.mxu1 %v8298_v3 }
 0x2a1   :  { %2036 = vmatmul.mubr.f32.gmra.mrb[28].mxu1 %v1901_v38 }
 0x2a2   :  { %7871 = vmatpush1.bf16.msra.mxu1 %v7843_v24  ;;  %6000 = vmatprep.mubr.msk.f32.mxu1 %vm1903_vm4, %v5983_v39  ;;  %v7876_v24 = vpack.c.bf16 %v6019_v21, %v6018_v20 }
 0x2a3   :  { %7872 = vmatprep.subr.bf16.mxu1 %v8298_v3 }
 0x2a5   :  { %2152 = vmatmul.mubr.f32.vlgmr.msra.gmra.mrb[30].mxu1 %v5982_v40 }
 0x2a6   :  { %6001 = vmatprep.mubr.msk.f32.mxu1 %vm1903_vm4, %v5985_v41  ;;  %7874 = vmatpush3.bf16.msra.mxu1 %v7873_v60 }
 0x2a7   :  { %7063 = vmatprep.subr.mxu1 %v8299_v63 }
 0x2a9   :  { %2157 = vmatmul.mubr.f32.gmra.mrb[32].mxu1 %v5984_v42 }
 0x2aa   :  { %6002 = vmatprep.mubr.msk.f32.mxu1 %vm1903_vm4, %v5987_v43  ;;  %7064 = vmatpush3.msra.mxu1 %v2208_v62 }
 0x2ab   :  { %7875 = vmatprep.subr.bf16.mxu1 %v8298_v3 }
 0x2ad   :  { %2162 = vmatmul.mubr.f32.gmra.mrb[34].mxu1 %v5986_v44 }
 0x2ae   :  { %6003 = vmatprep.mubr.msk.f32.mxu1 %vm1903_vm4, %v5989_v45 }
 0x2b1   :  { %2167 = vmatmul.mubr.f32.gmra.mrb[36].mxu1 %v5988_v46 }
 0x2b2   :  { %6004 = vmatprep.mubr.msk.f32.mxu1 %vm1903_vm4, %v5991_v47 }
 0x2b5   :  { %2172 = vmatmul.mubr.f32.gmra.mrb[38].mxu1 %v5990_v48 }
 0x2b6   :  { %6005 = vmatprep.mubr.msk.f32.mxu1 %vm1903_vm4, %v5993_v49  ;;  %v6040_v49 = vld [vmem:[%s10302_s7 + $0x10] sm:$0xff] }
 0x2b9   :  { %2177 = vmatmul.mubr.f32.gmra.mrb[40].mxu1 %v5992_v50  ;;  %v6041_v50 = vld [vmem:[%s10302_s7 + $0x18] sm:$0xf] }
 0x2ba   :  { %6006 = vmatprep.mubr.msk.f32.mxu1 %vm1903_vm4, %v5995_v51  ;;  %v7883_v51 = vpack.c.bf16 %v6041_v50, %v6040_v49 }
 0x2bd   :  { %2182 = vmatmul.mubr.f32.gmra.mrb[42].mxu1 %v5994_v52  ;;  %v2470_v52 = vld [vmem:[%s10302_s7] sm:$0xff] }
 0x2be   :  { %6007 = vmatprep.mubr.msk.f32.mxu1 %vm1903_vm4, %v5997_v53  ;;  %v2471_v53 = vld [vmem:[%s10302_s7 + $0x8] sm:$0xf] }
 0x2c1   :  { %2187 = vmatmul.mubr.f32.gmra.mrb[44].mxu1 %v5996_v54  ;;  %v7879_v54 = vpack.c.bf16 %v2471_v53, %v2470_v52 }
 0x2c2   :  { %6008 = vmatprep.mubr.msk.f32.mxu1 %vm1903_vm4, %v5999_v55 }
 0x2c3   :  { %7881 = vmatpush3.bf16.msk.msra.mxu0 %vm8405_vm3, %v7879_v54 }
 0x2c5   :  { %2192 = vmatmul.mubr.f32.gmra.mrb[46].mxu1 %v5998_v57 }
 0x2c6   :  { %7065 = vmatprep.mubr.msk.f32.mxu1 %vm8300_vm5, %v8299_v63 }
 0x354   :  { %v1997_v0 = vpop.f32.mrb[12].mxu1 }
 0x355   :  { %v1999_v1 = vpop.f32.mrb[13].mxu1 }
 0x358   :  { %v2002_v4 = vpop.f32.mrb[14].mxu1 }
 0x359   :  { %v2004_v56 = vpop.f32.mrb[15].mxu1 }
 0x35c   :  { %v2007_v5 = vpop.f32.mrb[16].mxu1 }
 0x35d   :  { %v2009_v6 = vpop.f32.mrb[17].mxu1 }
 0x360   :  { %v2012_v9 = vpop.f32.mrb[18].mxu1 }
 0x361   :  { %v2014_v10 = vpop.f32.mrb[19].mxu1 }
 0x364   :  { %v2017_v61 = vpop.f32.mrb[20].mxu1 }
 0x365   :  { %v2019_v11 = vpop.f32.mrb[21].mxu1 }
 0x368   :  { %v2022_v12 = vpop.f32.mrb[22].mxu1 }
 0x369   :  { %v2024_v13 = vpop.f32.mrb[23].mxu1 }
 0x36c   :  { %v2027_v14 = vpop.f32.mrb[24].mxu1 }
 0x36d   :  { %v2029_v15 = vpop.f32.mrb[25].mxu1 }
 0x36e   :  { %v6101_v15 = vld [vmem:[%s10302_s7 + $0x28] sm:$0xf] }
 0x370   :  { %v2032_v16 = vpop.f32.mrb[26].mxu1 }
 0x371   :  { %v2034_v17 = vpop.f32.mrb[27].mxu1 }
 0x374   :  { %v2037_v18 = vpop.f32.mrb[28].mxu1 }
 0x375   :  { %v2039_v19 = vpop.f32.mrb[29].mxu1 }
 0x378   :  { %v2153_v23 = vpop.f32.mrb[30].mxu1 }
 0x379   :  { %v2197_v25 = vmax.f32 %v1997_v0, %v2153_v23  ;;  %v2155_v26 = vpop.f32.mrb[31].mxu1 }
 0x37b   :  { %7066 = vmatmul.mubr.msk.f32.vlgmr.msra.gmra.mrb[48].mxu1 %vm2209_vm6, %v2197_v25 }
 0x37c   :  { %v2158_v27 = vpop.f32.mrb[32].mxu1  ;;  %7068 = vmatprep.mubr.msk.f32.mxu1 %vm8300_vm5, %v8299_v63  ;;  %7877 = vmatpush3.bf16.msra.mxu1 %v7876_v24 }
 0x37d   :  { %v2198_v28 = vmax.f32 %v2002_v4, %v2158_v27  ;;  %v2160_v22 = vpop.f32.mrb[33].mxu1  ;;  %7096 = vmatprep.subr.mxu1 %v8299_v63 }
 0x37f   :  { %7069 = vmatmul.mubr.msk.f32.gmra.mrb[50].mxu1 %vm2209_vm6, %v2198_v28 }
 0x380   :  { %v2163_v30 = vpop.f32.mrb[34].mxu1  ;;  %7071 = vmatprep.mubr.msk.f32.mxu1 %vm8300_vm5, %v8299_v63  ;;  %7097 = vmatpush3.msra.mxu1 %v6020_v29 }
 0x381   :  { %v2199_v31 = vmax.f32 %v2007_v5, %v2163_v30  ;;  %v2165_v32 = vpop.f32.mrb[35].mxu1  ;;  %7882 = vmatprep.subr.bf16.mxu1 %v8298_v3 }
 0x383   :  { %7072 = vmatmul.mubr.msk.f32.gmra.mrb[52].mxu1 %vm2209_vm6, %v2199_v31 }
 0x384   :  { %v2168_v33 = vpop.f32.mrb[36].mxu1  ;;  %7074 = vmatprep.mubr.msk.f32.mxu1 %vm8300_vm5, %v8299_v63 }
 0x385   :  { %v2200_v34 = vmax.f32 %v2012_v9, %v2168_v33  ;;  %v2170_v35 = vpop.f32.mrb[37].mxu1 }
 0x387   :  { %7075 = vmatmul.mubr.msk.f32.gmra.mrb[54].mxu1 %vm2209_vm6, %v2200_v34 }
 0x388   :  { %v2173_v2 = vpop.f32.mrb[38].mxu1  ;;  %7077 = vmatprep.mubr.msk.f32.mxu1 %vm8300_vm5, %v8299_v63 }
 0x389   :  { %v2201_v36 = vmax.f32 %v2017_v61, %v2173_v2  ;;  %v2175_v37 = vpop.f32.mrb[39].mxu1 }
 0x38b   :  { %7078 = vmatmul.mubr.msk.f32.gmra.mrb[56].mxu1 %vm2209_vm6, %v2201_v36 }
 0x38c   :  { %v2178_v8 = vpop.f32.mrb[40].mxu1  ;;  %7080 = vmatprep.mubr.msk.f32.mxu1 %vm8300_vm5, %v8299_v63 }
 0x38d   :  { %v2202_v38 = vmax.f32 %v2022_v12, %v2178_v8  ;;  %v2180_v39 = vpop.f32.mrb[41].mxu1 }
 0x38f   :  { %7081 = vmatmul.mubr.msk.f32.gmra.mrb[58].mxu1 %vm2209_vm6, %v2202_v38 }
 0x390   :  { %v2183_v40 = vpop.f32.mrb[42].mxu1  ;;  %7083 = vmatprep.mubr.msk.f32.mxu1 %vm8300_vm5, %v8299_v63 }
 0x391   :  { %v2203_v41 = vmax.f32 %v2027_v14, %v2183_v40  ;;  %v2185_v42 = vpop.f32.mrb[43].mxu1  ;;  %v6100_v14 = vld [vmem:[%s10302_s7 + $0x20] sm:$0xff] }
 0x392   :  { %v7919_v19 = vpack.c.bf16 %v6101_v15, %v6100_v14  ;;  %v6144_v42 = vld [vmem:[%s10302_s7 + $0x30] sm:$0xff] }
 0x393   :  { %7084 = vmatmul.mubr.msk.f32.gmra.mrb[60].mxu1 %vm2209_vm6, %v2203_v41 }
 0x394   :  { %v2188_v43 = vpop.f32.mrb[44].mxu1  ;;  %7086 = vmatprep.mubr.msk.f32.mxu1 %vm8300_vm5, %v8299_v63 }
 0x395   :  { %v2204_v44 = vmax.f32 %v2032_v16, %v2188_v43  ;;  %v2190_v45 = vpop.f32.mrb[45].mxu1  ;;  %v6145_v43 = vld [vmem:[%s10302_s7 + $0x38] sm:$0xf] }
 0x396   :  { %v6189_v45 = vld [vmem:[%s10302_s7 + $0x48] sm:$0xf] }
 0x397   :  { %7087 = vmatmul.mubr.msk.f32.gmra.mrb[62].mxu1 %vm2209_vm6, %v2204_v44 }
 0x398   :  { %v2193_v46 = vpop.f32.mrb[46].mxu1  ;;  %7089 = vmatprep.mubr.msk.f32.mxu1 %vm8300_vm5, %v8299_v63 }
 0x399   :  { %v2205_v47 = vmax.f32 %v2037_v18, %v2193_v46  ;;  %v2195_v48 = vpop.f32.mrb[47].mxu1 }
 0x39b   :  { %7090 = vmatmul.mubr.msk.f32.gmra.mrb[64].mxu1 %vm2209_vm6, %v2205_v47 }
 0x39c   :  { %7098 = vmatprep.mubr.msk.f32.mxu1 %vm8300_vm5, %v8299_v63 }
 0x39f   :  { %7099 = vmatmul.mubr.msk.f32.vlgmr.msra.gmra.mrb[66].mxu1 %vm2209_vm6, %v2197_v25 }
 0x3a0   :  { %7101 = vmatprep.mubr.msk.f32.mxu1 %vm8300_vm5, %v8299_v63  ;;  %7885 = vmatpush3.bf16.msk.msra.mxu1 %vm8405_vm3, %v7883_v51 }
 0x3a1   :  { %7918 = vmatprep.subr.bf16.mxu1 %v8298_v3 }
 0x3a3   :  { %7102 = vmatmul.mubr.msk.f32.gmra.mrb[68].mxu1 %vm2209_vm6, %v2198_v28 }
 0x3a4   :  { %7104 = vmatprep.mubr.msk.f32.mxu1 %vm8300_vm5, %v8299_v63 }
 0x3a7   :  { %7105 = vmatmul.mubr.msk.f32.gmra.mrb[70].mxu1 %vm2209_vm6, %v2199_v31 }
 0x3a8   :  { %7107 = vmatprep.mubr.msk.f32.mxu1 %vm8300_vm5, %v8299_v63 }
 0x3ab   :  { %7108 = vmatmul.mubr.msk.f32.gmra.mrb[72].mxu1 %vm2209_vm6, %v2200_v34 }
 0x3ac   :  { %7110 = vmatprep.mubr.msk.f32.mxu1 %vm8300_vm5, %v8299_v63 }
 0x3af   :  { %7111 = vmatmul.mubr.msk.f32.gmra.mrb[74].mxu1 %vm2209_vm6, %v2201_v36 }
 0x3b0   :  { %7113 = vmatprep.mubr.msk.f32.mxu1 %vm8300_vm5, %v8299_v63 }
 0x3b3   :  { %7114 = vmatmul.mubr.msk.f32.gmra.mrb[76].mxu1 %vm2209_vm6, %v2202_v38 }
 0x3b4   :  { %7116 = vmatprep.mubr.msk.f32.mxu1 %vm8300_vm5, %v8299_v63 }
 0x3b7   :  { %7117 = vmatmul.mubr.msk.f32.gmra.mrb[78].mxu1 %vm2209_vm6, %v2203_v41 }
 0x3b8   :  { %7119 = vmatprep.mubr.msk.f32.mxu1 %vm8300_vm5, %v8299_v63 }
 0x3bb   :  { %7120 = vmatmul.mubr.msk.f32.gmra.mrb[80].mxu1 %vm2209_vm6, %v2204_v44  ;;  %v7939_v44 = vpack.c.bf16 %v6145_v43, %v6144_v42  ;;  %v6059_v42 = vld [vmem:[%s10301_s6 + $0xb8] sm:$0xff]  ;;  %v6060_v43 = vld [vmem:[%s10301_s6 + $0xc0] sm:$0xff] }
 0x3bc   :  { %7122 = vmatprep.mubr.msk.f32.mxu1 %vm8300_vm5, %v8299_v63 }
 0x3bf   :  { %7123 = vmatmul.mubr.msk.f32.gmra.mrb[82].mxu1 %vm2209_vm6, %v2205_v47 }
 0x3c0   :  { %7160 = vmatprep.mubr.msk.f32.mxu1 %vm8300_vm5, %v8299_v63 }
 0x44e   :  { %v2303_v55 = vpop.f32.mrb[48].mxu1 }
 0x44f   :  { %v7067_v57 = vpop.f32.mrb[49].mxu1 }
 0x452   :  { %v2308_v58 = vpop.f32.mrb[50].mxu1 }
 0x453   :  { %v7070_v59 = vpop.f32.mrb[51].mxu1 }
 0x456   :  { %v2313_v60 = vpop.f32.mrb[52].mxu1 }
 0x457   :  { %v7073_v62 = vpop.f32.mrb[53].mxu1 }
 0x45a   :  { %v2318_v0 = vpop.f32.mrb[54].mxu1 }
 0x45b   :  { %v7076_v1 = vpop.f32.mrb[55].mxu1 }
 0x45e   :  { %v2323_v4 = vpop.f32.mrb[56].mxu1 }
 0x45f   :  { %v7079_v56 = vpop.f32.mrb[57].mxu1 }
 0x462   :  { %v2328_v5 = vpop.f32.mrb[58].mxu1 }
 0x463   :  { %v7082_v6 = vpop.f32.mrb[59].mxu1 }
 0x466   :  { %v2333_v9 = vpop.f32.mrb[60].mxu1 }
 0x467   :  { %v7085_v10 = vpop.f32.mrb[61].mxu1 }
 0x46a   :  { %v2338_v61 = vpop.f32.mrb[62].mxu1 }
 0x46b   :  { %v7088_v11 = vpop.f32.mrb[63].mxu1 }
 0x46e   :  { %v9280_v12 = vpop.f32.mrb[64].mxu1 }
 0x46f   :  { %v7091_v13 = vpop.f32.mrb[65].mxu1 }
 0x472   :  { %v2417_v16 = vpop.f32.mrb[66].mxu1 }
 0x473   :  { %v9288_v17 = vmax.f32 %v2303_v55, %v2417_v16  ;;  %v7100_v18 = vpop.f32.mrb[67].mxu1 }
 0x475   :  { %7130 = vmatmul.mubr.msk.f32.vlgmr.msra.gmra.mrb[26].mxu0 %vm2472_vm7, %v9288_v17  ;;  %7161 = vmatmul.mubr.msk.f32.vlgmr.msra.gmra.mrb[84].mxu1 %vm2472_vm7, %v9288_v17 }
 0x476   :  { %v2422_v20 = vpop.f32.mrb[68].mxu1  ;;  %7132 = vmatprep.mubr.msk.f32.mxu0 %vm8300_vm5, %v8299_v63  ;;  %7163 = vmatprep.mubr.msk.f32.mxu1 %vm8300_vm5, %v8299_v63 }
 0x477   :  { %v9298_v21 = vmax.f32 %v2308_v58, %v2422_v20  ;;  %v7103_v23 = vpop.f32.mrb[69].mxu1  ;;  %7921 = vmatpush3.bf16.msk.msra.mxu1 %vm8405_vm3, %v7919_v19 }
 0x478   :  { %7938 = vmatprep.subr.bf16.mxu1 %v8298_v3 }
 0x479   :  { %7133 = vmatmul.mubr.msk.f32.gmra.mrb[28].mxu0 %vm2472_vm7, %v9298_v21  ;;  %7164 = vmatmul.mubr.msk.f32.gmra.mrb[86].mxu1 %vm2472_vm7, %v9298_v21 }
 0x47a   :  { %v2427_v24 = vpop.f32.mrb[70].mxu1  ;;  %7135 = vmatprep.mubr.msk.f32.mxu0 %vm8300_vm5, %v8299_v63  ;;  %7166 = vmatprep.mubr.msk.f32.mxu1 %vm8300_vm5, %v8299_v63 }
 0x47b   :  { %v9311_v25 = vmax.f32 %v2313_v60, %v2427_v24  ;;  %v7106_v26 = vpop.f32.mrb[71].mxu1 }
 0x47d   :  { %7136 = vmatmul.mubr.msk.f32.gmra.mrb[30].mxu0 %vm2472_vm7, %v9311_v25  ;;  %7167 = vmatmul.mubr.msk.f32.gmra.mrb[88].mxu1 %vm2472_vm7, %v9311_v25 }
 0x47e   :  { %v2432_v27 = vpop.f32.mrb[72].mxu1  ;;  %7138 = vmatprep.mubr.msk.f32.mxu0 %vm8300_vm5, %v8299_v63  ;;  %7169 = vmatprep.mubr.msk.f32.mxu1 %vm8300_vm5, %v8299_v63 }
 0x47f   :  { %v9321_v28 = vmax.f32 %v2318_v0, %v2432_v27  ;;  %v7109_v22 = vpop.f32.mrb[73].mxu1 }
 0x481   :  { %7139 = vmatmul.mubr.msk.f32.gmra.mrb[32].mxu0 %vm2472_vm7, %v9321_v28  ;;  %7170 = vmatmul.mubr.msk.f32.gmra.mrb[90].mxu1 %vm2472_vm7, %v9321_v28 }
 0x482   :  { %v2437_v29 = vpop.f32.mrb[74].mxu1  ;;  %7141 = vmatprep.mubr.msk.f32.mxu0 %vm8300_vm5, %v8299_v63  ;;  %7172 = vmatprep.mubr.msk.f32.mxu1 %vm8300_vm5, %v8299_v63 }
 0x483   :  { %v9331_v30 = vmax.f32 %v2323_v4, %v2437_v29  ;;  %v7112_v31 = vpop.f32.mrb[75].mxu1 }
 0x484   :  { %v6053_v31 = vld [vmem:[%s10301_s6 + $0x88] sm:$0xff] }
 0x485   :  { %7142 = vmatmul.mubr.msk.f32.gmra.mrb[34].mxu0 %vm2472_vm7, %v9331_v30  ;;  %7173 = vmatmul.mubr.msk.f32.gmra.mrb[92].mxu1 %vm2472_vm7, %v9331_v30 }
 0x486   :  { %v2442_v32 = vpop.f32.mrb[76].mxu1  ;;  %7144 = vmatprep.mubr.msk.f32.mxu0 %vm8300_vm5, %v8299_v63  ;;  %7175 = vmatprep.mubr.msk.f32.mxu1 %vm8300_vm5, %v8299_v63 }
 0x487   :  { %v9341_v33 = vmax.f32 %v2328_v5, %v2442_v32  ;;  %v7115_v34 = vpop.f32.mrb[77].mxu1  ;;  %v6054_v32 = vld [vmem:[%s10301_s6 + $0x90] sm:$0xff] }
 0x489   :  { %7145 = vmatmul.mubr.msk.f32.gmra.mrb[36].mxu0 %vm2472_vm7, %v9341_v33  ;;  %7176 = vmatmul.mubr.msk.f32.gmra.mrb[94].mxu1 %vm2472_vm7, %v9341_v33 }
 0x48a   :  { %v2447_v35 = vpop.f32.mrb[78].mxu1  ;;  %7147 = vmatprep.mubr.msk.f32.mxu0 %vm8300_vm5, %v8299_v63  ;;  %7178 = vmatprep.mubr.msk.f32.mxu1 %vm8300_vm5, %v8299_v63 }
 0x48b   :  { %v9351_v2 = vmax.f32 %v2333_v9, %v2447_v35  ;;  %v7118_v36 = vpop.f32.mrb[79].mxu1  ;;  %v6055_v35 = vld [vmem:[%s10301_s6 + $0x98] sm:$0xff] }
 0x48d   :  { %7148 = vmatmul.mubr.msk.f32.gmra.mrb[38].mxu0 %vm2472_vm7, %v9351_v2  ;;  %7179 = vmatmul.mubr.msk.f32.gmra.mrb[96].mxu1 %vm2472_vm7, %v9351_v2 }
 0x48e   :  { %v2452_v37 = vpop.f32.mrb[80].mxu1  ;;  %7150 = vmatprep.mubr.msk.f32.mxu0 %vm8300_vm5, %v8299_v63  ;;  %7181 = vmatprep.mubr.msk.f32.mxu1 %vm8300_vm5, %v8299_v63 }
 0x48f   :  { %v9361_v8 = vmax.f32 %v2338_v61, %v2452_v37  ;;  %v7121_v38 = vpop.f32.mrb[81].mxu1 }
 0x490   :  { %v6057_v38 = vld [vmem:[%s10301_s6 + $0xa8] sm:$0xff] }
 0x491   :  { %7151 = vmatmul.mubr.msk.f32.gmra.mrb[40].mxu0 %vm2472_vm7, %v9361_v8  ;;  %7182 = vmatmul.mubr.msk.f32.gmra.mrb[98].mxu1 %vm2472_vm7, %v9361_v8 }
 0x492   :  { %v2457_v39 = vpop.f32.mrb[82].mxu1  ;;  %7153 = vmatprep.mubr.msk.f32.mxu0 %vm8300_vm5, %v8299_v63  ;;  %7184 = vmatprep.mubr.msk.f32.mxu1 %vm8300_vm5, %v8299_v63 }
 0x493   :  { %v9372_v40 = vmax.f32 %v9280_v12, %v2457_v39  ;;  %v7124_v41 = vpop.f32.mrb[83].mxu1  ;;  %v6058_v39 = vld [vmem:[%s10301_s6 + $0xb0] sm:$0xff] }
 0x495   :  { %7154 = vmatmul.mubr.msk.f32.gmra.mrb[42].mxu0 %vm2472_vm7, %v9372_v40  ;;  %7185 = vmatmul.mubr.msk.f32.gmra.mrb[100].mxu1 %vm2472_vm7, %v9372_v40 }
 0x496   :  { %7275 = vmatprep.mubr.msk.f32.mxu1 %vm8300_vm5, %v8299_v63  ;;  %7205 = vmatprep.mubr.msk.f32.mxu0 %vm2762_vm8, %v6052_v7  ;;  %v6062_v7 = vld [vmem:[%s10301_s6 + $0xd0] sm:$0xff] }
 0x499   :  { %7276 = vmatmul.mubr.msk.f32.vlgmr.msra.gmra.mrb[102].mxu1 %vm2472_vm7, %v9288_v17 }
 0x49a   :  { %7278 = vmatprep.mubr.msk.f32.mxu1 %vm8300_vm5, %v8299_v63  ;;  %7941 = vmatpush3.bf16.msk.msra.mxu1 %vm8405_vm3, %v7939_v44 }
 0x49b   :  { %7958 = vmatprep.subr.bf16.mxu1 %v8298_v3  ;;  %v6188_v3 = vld [vmem:[%s10302_s7 + $0x40] sm:$0xff] }
 0x49c   :  { %v7959_v46 = vpack.c.bf16 %v6189_v45, %v6188_v3 }
 0x49d   :  { %7279 = vmatmul.mubr.msk.f32.gmra.mrb[104].mxu1 %vm2472_vm7, %v9298_v21 }
 0x49e   :  { %7281 = vmatprep.mubr.msk.f32.mxu1 %vm8300_vm5, %v8299_v63 }
 0x4a1   :  { %7282 = vmatmul.mubr.msk.f32.gmra.mrb[106].mxu1 %vm2472_vm7, %v9311_v25 }
 0x4a2   :  { %7284 = vmatprep.mubr.msk.f32.mxu1 %vm8300_vm5, %v8299_v63 }
 0x4a5   :  { %7285 = vmatmul.mubr.msk.f32.gmra.mrb[108].mxu1 %vm2472_vm7, %v9321_v28 }
 0x4a6   :  { %7287 = vmatprep.mubr.msk.f32.mxu1 %vm8300_vm5, %v8299_v63 }
 0x4a9   :  { %7288 = vmatmul.mubr.msk.f32.gmra.mrb[110].mxu1 %vm2472_vm7, %v9331_v30 }
 0x4aa   :  { %7290 = vmatprep.mubr.msk.f32.mxu1 %vm8300_vm5, %v8299_v63 }
 0x4ad   :  { %7291 = vmatmul.mubr.msk.f32.gmra.mrb[112].mxu1 %vm2472_vm7, %v9341_v33 }
 0x4ae   :  { %7293 = vmatprep.mubr.msk.f32.mxu1 %vm8300_vm5, %v8299_v63 }
 0x4b1   :  { %7294 = vmatmul.mubr.msk.f32.gmra.mrb[114].mxu1 %vm2472_vm7, %v9351_v2 }
 0x4b2   :  { %7296 = vmatprep.mubr.msk.f32.mxu1 %vm8300_vm5, %v8299_v63 }
 0x4b5   :  { %7297 = vmatmul.mubr.msk.f32.gmra.mrb[116].mxu1 %vm2472_vm7, %v9361_v8 }
 0x4b6   :  { %7299 = vmatprep.mubr.msk.f32.mxu1 %vm8300_vm5, %v8299_v63 }
 0x4b9   :  { %7300 = vmatmul.mubr.msk.f32.gmra.mrb[118].mxu1 %vm2472_vm7, %v9372_v40 }
 0x4ba   :  { %7348 = vmatprep.mubr.msk.f32.mxu1 %vm8300_vm5, %v8299_v63 }
 0x4bd   :  { %7349 = vmatmul.mubr.msk.f32.vlgmr.msra.gmra.mrb[120].mxu1 %vm2472_vm7, %v9288_v17 }
 0x4be   :  { %7351 = vmatprep.mubr.msk.f32.mxu1 %vm8300_vm5, %v8299_v63  ;;  %7961 = vmatpush3.bf16.msk.msra.mxu1 %vm8405_vm3, %v7959_v46  ;;  %v6061_v46 = vld [vmem:[%s10301_s6 + $0xc8] sm:$0xff] }
 0x4c1   :  { %7352 = vmatmul.mubr.msk.f32.gmra.mrb[122].mxu1 %vm2472_vm7, %v9298_v21 }
 0x4c2   :  { %7354 = vmatprep.mubr.msk.f32.mxu1 %vm8300_vm5, %v8299_v63 }
 0x4c5   :  { %7355 = vmatmul.mubr.msk.f32.gmra.mrb[124].mxu1 %vm2472_vm7, %v9311_v25 }
 0x4c6   :  { %7357 = vmatprep.mubr.msk.f32.mxu1 %vm8300_vm5, %v8299_v63 }
 0x4c9   :  { %7358 = vmatmul.mubr.msk.f32.gmra.mrb[126].mxu1 %vm2472_vm7, %v9321_v28 }
 0x4ca   :  { %7360 = vmatprep.mubr.msk.f32.mxu1 %vm8300_vm5, %v8299_v63 }
 0x4cd   :  { %7361 = vmatmul.mubr.msk.f32.gmra.mrb[128].mxu1 %vm2472_vm7, %v9331_v30 }
 0x4ce   :  { %7363 = vmatprep.mubr.msk.f32.mxu1 %vm8300_vm5, %v8299_v63 }
 0x4d1   :  { %7364 = vmatmul.mubr.msk.f32.gmra.mrb[130].mxu1 %vm2472_vm7, %v9341_v33 }
 0x4d2   :  { %7366 = vmatprep.mubr.msk.f32.mxu1 %vm8300_vm5, %v8299_v63 }
 0x4d5   :  { %7367 = vmatmul.mubr.msk.f32.gmra.mrb[132].mxu1 %vm2472_vm7, %v9351_v2 }
 0x4d6   :  { %7369 = vmatprep.mubr.msk.f32.mxu1 %vm8300_vm5, %v8299_v63 }
 0x4d9   :  { %7370 = vmatmul.mubr.msk.f32.gmra.mrb[134].mxu1 %vm2472_vm7, %v9361_v8 }
 0x4da   :  { %7372 = vmatprep.mubr.msk.f32.mxu1 %vm8300_vm5, %v8299_v63 }
 0x4dd   :  { %7373 = vmatmul.mubr.msk.f32.gmra.mrb[136].mxu1 %vm2472_vm7, %v9372_v40 }
 0x4de   :  { %7421 = vmatprep.mubr.msk.f32.mxu1 %vm8300_vm5, %v8299_v63 }
 0x4e1   :  { %7422 = vmatmul.mubr.msk.f32.vlgmr.msra.gmra.mrb[138].mxu1 %vm2472_vm7, %v9288_v17 }
 0x4e2   :  { %7424 = vmatprep.mubr.msk.f32.mxu1 %vm8300_vm5, %v8299_v63 }
 0x4e5   :  { %7425 = vmatmul.mubr.msk.f32.gmra.mrb[140].mxu1 %vm2472_vm7, %v9298_v21 }
 0x4e6   :  { %7427 = vmatprep.mubr.msk.f32.mxu1 %vm8300_vm5, %v8299_v63 }
 0x4e9   :  { %7428 = vmatmul.mubr.msk.f32.gmra.mrb[142].mxu1 %vm2472_vm7, %v9311_v25 }
 0x4ea   :  { %7430 = vmatprep.mubr.msk.f32.mxu1 %vm8300_vm5, %v8299_v63 }
 0x4ed   :  { %7431 = vmatmul.mubr.msk.f32.gmra.mrb[144].mxu1 %vm2472_vm7, %v9321_v28 }
 0x4ee   :  { %7433 = vmatprep.mubr.msk.f32.mxu1 %vm8300_vm5, %v8299_v63 }
 0x4f1   :  { %7434 = vmatmul.mubr.msk.f32.gmra.mrb[146].mxu1 %vm2472_vm7, %v9331_v30 }
 0x4f2   :  { %7436 = vmatprep.mubr.msk.f32.mxu1 %vm8300_vm5, %v8299_v63 }
 0x4f5   :  { %7437 = vmatmul.mubr.msk.f32.gmra.mrb[148].mxu1 %vm2472_vm7, %v9341_v33 }
 0x4f6   :  { %7439 = vmatprep.mubr.msk.f32.mxu1 %vm8300_vm5, %v8299_v63 }
 0x4f9   :  { %7440 = vmatmul.mubr.msk.f32.gmra.mrb[150].mxu1 %vm2472_vm7, %v9351_v2  ;;  %v6056_v2 = vld [vmem:[%s10301_s6 + $0xa0] sm:$0xff] }
 0x4fa   :  { %7442 = vmatprep.mubr.msk.f32.mxu1 %vm8300_vm5, %v8299_v63 }
 0x4fd   :  { %7443 = vmatmul.mubr.msk.f32.gmra.mrb[152].mxu1 %vm2472_vm7, %v9361_v8 }
 0x4fe   :  { %7445 = vmatprep.mubr.msk.f32.mxu1 %vm8300_vm5, %v8299_v63 }
 0x501   :  { %7446 = vmatmul.mubr.msk.f32.gmra.mrb[154].mxu1 %vm2472_vm7, %v9372_v40 }
 0x548   :  { %v2569_v47 = vpop.f32.mrb[26].mxu0  ;;  %v2701_v48 = vpop.f32.mrb[84].mxu1 }
 0x549   :  { %v7131_v49 = vpop.f32.mrb[27].mxu0  ;;  %v7162_v50 = vpop.f32.mrb[85].mxu1 }
 0x54a   :  { %v6063_v49 = vld [vmem:[%s10301_s6 + $0xd8] sm:$0xff]  ;;  %v6064_v50 = vld [vmem:[%s10301_s6 + $0xe0] sm:$0xff] }
 0x54c   :  { %v2574_v51 = vpop.f32.mrb[28].mxu0  ;;  %v2706_v52 = vpop.f32.mrb[86].mxu1 }
 0x54d   :  { %v7902_v53 = vpack.c.bf16 %v2574_v51, %v2569_v47  ;;  %v7886_v54 = vpack.c.bf16 %v2706_v52, %v2701_v48  ;;  %v7134_v55 = vpop.f32.mrb[29].mxu0  ;;  %v7165_v57 = vpop.f32.mrb[87].mxu1 }
 0x54e   :  { %v6066_v55 = vld [vmem:[%s10301_s6 + $0xf0] sm:$0xff] }
 0x54f   :  { %7887 = vmatprep.subr.bf16.mxu0 %v7886_v54 }
 0x550   :  { %v2579_v58 = vpop.f32.mrb[30].mxu0  ;;  %v2711_v59 = vpop.f32.mrb[88].mxu1  ;;  %7889 = vmatpush3.bf16.msra.mxu0 %v7886_v54  ;;  %v6065_v54 = vld [vmem:[%s10301_s6 + $0xe8] sm:$0xff] }
 0x551   :  { %v7137_v60 = vpop.f32.mrb[31].mxu0  ;;  %v7168_v62 = vpop.f32.mrb[89].mxu1 }
 0x552   :  { %v2613_v60 = vld [vmem:[%s10301_s6] sm:$0xff] }
 0x554   :  { %v2584_v63 = vpop.f32.mrb[32].mxu0  ;;  %v2716_v0 = vpop.f32.mrb[90].mxu1 }
 0x555   :  { %v7906_v1 = vpack.c.bf16 %v2584_v63, %v2579_v58  ;;  %v7890_v4 = vpack.c.bf16 %v2716_v0, %v2711_v59  ;;  %v7140_v56 = vpop.f32.mrb[33].mxu0  ;;  %v7171_v5 = vpop.f32.mrb[91].mxu1  ;;  %v6067_v59 = vld [vmem:[%s10301_s6 + $0xf8] sm:$0xff] }
 0x557   :  { %7891 = vmatprep.subr.bf16.mxu0 %v7890_v4 }
 0x558   :  { %v2589_v6 = vpop.f32.mrb[34].mxu0  ;;  %v2721_v9 = vpop.f32.mrb[92].mxu1  ;;  %7893 = vmatpush3.bf16.msra.mxu0 %v7890_v4  ;;  %v2615_v4 = vld [vmem:[%s10301_s6 + $0x10] sm:$0xff] }
 0x559   :  { %v7143_v10 = vpop.f32.mrb[35].mxu0  ;;  %v7174_v61 = vpop.f32.mrb[93].mxu1 }
 0x55c   :  { %v2594_v11 = vpop.f32.mrb[36].mxu0  ;;  %v2726_v12 = vpop.f32.mrb[94].mxu1 }
 0x55d   :  { %v7910_v13 = vpack.c.bf16 %v2594_v11, %v2589_v6  ;;  %v7894_v14 = vpack.c.bf16 %v2726_v12, %v2721_v9  ;;  %v7146_v15 = vpop.f32.mrb[37].mxu0  ;;  %v7177_v16 = vpop.f32.mrb[95].mxu1  ;;  %v2616_v6 = vld [vmem:[%s10301_s6 + $0x18] sm:$0xff]  ;;  %v2617_v9 = vld [vmem:[%s10301_s6 + $0x20] sm:$0xff]  ;;  %v2618_v11 = vld [vmem:[%s10301_s6 + $0x28] sm:$0xff] }
 0x55e   :  { %v2619_v12 = vld [vmem:[%s10301_s6 + $0x30] sm:$0xff]  ;;  %v2620_v16 = vld [vmem:[%s10301_s6 + $0x38] sm:$0xff] }
 0x55f   :  { %7895 = vmatprep.subr.bf16.mxu0 %v7894_v14 }
 0x560   :  { %v2599_v17 = vpop.f32.mrb[38].mxu0  ;;  %v2731_v18 = vpop.f32.mrb[96].mxu1  ;;  %7897 = vmatpush3.bf16.msra.mxu0 %v7894_v14 }
 0x561   :  { %v7149_v19 = vpop.f32.mrb[39].mxu0  ;;  %v7180_v20 = vpop.f32.mrb[97].mxu1 }
 0x562   :  { %v2622_v20 = vld [vmem:[%s10301_s6 + $0x48] sm:$0xff] }
 0x564   :  { %v2604_v21 = vpop.f32.mrb[40].mxu0  ;;  %v2736_v23 = vpop.f32.mrb[98].mxu1 }
 0x565   :  { %v7914_v24 = vpack.c.bf16 %v2604_v21, %v2599_v17  ;;  %v7898_v25 = vpack.c.bf16 %v2736_v23, %v2731_v18  ;;  %v7152_v26 = vpop.f32.mrb[41].mxu0  ;;  %v7183_v27 = vpop.f32.mrb[99].mxu1  ;;  %v2621_v17 = vld [vmem:[%s10301_s6 + $0x40] sm:$0xff]  ;;  %v2623_v21 = vld [vmem:[%s10301_s6 + $0x50] sm:$0xff] }
 0x566   :  { %v2624_v26 = vld [vmem:[%s10301_s6 + $0x58] sm:$0xff]  ;;  %v2625_v27 = vld [vmem:[%s10301_s6 + $0x60] sm:$0xff] }
 0x567   :  { %7899 = vmatprep.subr.bf16.mxu0 %v7898_v25 }
 0x568   :  { %v2609_v28 = vpop.f32.mrb[42].mxu0  ;;  %v2741_v22 = vpop.f32.mrb[100].mxu1  ;;  %7901 = vmatpush3.bf16.msra.mxu0 %v7898_v25 }
 0x569   :  { %v7155_v29 = vpop.f32.mrb[43].mxu0  ;;  %v7186_v30 = vpop.f32.mrb[101].mxu1  ;;  %7203 = vmatprep.subr.mxu0 %v2741_v22 }
 0x56a   :  { %v2626_v29 = vld [vmem:[%s10301_s6 + $0x68] sm:$0xff]  ;;  %v2627_v30 = vld [vmem:[%s10301_s6 + $0x70] sm:$0xff] }
 0x56c   :  { %7204 = vmatpush3.msra.mxu0 %v2741_v22  ;;  %v3221_v33 = vpop.f32.mrb[102].mxu1 }
 0x56d   :  { %7206 = vmatmul.mubr.msk.f32.vlgmr.msra.gmra.mrb[44].mxu0 %vm2762_vm8, %v6053_v31  ;;  %7903 = vmatprep.subr.bf16.mxu0 %v7902_v53  ;;  %v7277_v34 = vpop.f32.mrb[103].mxu1 }
 0x56e   :  { %7905 = vmatpush3.bf16.msra.mxu0 %v7902_v53  ;;  %7208 = vmatprep.mubr.msk.f32.mxu0 %vm2762_vm8, %v6054_v32  ;;  %v2628_v34 = vld [vmem:[%s10301_s6 + $0x78] sm:$0xff] }
 0x56f   :  { %7907 = vmatprep.subr.bf16.mxu0 %v7906_v1 }
 0x570   :  { %v3226_v36 = vpop.f32.mrb[104].mxu1 }
 0x571   :  { %v7922_v37 = vpack.c.bf16 %v3226_v36, %v3221_v33  ;;  %7209 = vmatmul.mubr.msk.f32.gmra.mrb[46].mxu0 %vm2762_vm8, %v6055_v35  ;;  %v7280_v8 = vpop.f32.mrb[105].mxu1  ;;  %v6112_v35 = vld [vmem:[%s10301_s6 + $0x100] sm:$0xff] }
 0x572   :  { %7909 = vmatpush3.bf16.msra.mxu0 %v7906_v1  ;;  %7211 = vmatprep.mubr.msk.f32.mxu0 %vm2762_vm8, %v6056_v2  ;;  %v2614_v1 = vld [vmem:[%s10301_s6 + $0x8] sm:$0xff]  ;;  %v6114_v8 = vld [vmem:[%s10301_s6 + $0x110] sm:$0xff] }
 0x573   :  { %7911 = vmatprep.subr.bf16.mxu0 %v7910_v13 }
 0x574   :  { %v3231_v40 = vpop.f32.mrb[106].mxu1 }
 0x575   :  { %7212 = vmatmul.mubr.msk.f32.gmra.mrb[48].mxu0 %vm2762_vm8, %v6057_v38  ;;  %v7283_v41 = vpop.f32.mrb[107].mxu1 }
 0x576   :  { %7913 = vmatpush3.bf16.msra.mxu0 %v7910_v13  ;;  %7214 = vmatprep.mubr.msk.f32.mxu0 %vm2762_vm8, %v6058_v39  ;;  %v6115_v41 = vld [vmem:[%s10301_s6 + $0x118] sm:$0xff] }
 0x577   :  { %7915 = vmatprep.subr.bf16.mxu0 %v7914_v24 }
 0x578   :  { %v3236_v44 = vpop.f32.mrb[108].mxu1 }
 0x579   :  { %v7926_v3 = vpack.c.bf16 %v3236_v44, %v3231_v40  ;;  %7215 = vmatmul.mubr.msk.f32.gmra.mrb[50].mxu0 %vm2762_vm8, %v6059_v42  ;;  %v7286_v45 = vpop.f32.mrb[109].mxu1  ;;  %v6116_v42 = vld [vmem:[%s10301_s6 + $0x120] sm:$0xff] }
 0x57a   :  { %7917 = vmatpush3.bf16.msra.mxu0 %v7914_v24  ;;  %7217 = vmatprep.mubr.msk.f32.mxu0 %vm2762_vm8, %v6060_v43  ;;  %v6118_v45 = vld [vmem:[%s10301_s6 + $0x130] sm:$0xff] }
 0x57b   :  { %7245 = vmatprep.subr.mxu0 %v2609_v28 }
 0x57c   :  { %v3241_v47 = vpop.f32.mrb[110].mxu1 }
 0x57d   :  { %7218 = vmatmul.mubr.msk.f32.gmra.mrb[52].mxu0 %vm2762_vm8, %v6061_v46  ;;  %v7289_v48 = vpop.f32.mrb[111].mxu1 }
 0x57e   :  { %7246 = vmatpush3.msra.mxu0 %v2609_v28  ;;  %7220 = vmatprep.mubr.msk.f32.mxu0 %vm2762_vm8, %v6062_v7  ;;  %v6120_v48 = vld [vmem:[%s10301_s6 + $0x140] sm:$0xff] }
 0x57f   :  { %7923 = vmatprep.subr.bf16.mxu0 %v7922_v37 }
 0x580   :  { %v3246_v51 = vpop.f32.mrb[112].mxu1 }
 0x581   :  { %v7930_v52 = vpack.c.bf16 %v3246_v51, %v3241_v47  ;;  %7221 = vmatmul.mubr.msk.f32.gmra.mrb[54].mxu0 %vm2762_vm8, %v6063_v49  ;;  %v7292_v53 = vpop.f32.mrb[113].mxu1  ;;  %v6119_v47 = vld [vmem:[%s10301_s6 + $0x138] sm:$0xff] }
 0x582   :  { %7223 = vmatprep.mubr.msk.f32.mxu0 %vm2762_vm8, %v6064_v50  ;;  %v6122_v53 = vld [vmem:[%s10301_s6 + $0x150] sm:$0xff] }
 0x584   :  { %v3251_v57 = vpop.f32.mrb[114].mxu1 }
 0x585   :  { %7224 = vmatmul.mubr.msk.f32.gmra.mrb[56].mxu0 %vm2762_vm8, %v6065_v54  ;;  %v7295_v58 = vpop.f32.mrb[115].mxu1 }
 0x586   :  { %7226 = vmatprep.mubr.msk.f32.mxu0 %vm2762_vm8, %v6066_v55  ;;  %v6124_v58 = vld [vmem:[%s10301_s6 + $0x160] sm:$0xff] }
 0x588   :  { %v3256_v62 = vpop.f32.mrb[116].mxu1 }
 0x589   :  { %v7934_v63 = vpack.c.bf16 %v3256_v62, %v3251_v57  ;;  %7227 = vmatmul.mubr.msk.f32.gmra.mrb[58].mxu0 %vm2762_vm8, %v6067_v59  ;;  %v7298_v0 = vpop.f32.mrb[117].mxu1  ;;  %v6123_v57 = vld [vmem:[%s10301_s6 + $0x158] sm:$0xff] }
 0x58a   :  { %7247 = vmatprep.mubr.msk.f32.mxu0 %vm2762_vm8, %v2613_v60  ;;  %v6126_v0 = vld [vmem:[%s10301_s6 + $0x170] sm:$0xff] }
 0x58c   :  { %v3261_v56 = vpop.f32.mrb[118].mxu1 }
 0x58d   :  { %7248 = vmatmul.mubr.msk.f32.vlgmr.msra.gmra.mrb[44].mxu0 %vm2762_vm8, %v2614_v1  ;;  %v7301_v5 = vpop.f32.mrb[119].mxu1 }
 0x58e   :  { %7925 = vmatpush3.bf16.msra.mxu0 %v7922_v37  ;;  %7250 = vmatprep.mubr.msk.f32.mxu0 %vm2762_vm8, %v2615_v4  ;;  %v6113_v37 = vld [vmem:[%s10301_s6 + $0x108] sm:$0xff]  ;;  %v6156_v5 = vld [vmem:[%s10301_s6 + $0x180] sm:$0xff] }
 0x58f   :  { %7927 = vmatprep.subr.bf16.mxu0 %v7926_v3 }
 0x590   :  { %v3563_v10 = vpop.f32.mrb[120].mxu1 }
 0x591   :  { %7251 = vmatmul.mubr.msk.f32.gmra.mrb[46].mxu0 %vm2762_vm8, %v2616_v6  ;;  %v7350_v61 = vpop.f32.mrb[121].mxu1 }
 0x592   :  { %7929 = vmatpush3.bf16.msra.mxu0 %v7926_v3  ;;  %7253 = vmatprep.mubr.msk.f32.mxu0 %vm2762_vm8, %v2617_v9  ;;  %v6117_v3 = vld [vmem:[%s10301_s6 + $0x128] sm:$0xff] }
 0x593   :  { %7931 = vmatprep.subr.bf16.mxu0 %v7930_v52  ;;  %v6157_v61 = vld [vmem:[%s10301_s6 + $0x188] sm:$0xff] }
 0x594   :  { %v3568_v13 = vpop.f32.mrb[122].mxu1 }
 0x595   :  { %v7942_v14 = vpack.c.bf16 %v3568_v13, %v3563_v10  ;;  %7254 = vmatmul.mubr.msk.f32.gmra.mrb[48].mxu0 %vm2762_vm8, %v2618_v11  ;;  %v7353_v15 = vpop.f32.mrb[123].mxu1  ;;  %v6158_v11 = vld [vmem:[%s10301_s6 + $0x190] sm:$0xff] }
 0x596   :  { %7933 = vmatpush3.bf16.msra.mxu0 %v7930_v52  ;;  %7256 = vmatprep.mubr.msk.f32.mxu0 %vm2762_vm8, %v2619_v12  ;;  %v6121_v52 = vld [vmem:[%s10301_s6 + $0x148] sm:$0xff]  ;;  %v6160_v15 = vld [vmem:[%s10301_s6 + $0x1a0] sm:$0xff] }
 0x597   :  { %7935 = vmatprep.subr.bf16.mxu0 %v7934_v63 }
 0x598   :  { %v3573_v18 = vpop.f32.mrb[124].mxu1 }
 0x599   :  { %7257 = vmatmul.mubr.msk.f32.gmra.mrb[50].mxu0 %vm2762_vm8, %v2620_v16  ;;  %v7356_v19 = vpop.f32.mrb[125].mxu1 }
 0x59a   :  { %7937 = vmatpush3.bf16.msra.mxu0 %v7934_v63  ;;  %7259 = vmatprep.mubr.msk.f32.mxu0 %vm2762_vm8, %v2621_v17  ;;  %v6125_v63 = vld [vmem:[%s10301_s6 + $0x168] sm:$0xff] }
 0x59b   :  { %7318 = vmatprep.subr.mxu0 %v3261_v56  ;;  %v6161_v19 = vld [vmem:[%s10301_s6 + $0x1a8] sm:$0xff] }
 0x59c   :  { %v3578_v23 = vpop.f32.mrb[126].mxu1 }
 0x59d   :  { %v7946_v24 = vpack.c.bf16 %v3578_v23, %v3573_v18  ;;  %7260 = vmatmul.mubr.msk.f32.gmra.mrb[52].mxu0 %vm2762_vm8, %v2622_v20  ;;  %v7359_v25 = vpop.f32.mrb[127].mxu1  ;;  %v6162_v20 = vld [vmem:[%s10301_s6 + $0x1b0] sm:$0xff] }
 0x59e   :  { %7319 = vmatpush3.msra.mxu0 %v3261_v56  ;;  %7262 = vmatprep.mubr.msk.f32.mxu0 %vm2762_vm8, %v2623_v21  ;;  %v6127_v56 = vld [vmem:[%s10301_s6 + $0x178] sm:$0xff]  ;;  %v6164_v25 = vld [vmem:[%s10301_s6 + $0x1c0] sm:$0xff] }
 0x59f   :  { %7943 = vmatprep.subr.bf16.mxu0 %v7942_v14 }
 0x5a0   :  { %v3583_v28 = vpop.f32.mrb[128].mxu1 }
 0x5a1   :  { %7263 = vmatmul.mubr.msk.f32.gmra.mrb[54].mxu0 %vm2762_vm8, %v2624_v26  ;;  %v7362_v22 = vpop.f32.mrb[129].mxu1  ;;  %v6165_v26 = vld [vmem:[%s10301_s6 + $0x1c8] sm:$0xff] }
 0x5a2   :  { %7265 = vmatprep.mubr.msk.f32.mxu0 %vm2762_vm8, %v2625_v27  ;;  %v6166_v27 = vld [vmem:[%s10301_s6 + $0x1d0] sm:$0xff]  ;;  %v6168_v22 = vld [vmem:[%s10301_s6 + $0x1e0] sm:$0xff] }
 0x5a4   :  { %v3588_v31 = vpop.f32.mrb[130].mxu1 }
 0x5a5   :  { %v7950_v32 = vpack.c.bf16 %v3588_v31, %v3583_v28  ;;  %7266 = vmatmul.mubr.msk.f32.gmra.mrb[56].mxu0 %vm2762_vm8, %v2626_v29  ;;  %v7365_v33 = vpop.f32.mrb[131].mxu1  ;;  %v6167_v28 = vld [vmem:[%s10301_s6 + $0x1d8] sm:$0xff]  ;;  %v6169_v29 = vld [vmem:[%s10301_s6 + $0x1e8] sm:$0xff] }
 0x5a6   :  { %7268 = vmatprep.mubr.msk.f32.mxu0 %vm2762_vm8, %v2627_v30  ;;  %v6170_v30 = vld [vmem:[%s10301_s6 + $0x1f0] sm:$0xff]  ;;  %v6171_v31 = vld [vmem:[%s10301_s6 + $0x1f8] sm:$0xff]  ;;  %v6201_v33 = vld [vmem:[%s10301_s6 + $0x208] sm:$0xff] }
 0x5a8   :  { %v3593_v2 = vpop.f32.mrb[132].mxu1 }
 0x5a9   :  { %7269 = vmatmul.mubr.msk.f32.gmra.mrb[58].mxu0 %vm2762_vm8, %v2628_v34  ;;  %v7368_v36 = vpop.f32.mrb[133].mxu1  ;;  %v6202_v34 = vld [vmem:[%s10301_s6 + $0x210] sm:$0xff] }
 0x5aa   :  { %7320 = vmatprep.mubr.msk.f32.mxu0 %vm2762_vm8, %v6112_v35  ;;  %v6203_v35 = vld [vmem:[%s10301_s6 + $0x218] sm:$0xff]  ;;  %v6205_v36 = vld [vmem:[%s10301_s6 + $0x228] sm:$0xff] }
 0x5ac   :  { %v3598_v38 = vpop.f32.mrb[134].mxu1 }
 0x5ad   :  { %v7954_v39 = vpack.c.bf16 %v3598_v38, %v3593_v2  ;;  %7321 = vmatmul.mubr.msk.f32.vlgmr.msra.gmra.mrb[44].mxu0 %vm2762_vm8, %v6113_v37  ;;  %v7371_v40 = vpop.f32.mrb[135].mxu1  ;;  %v6204_v2 = vld [vmem:[%s10301_s6 + $0x220] sm:$0xff]  ;;  %v6206_v37 = vld [vmem:[%s10301_s6 + $0x230] sm:$0xff] }
 0x5ae   :  { %7945 = vmatpush3.bf16.msra.mxu0 %v7942_v14  ;;  %7323 = vmatprep.mubr.msk.f32.mxu0 %vm2762_vm8, %v6114_v8  ;;  %v6159_v14 = vld [vmem:[%s10301_s6 + $0x198] sm:$0xff]  ;;  %v6208_v38 = vld [vmem:[%s10301_s6 + $0x240] sm:$0xff]  ;;  %v6210_v40 = vld [vmem:[%s10301_s6 + $0x250] sm:$0xff] }
 0x5af   :  { %7947 = vmatprep.subr.bf16.mxu0 %v7946_v24  ;;  %v6207_v8 = vld [vmem:[%s10301_s6 + $0x238] sm:$0xff] }
 0x5b0   :  { %v3603_v43 = vpop.f32.mrb[136].mxu1 }
 0x5b1   :  { %7324 = vmatmul.mubr.msk.f32.gmra.mrb[46].mxu0 %vm2762_vm8, %v6115_v41  ;;  %v7374_v44 = vpop.f32.mrb[137].mxu1  ;;  %v6211_v41 = vld [vmem:[%s10301_s6 + $0x258] sm:$0xff] }
 0x5b2   :  { %7949 = vmatpush3.bf16.msra.mxu0 %v7946_v24  ;;  %7326 = vmatprep.mubr.msk.f32.mxu0 %vm2762_vm8, %v6116_v42  ;;  %v6163_v24 = vld [vmem:[%s10301_s6 + $0x1b8] sm:$0xff]  ;;  %v6212_v42 = vld [vmem:[%s10301_s6 + $0x260] sm:$0xff]  ;;  %v6214_v44 = vld [vmem:[%s10301_s6 + $0x270] sm:$0xff] }
 0x5b3   :  { %7951 = vmatprep.subr.bf16.mxu0 %v7950_v32 }
 0x5b4   :  { %v3905_v46 = vpop.f32.mrb[138].mxu1 }
 0x5b5   :  { %7327 = vmatmul.mubr.msk.f32.gmra.mrb[48].mxu0 %vm2762_vm8, %v6117_v3  ;;  %v7423_v7 = vpop.f32.mrb[139].mxu1  ;;  %v6215_v3 = vld [vmem:[%s10301_s6 + $0x278] sm:$0xff] }
 0x5b6   :  { %7953 = vmatpush3.bf16.msra.mxu0 %v7950_v32  ;;  %7329 = vmatprep.mubr.msk.f32.mxu0 %vm2762_vm8, %v6118_v45  ;;  %v6200_v32 = vld [vmem:[%s10301_s6 + $0x200] sm:$0xff]  ;;  %v4194_v7 = vpop.permute.xlu0 %4193 }
 0x5b7   :  { %7955 = vmatprep.subr.bf16.mxu0 %v7954_v39  ;;  %v4303_v45 = vld [vmem:[%s10304_s9] sm:$0xff] }
 0x5b8   :  { %v3910_v49 = vpop.f32.mrb[140].mxu1  ;;  %7522 = vmatprep.mubr.f32.mxu1 %v4303_v45 }
 0x5b9   :  { %v7962_v50 = vpack.c.bf16 %v3910_v49, %v3905_v46  ;;  %7330 = vmatmul.mubr.msk.f32.gmra.mrb[50].mxu0 %vm2762_vm8, %v6119_v47  ;;  %v7426_v51 = vpop.f32.mrb[141].mxu1  ;;  %v4199_v46 = vpop.permute.xlu1 %4198 }
 0x5ba   :  { %7957 = vmatpush3.bf16.msra.mxu0 %v7954_v39  ;;  %7332 = vmatprep.mubr.msk.f32.mxu0 %vm2762_vm8, %v6120_v48  ;;  %v6209_v39 = vld [vmem:[%s10301_s6 + $0x248] sm:$0xff]  ;;  %v4204_v48 = vpop.permute.xlu0 %4203 }
 0x5bb   :  { %7391 = vmatprep.subr.mxu0 %v3603_v43 }
 0x5bc   :  { %v3915_v54 = vpop.f32.mrb[142].mxu1 }
 0x5bd   :  { %7333 = vmatmul.mubr.msk.f32.gmra.mrb[52].mxu0 %vm2762_vm8, %v6121_v52  ;;  %v7429_v55 = vpop.f32.mrb[143].mxu1  ;;  %v4209_v47 = vpop.permute.xlu1 %4208 }
 0x5be   :  { %7392 = vmatpush3.msra.mxu0 %v3603_v43  ;;  %7335 = vmatprep.mubr.msk.f32.mxu0 %vm2762_vm8, %v6122_v53  ;;  %v6213_v43 = vld [vmem:[%s10301_s6 + $0x268] sm:$0xff] }
 0x5bf   :  { %7963 = vmatprep.subr.bf16.mxu0 %v7962_v50 }
 0x5c0   :  { %v3920_v59 = vpop.f32.mrb[144].mxu1 }
 0x5c1   :  { %v7966_v60 = vpack.c.bf16 %v3920_v59, %v3915_v54  ;;  %7336 = vmatmul.mubr.msk.f32.gmra.mrb[54].mxu0 %vm2762_vm8, %v6123_v57  ;;  %v7432_v62 = vpop.f32.mrb[145].mxu1  ;;  %v4219_v49 = vpop.permute.xlu1 %4218 }
 0x5c2   :  { %7338 = vmatprep.mubr.msk.f32.mxu0 %vm2762_vm8, %v6124_v58 }
 0x5c4   :  { %v3925_v1 = vpop.f32.mrb[146].mxu1 }
 0x5c5   :  { %7339 = vmatmul.mubr.msk.f32.gmra.mrb[56].mxu0 %vm2762_vm8, %v6125_v63  ;;  %v7435_v4 = vpop.f32.mrb[147].mxu1  ;;  %v4229_v57 = vpop.permute.xlu1 %4228 }
 0x5c6   :  { %7341 = vmatprep.mubr.msk.f32.mxu0 %vm2762_vm8, %v6126_v0 }
 0x5c8   :  { %v3930_v6 = vpop.f32.mrb[148].mxu1 }
 0x5c9   :  { %v7970_v9 = vpack.c.bf16 %v3930_v6, %v3925_v1  ;;  %7342 = vmatmul.mubr.msk.f32.gmra.mrb[58].mxu0 %vm2762_vm8, %v6127_v56  ;;  %v7438_v10 = vpop.f32.mrb[149].mxu1 }
 0x5ca   :  { %7393 = vmatprep.mubr.msk.f32.mxu0 %vm2762_vm8, %v6156_v5  ;;  %v4239_v10 = vpop.permute.xlu1 %4238 }
 0x5cc   :  { %v3935_v12 = vpop.f32.mrb[150].mxu1 }
 0x5cd   :  { %7394 = vmatmul.mubr.msk.f32.vlgmr.msra.gmra.mrb[44].mxu0 %vm2762_vm8, %v6157_v61  ;;  %v7441_v13 = vpop.f32.mrb[151].mxu1 }
 0x5ce   :  { %7965 = vmatpush3.bf16.msra.mxu0 %v7962_v50  ;;  %7396 = vmatprep.mubr.msk.f32.mxu0 %vm2762_vm8, %v6158_v11  ;;  %v4214_v50 = vpop.permute.xlu0 %4213 }
 0x5cf   :  { %7967 = vmatprep.subr.bf16.mxu0 %v7966_v60 }
 0x5d0   :  { %v3940_v16 = vpop.f32.mrb[152].mxu1 }
 0x5d1   :  { %v7974_v17 = vpack.c.bf16 %v3940_v16, %v3935_v12  ;;  %7397 = vmatmul.mubr.msk.f32.gmra.mrb[46].mxu0 %vm2762_vm8, %v6159_v14  ;;  %v7444_v18 = vpop.f32.mrb[153].mxu1 }
 0x5d2   :  { %7969 = vmatpush3.bf16.msra.mxu0 %v7966_v60  ;;  %7399 = vmatprep.mubr.msk.f32.mxu0 %vm2762_vm8, %v6160_v15  ;;  %v4224_v60 = vpop.permute.xlu0 %4223 }
 0x5d3   :  { %7971 = vmatprep.subr.bf16.mxu0 %v7970_v9 }
 0x5d4   :  { %v3945_v21 = vpop.f32.mrb[154].mxu1 }
 0x5d5   :  { %7400 = vmatmul.mubr.msk.f32.gmra.mrb[48].mxu0 %vm2762_vm8, %v6161_v19  ;;  %v7447_v23 = vpop.f32.mrb[155].mxu1 }
 0x5d6   :  { %7973 = vmatpush3.bf16.msra.mxu0 %v7970_v9  ;;  %7402 = vmatprep.mubr.msk.f32.mxu0 %vm2762_vm8, %v6162_v20  ;;  %v4234_v12 = vpop.permute.xlu0 %4233 }
 0x5d7   :  { %7975 = vmatprep.subr.bf16.mxu0 %v7974_v17 }
 0x5d9   :  { %7403 = vmatmul.mubr.msk.f32.gmra.mrb[50].mxu0 %vm2762_vm8, %v6163_v24 }
 0x5da   :  { %7977 = vmatpush3.bf16.msra.mxu0 %v7974_v17  ;;  %7405 = vmatprep.mubr.msk.f32.mxu0 %vm2762_vm8, %v6164_v25  ;;  %v4244_v25 = vpop.permute.xlu0 %4243 }
 0x5db   :  { %7464 = vmatprep.subr.mxu0 %v3945_v21 }
 0x5dd   :  { %7406 = vmatmul.mubr.msk.f32.gmra.mrb[52].mxu0 %vm2762_vm8, %v6165_v26 }
 0x5de   :  { %7465 = vmatpush3.msra.mxu0 %v3945_v21  ;;  %7408 = vmatprep.mubr.msk.f32.mxu0 %vm2762_vm8, %v6166_v27  ;;  %v4249_v21 = vpop.permute.xlu1 %4248 }
 0x5e1   :  { %7409 = vmatmul.mubr.msk.f32.gmra.mrb[54].mxu0 %vm2762_vm8, %v6167_v28 }
 0x5e2   :  { %7411 = vmatprep.mubr.msk.f32.mxu0 %vm2762_vm8, %v6168_v22 }
 0x5e5   :  { %7412 = vmatmul.mubr.msk.f32.gmra.mrb[56].mxu0 %vm2762_vm8, %v6169_v29 }
 0x5e6   :  { %7414 = vmatprep.mubr.msk.f32.mxu0 %vm2762_vm8, %v6170_v30 }
 0x5e9   :  { %7415 = vmatmul.mubr.msk.f32.gmra.mrb[58].mxu0 %vm2762_vm8, %v6171_v31 }
 0x5ea   :  { %7466 = vmatprep.mubr.msk.f32.mxu0 %vm2762_vm8, %v6200_v32 }
 0x5ed   :  { %7467 = vmatmul.mubr.msk.f32.vlgmr.msra.gmra.mrb[44].mxu0 %vm2762_vm8, %v6201_v33 }
 0x5ee   :  { %7469 = vmatprep.mubr.msk.f32.mxu0 %vm2762_vm8, %v6202_v34  ;;  %v4259_v34 = vpop.permute.xlu1 %4258 }
 0x5f1   :  { %7470 = vmatmul.mubr.msk.f32.gmra.mrb[46].mxu0 %vm2762_vm8, %v6203_v35 }
 0x5f2   :  { %7472 = vmatprep.mubr.msk.f32.mxu0 %vm2762_vm8, %v6204_v2 }
 0x5f5   :  { %7473 = vmatmul.mubr.msk.f32.gmra.mrb[48].mxu0 %vm2762_vm8, %v6205_v36  ;;  %v4254_v36 = vpop.permute.xlu0 %4253 }
 0x5f6   :  { %7475 = vmatprep.mubr.msk.f32.mxu0 %vm2762_vm8, %v6206_v37 }
 0x5f9   :  { %7476 = vmatmul.mubr.msk.f32.gmra.mrb[50].mxu0 %vm2762_vm8, %v6207_v8 }
 0x5fa   :  { %7478 = vmatprep.mubr.msk.f32.mxu0 %vm2762_vm8, %v6208_v38 }
 0x5fd   :  { %7479 = vmatmul.mubr.msk.f32.gmra.mrb[52].mxu0 %vm2762_vm8, %v6209_v39 }
 0x5fe   :  { %7481 = vmatprep.mubr.msk.f32.mxu0 %vm2762_vm8, %v6210_v40 }
 0x601   :  { %7482 = vmatmul.mubr.msk.f32.gmra.mrb[54].mxu0 %vm2762_vm8, %v6211_v41 }
 0x602   :  { %7484 = vmatprep.mubr.msk.f32.mxu0 %vm2762_vm8, %v6212_v42 }
 0x605   :  { %7485 = vmatmul.mubr.msk.f32.gmra.mrb[56].mxu0 %vm2762_vm8, %v6213_v43 }
 0x606   :  { %7487 = vmatprep.mubr.msk.f32.mxu0 %vm2762_vm8, %v6214_v44  ;;  %v4269_v44 = vpop.permute.xlu1 %4268 }
 0x609   :  { %7488 = vmatmul.mubr.msk.f32.gmra.mrb[58].mxu0 %vm2762_vm8, %v6215_v3 }
 0x6c0   :  { %v7468_v51 = vpop.f32.mrb[44].mxu0 }
 0x6c1   :  { %v4272_v52 = vadd.f32 %v7468_v51, %v4199_v46  ;;  %v4080_v53 = vpop.f32.mrb[45].mxu0  ;;  %v4264_v46 = vpop.permute.xlu0 %4263 }
 0x6c2   :  { %v4271_v54 = vadd.f32 %v4194_v7, %v4080_v53  ;;  %v4304_v53 = vld [vmem:[%s10304_s9 + $0x8] sm:$0xff] }
 0x6c3   :  { %v4288_v55 = vmax.f32 %v4272_v52, 0.0 }
 0x6c4   :  { %v4287_v58 = vmax.f32 %v4271_v54, 0.0  ;;  %v7471_v59 = vpop.f32.mrb[46].mxu0  ;;  %v4305_v54 = vld [vmem:[%s10304_s9 + $0x10] sm:$0xff] }
 0x6c5   :  { %v4274_v62 = vadd.f32 %v7471_v59, %v4209_v47  ;;  %v4090_v63 = vpop.f32.mrb[47].mxu0  ;;  %v4309_v59 = vld [vmem:[%s10304_s9 + $0x30] sm:$0xff] }
 0x6c6   :  { %v9826_v0 = vpack.c.bf16 %v4288_v55, %v4287_v58  ;;  %v4273_v1 = vadd.f32 %v4204_v48, %v4090_v63  ;;  %v4306_v55 = vld [vmem:[%s10304_s9 + $0x18] sm:$0xff]  ;;  %v4308_v58 = vld [vmem:[%s10304_s9 + $0x28] sm:$0xff] }
 0x6c7   :  { %v4290_v4 = vmax.f32 %v4274_v62, 0.0  ;;  %v6232_v62 = vld [vmem:[%s10304_s9 + $0x40] sm:$0xff]  ;;  %v6233_v63 = vld [vmem:[%s10304_s9 + $0x48] sm:$0xff] }
 0x6c8   :  { %v4289_v56 = vmax.f32 %v4273_v1, 0.0  ;;  %v7474_v5 = vpop.f32.mrb[48].mxu0  ;;  %7979 = vmatprep.subr.bf16.mxu1 %v9826_v0  ;;  %v6235_v1 = vld [vmem:[%s10304_s9 + $0x58] sm:$0xff] }
 0x6c9   :  { %v4276_v6 = vadd.f32 %v7474_v5, %v4219_v49  ;;  %v4100_v9 = vpop.f32.mrb[49].mxu0  ;;  %7981 = vmatpush3.bf16.msra.mxu1 %v9826_v0  ;;  %v6238_v5 = vld [vmem:[%s10304_s9 + $0x70] sm:$0xff] }
 0x6ca   :  { %v9830_v61 = vpack.c.bf16 %v4290_v4, %v4289_v56  ;;  %v4275_v11 = vadd.f32 %v4214_v50, %v4100_v9  ;;  %v6236_v4 = vld [vmem:[%s10304_s9 + $0x60] sm:$0xff]  ;;  %v6237_v56 = vld [vmem:[%s10304_s9 + $0x68] sm:$0xff] }
 0x6cb   :  { %v4292_v13 = vmax.f32 %v4276_v6, 0.0  ;;  %v6239_v6 = vld [vmem:[%s10304_s9 + $0x78] sm:$0xff]  ;;  %v4538_v9 = vld [vmem:[%s10305_s10] sm:$0xff] }
 0x6cc   :  { %v4291_v14 = vmax.f32 %v4275_v11, 0.0  ;;  %v7477_v15 = vpop.f32.mrb[50].mxu0  ;;  %7983 = vmatprep.subr.bf16.mxu1 %v9830_v61  ;;  %7578 = vmatprep.subr.mxu0 %v4538_v9 }
 0x6cd   :  { %v4278_v16 = vadd.f32 %v7477_v15, %v4229_v57  ;;  %v4110_v17 = vpop.f32.mrb[51].mxu0  ;;  %7985 = vmatpush3.bf16.msra.mxu1 %v9830_v61  ;;  %v4307_v57 = vld [vmem:[%s10304_s9 + $0x20] sm:$0xff]  ;;  %7579 = vmatpush3.msra.mxu0 %v4538_v9  ;;  %v4791_v9 = vld [vmem:[%s10306_s11 + $0x28] sm:$0xff] }
 0x6ce   :  { %v9834_v18 = vpack.c.bf16 %v4292_v13, %v4291_v14  ;;  %v4277_v19 = vadd.f32 %v4224_v60, %v4110_v17  ;;  %v4310_v60 = vld [vmem:[%s10304_s9 + $0x38] sm:$0xff] }
 0x6cf   :  { %v4294_v20 = vmax.f32 %v4278_v16, 0.0 }
 0x6d0   :  { %v4293_v23 = vmax.f32 %v4277_v19, 0.0  ;;  %v7480_v24 = vpop.f32.mrb[52].mxu0  ;;  %7987 = vmatprep.subr.bf16.mxu1 %v9834_v18 }
 0x6d1   :  { %v4280_v26 = vadd.f32 %v7480_v24, %v4239_v10  ;;  %v4120_v27 = vpop.f32.mrb[53].mxu0  ;;  %7989 = vmatpush3.bf16.msra.mxu1 %v9834_v18  ;;  %v6248_v10 = vld [vmem:[%s10305_s10 + $0x8] sm:$0xff] }
 0x6d2   :  { %v7990_v28 = vpack.c.bf16 %v4294_v20, %v4293_v23  ;;  %v4279_v22 = vadd.f32 %v4234_v12, %v4120_v27 }
 0x6d3   :  { %v4296_v29 = vmax.f32 %v4280_v26, 0.0 }
 0x6d4   :  { %v4295_v30 = vmax.f32 %v4279_v22, 0.0  ;;  %v7483_v31 = vpop.f32.mrb[54].mxu0  ;;  %7991 = vmatprep.subr.bf16.mxu1 %v7990_v28 }
 0x6d5   :  { %v4282_v32 = vadd.f32 %v7483_v31, %v4249_v21  ;;  %v4130_v33 = vpop.f32.mrb[55].mxu0  ;;  %7993 = vmatpush3.bf16.msra.mxu1 %v7990_v28 }
 0x6d6   :  { %v7994_v35 = vpack.c.bf16 %v4296_v29, %v4295_v30  ;;  %v4281_v2 = vadd.f32 %v4244_v25, %v4130_v33 }
 0x6d7   :  { %v4298_v37 = vmax.f32 %v4282_v32, 0.0 }
 0x6d8   :  { %v4297_v8 = vmax.f32 %v4281_v2, 0.0  ;;  %v7486_v38 = vpop.f32.mrb[56].mxu0  ;;  %7995 = vmatprep.subr.bf16.mxu1 %v7994_v35 }
 0x6d9   :  { %v4284_v39 = vadd.f32 %v7486_v38, %v4259_v34  ;;  %v4140_v40 = vpop.f32.mrb[57].mxu0  ;;  %7997 = vmatpush3.bf16.msra.mxu1 %v7994_v35  ;;  %v4786_v34 = vld [vmem:[%s10306_s11] sm:$0xff] }
 0x6da   :  { %v7998_v41 = vpack.c.bf16 %v4298_v37, %v4297_v8  ;;  %v4283_v42 = vadd.f32 %v4254_v36, %v4140_v40 }
 0x6db   :  { %v4300_v43 = vmax.f32 %v4284_v39, 0.0 }
 0x6dc   :  { %v4299_v3 = vmax.f32 %v4283_v42, 0.0  ;;  %v7489_v45 = vpop.f32.mrb[58].mxu0  ;;  %7999 = vmatprep.subr.bf16.mxu1 %v7998_v41 }
 0x6dd   :  { %v4286_v7 = vadd.f32 %v7489_v45, %v4269_v44  ;;  %v4150_v47 = vpop.f32.mrb[59].mxu0  ;;  %8001 = vmatpush3.bf16.msra.mxu1 %v7998_v41 }
 0x6de   :  { %v8002_v48 = vpack.c.bf16 %v4300_v43, %v4299_v3  ;;  %v4285_v49 = vadd.f32 %v4264_v46, %v4150_v47 }
 0x6df   :  { %v4302_v50 = vmax.f32 %v4286_v7, 0.0 }
 0x6e0   :  { %v4301_v51 = vmax.f32 %v4285_v49, 0.0  ;;  %8003 = vmatprep.subr.bf16.mxu1 %v8002_v48 }
 0x6e1   :  { %8005 = vmatpush3.bf16.msra.mxu1 %v8002_v48 }
 0x6e2   :  { %v8006_v52 = vpack.c.bf16 %v4302_v50, %v4301_v51 }
 0x6e4   :  { %8007 = vmatprep.subr.bf16.mxu1 %v8006_v52 }
 0x6e5   :  { %8009 = vmatpush3.bf16.msra.mxu1 %v8006_v52 }
 0x6e6   :  { %8011 = vmatprep.subr.bf16.mxu1 %v9826_v0 }
 0x6e8   :  { %7523 = vmatmul.mubr.f32.vlgmr.msra.gmra.mrb[156].mxu1 %v4304_v53 }
 0x6e9   :  { %8013 = vmatpush3.bf16.msra.mxu1 %v9826_v0  ;;  %7525 = vmatprep.mubr.f32.mxu1 %v4305_v54  ;;  %v6234_v0 = vld [vmem:[%s10304_s9 + $0x50] sm:$0xff] }
 0x6ea   :  { %8015 = vmatprep.subr.bf16.mxu1 %v9830_v61 }
 0x6ec   :  { %7526 = vmatmul.mubr.f32.gmra.mrb[158].mxu1 %v4306_v55 }
 0x6ed   :  { %8017 = vmatpush3.bf16.msra.mxu1 %v9830_v61  ;;  %7528 = vmatprep.mubr.f32.mxu1 %v4307_v57 }
 0x6ee   :  { %8019 = vmatprep.subr.bf16.mxu1 %v9834_v18 }
 0x6f0   :  { %7529 = vmatmul.mubr.f32.gmra.mrb[160].mxu1 %v4308_v58 }
 0x6f1   :  { %8021 = vmatpush3.bf16.msra.mxu1 %v9834_v18  ;;  %7531 = vmatprep.mubr.f32.mxu1 %v4309_v59 }
 0x6f2   :  { %8023 = vmatprep.subr.bf16.mxu1 %v7990_v28 }
 0x6f4   :  { %7532 = vmatmul.mubr.f32.gmra.mrb[162].mxu1 %v4310_v60 }
 0x6f5   :  { %8025 = vmatpush3.bf16.msra.mxu1 %v7990_v28  ;;  %7566 = vmatprep.mubr.f32.mxu1 %v6232_v62  ;;  %v4787_v62 = vld [vmem:[%s10306_s11 + $0x8] sm:$0xff] }
 0x6f6   :  { %8027 = vmatprep.subr.bf16.mxu1 %v7994_v35 }
 0x6f9   :  { %8029 = vmatpush3.bf16.msra.mxu1 %v7994_v35  ;;  %v6265_v35 = vld [vmem:[%s10306_s11 + $0x40] sm:$0xff] }
 0x6fa   :  { %8031 = vmatprep.subr.bf16.mxu1 %v7998_v41 }
 0x6fd   :  { %8033 = vmatpush3.bf16.msra.mxu1 %v7998_v41 }
 0x6fe   :  { %8035 = vmatprep.subr.bf16.mxu1 %v8002_v48 }
 0x701   :  { %8037 = vmatpush3.bf16.msra.mxu1 %v8002_v48 }
 0x702   :  { %8039 = vmatprep.subr.bf16.mxu1 %v8006_v52 }
 0x705   :  { %8041 = vmatpush3.bf16.msra.mxu1 %v8006_v52 }
 0x706   :  { %7592 = vmatprep.subr.mxu1 %v6248_v10 }
 0x708   :  { %7567 = vmatmul.mubr.f32.vlgmr.msra.gmra.mrb[164].mxu1 %v6233_v63  ;;  %v6266_v63 = vld [vmem:[%s10306_s11 + $0x48] sm:$0xff] }
 0x709   :  { %7569 = vmatprep.mubr.f32.mxu1 %v6234_v0  ;;  %7593 = vmatpush3.msra.mxu1 %v6248_v10  ;;  %v4788_v0 = vld [vmem:[%s10306_s11 + $0x10] sm:$0xff]  ;;  %v6270_v10 = vld [vmem:[%s10306_s11 + $0x68] sm:$0xff] }
 0x70c   :  { %7570 = vmatmul.mubr.f32.gmra.mrb[166].mxu1 %v6235_v1  ;;  %v6267_v1 = vld [vmem:[%s10306_s11 + $0x50] sm:$0xff] }
 0x70d   :  { %7572 = vmatprep.mubr.f32.mxu1 %v6236_v4  ;;  %v4789_v4 = vld [vmem:[%s10306_s11 + $0x18] sm:$0xff] }
 0x710   :  { %7573 = vmatmul.mubr.f32.gmra.mrb[168].mxu1 %v6237_v56  ;;  %v6268_v56 = vld [vmem:[%s10306_s11 + $0x58] sm:$0xff] }
 0x711   :  { %7575 = vmatprep.mubr.f32.mxu1 %v6238_v5  ;;  %v4790_v5 = vld [vmem:[%s10306_s11 + $0x20] sm:$0xff] }
 0x714   :  { %7576 = vmatmul.mubr.f32.gmra.mrb[170].mxu1 %v6239_v6  ;;  %v6269_v6 = vld [vmem:[%s10306_s11 + $0x60] sm:$0xff] }
 0x7bb   :  { %v7524_v61 = vpop.f32.mrb[156].mxu1 }
 0x7bc   :  { %v4377_v11 = vpop.f32.mrb[157].mxu1 }
 0x7bf   :  { %v7527_v12 = vpop.f32.mrb[158].mxu1 }
 0x7c0   :  { %v4387_v13 = vpop.f32.mrb[159].mxu1 }
 0x7c3   :  { %v7530_v14 = vpop.f32.mrb[160].mxu1 }
 0x7c4   :  { %v4397_v15 = vpop.f32.mrb[161].mxu1 }
 0x7c7   :  { %v7533_v16 = vpop.f32.mrb[162].mxu1 }
 0x7c8   :  { %v4407_v17 = vpop.f32.mrb[163].mxu1 }
 0x7db   :  { %v7568_v18 = vpop.f32.mrb[164].mxu1 }
 0x7dc   :  { %v4531_v19 = vmax.f32 %v7524_v61, %v7568_v18  ;;  %v4491_v20 = vpop.f32.mrb[165].mxu1  ;;  %v4792_v61 = vld [vmem:[%s10306_s11 + $0x30] sm:$0xff] }
 0x7dd   :  { %v4530_v21 = vmax.f32 %v4377_v11, %v4491_v20  ;;  %v6271_v11 = vld [vmem:[%s10306_s11 + $0x70] sm:$0xff]  ;;  %v6284_v20 = vld [vmem:[%s10306_s11 + $0x98] sm:$0xff] }
 0x7de   :  { %v6283_v18 = vld [vmem:[%s10306_s11 + $0x90] sm:$0xff] }
 0x7df   :  { %v7571_v23 = vpop.f32.mrb[166].mxu1  ;;  %7580 = vmatprep.mubr.msk.f32.mxu0 %vm4539_vm9, %v4530_v21  ;;  %7594 = vmatprep.mubr.msk.f32.mxu1 %vm4539_vm9, %v4530_v21  ;;  %v6300_v21 = vld [vmem:[%s10306_s11 + $0xd8] sm:$0xff] }
 0x7e0   :  { %v4533_v24 = vmax.f32 %v7527_v12, %v7571_v23  ;;  %v4501_v25 = vpop.f32.mrb[167].mxu1  ;;  %7581 = vmatmul.mubr.msk.f32.vlgmr.msra.gmra.mrb[60].mxu0 %vm4539_vm9, %v4531_v19  ;;  %7595 = vmatmul.mubr.msk.f32.vlgmr.msra.gmra.mrb[172].mxu1 %vm4539_vm9, %v4531_v19  ;;  %v4793_v12 = vld [vmem:[%s10306_s11 + $0x38] sm:$0xff]  ;;  %v6299_v19 = vld [vmem:[%s10306_s11 + $0xd0] sm:$0xff]  ;;  %v6285_v23 = vld [vmem:[%s10306_s11 + $0xa0] sm:$0xff] }
 0x7e1   :  { %v4532_v26 = vmax.f32 %v4387_v13, %v4501_v25  ;;  %v6272_v13 = vld [vmem:[%s10306_s11 + $0x78] sm:$0xff]  ;;  %v6286_v25 = vld [vmem:[%s10306_s11 + $0xa8] sm:$0xff] }
 0x7e3   :  { %v7574_v27 = vpop.f32.mrb[168].mxu1  ;;  %7583 = vmatprep.mubr.msk.f32.mxu0 %vm4539_vm9, %v4532_v26  ;;  %7597 = vmatprep.mubr.msk.f32.mxu1 %vm4539_vm9, %v4532_v26  ;;  %v6302_v26 = vld [vmem:[%s10306_s11 + $0xe8] sm:$0xff] }
 0x7e4   :  { %v4535_v28 = vmax.f32 %v7530_v14, %v7574_v27  ;;  %v4511_v22 = vpop.f32.mrb[169].mxu1  ;;  %7584 = vmatmul.mubr.msk.f32.gmra.mrb[62].mxu0 %vm4539_vm9, %v4533_v24  ;;  %7598 = vmatmul.mubr.msk.f32.gmra.mrb[174].mxu1 %vm4539_vm9, %v4533_v24  ;;  %v6281_v14 = vld [vmem:[%s10306_s11 + $0x80] sm:$0xff]  ;;  %v6287_v27 = vld [vmem:[%s10306_s11 + $0xb0] sm:$0xff] }
 0x7e5   :  { %v4534_v29 = vmax.f32 %v4397_v15, %v4511_v22  ;;  %v6297_v15 = vld [vmem:[%s10306_s11 + $0xc0] sm:$0xff]  ;;  %v6288_v22 = vld [vmem:[%s10306_s11 + $0xb8] sm:$0xff] }
 0x7e6   :  { %v6301_v24 = vld [vmem:[%s10306_s11 + $0xe0] sm:$0xff] }
 0x7e7   :  { %v7577_v30 = vpop.f32.mrb[170].mxu1  ;;  %7586 = vmatprep.mubr.msk.f32.mxu0 %vm4539_vm9, %v4534_v29  ;;  %7600 = vmatprep.mubr.msk.f32.mxu1 %vm4539_vm9, %v4534_v29  ;;  %v6304_v29 = vld [vmem:[%s10306_s11 + $0xf8] sm:$0xff] }
 0x7e8   :  { %v4537_v31 = vmax.f32 %v7533_v16, %v7577_v30  ;;  %v4521_v32 = vpop.f32.mrb[171].mxu1  ;;  %7587 = vmatmul.mubr.msk.f32.gmra.mrb[64].mxu0 %vm4539_vm9, %v4535_v28  ;;  %7601 = vmatmul.mubr.msk.f32.gmra.mrb[176].mxu1 %vm4539_vm9, %v4535_v28  ;;  %v6282_v16 = vld [vmem:[%s10306_s11 + $0x88] sm:$0xff]  ;;  %v6303_v28 = vld [vmem:[%s10306_s11 + $0xf0] sm:$0xff]  ;;  %v4784_v30 = vlaneseq }
 0x7e9   :  { %v4536_v33 = vmax.f32 %v4407_v17, %v4521_v32  ;;  %v6298_v17 = vld [vmem:[%s10306_s11 + $0xc8] sm:$0xff] }
 0x7eb   :  { %7589 = vmatprep.mubr.msk.f32.mxu0 %vm4539_vm9, %v4536_v33  ;;  %7603 = vmatprep.mubr.msk.f32.mxu1 %vm4539_vm9, %v4536_v33 }
 0x7ec   :  { %7590 = vmatmul.mubr.msk.f32.gmra.mrb[66].mxu0 %vm4539_vm9, %v4537_v31  ;;  %7604 = vmatmul.mubr.msk.f32.gmra.mrb[178].mxu1 %vm4539_vm9, %v4537_v31  ;;  %v10039_v31 = vand.u32 127, %v4784_v30 }
 0x7ed   :  { %7622 = vmatprep.mubr.msk.f32.mxu0 %vm4794_vm10, %v4786_v34  ;;  %7650 = vmatprep.mubr.msk.f32.mxu1 %vm4794_vm10, %v6265_v35 }
 0x7ee   :  { %vm4924_vm11 = vcmp.eq.s32.totalorder %v10039_v31, 0  ;;  %vm5071_vm12 = vcmp.eq.s32.totalorder %v10039_v31, 1  ;;  %vm5226_vm13 = vcmp.eq.s32.totalorder %v10039_v31, 2  ;;  %vm5381_vm14 = vcmp.eq.s32.totalorder %v10039_v31, 3 }
 0x8b3   :  { %v7582_v2 = vpop.f32.mrb[60].mxu0  ;;  %v7596_v36 = vpop.f32.mrb[172].mxu1 }
 0x8b4   :  { %v4777_v37 = vmax.f32 %v7582_v2, %v7596_v36  ;;  %v4630_v8 = vpop.f32.mrb[61].mxu0  ;;  %v4737_v38 = vpop.f32.mrb[173].mxu1 }
 0x8b5   :  { %v4776_v39 = vmax.f32 %v4630_v8, %v4737_v38 }
 0x8b7   :  { %v8042_v40 = vpack.c.bf16 %v4777_v37, %v4776_v39  ;;  %v7585_v41 = vpop.f32.mrb[62].mxu0  ;;  %v7599_v42 = vpop.f32.mrb[174].mxu1 }
 0x8b8   :  { %v4779_v43 = vmax.f32 %v7585_v41, %v7599_v42  ;;  %v4640_v44 = vpop.f32.mrb[63].mxu0  ;;  %v4747_v3 = vpop.f32.mrb[175].mxu1 }
 0x8b9   :  { %v4778_v45 = vmax.f32 %v4640_v44, %v4747_v3  ;;  %8043 = vmatprep.subr.bf16.mxu0 %v8042_v40  ;;  %8059 = vmatprep.subr.bf16.mxu1 %v8042_v40 }
 0x8ba   :  { %8045 = vmatpush3.bf16.msra.mxu0 %v8042_v40  ;;  %8061 = vmatpush3.bf16.msra.mxu1 %v8042_v40 }
 0x8bb   :  { %v8046_v46 = vpack.c.bf16 %v4779_v43, %v4778_v45  ;;  %v7588_v7 = vpop.f32.mrb[64].mxu0  ;;  %v7602_v47 = vpop.f32.mrb[176].mxu1 }
 0x8bc   :  { %v4781_v48 = vmax.f32 %v7588_v7, %v7602_v47  ;;  %v4650_v49 = vpop.f32.mrb[65].mxu0  ;;  %v4757_v50 = vpop.f32.mrb[177].mxu1 }
 0x8bd   :  { %v4780_v51 = vmax.f32 %v4650_v49, %v4757_v50  ;;  %8047 = vmatprep.subr.bf16.mxu0 %v8046_v46  ;;  %8063 = vmatprep.subr.bf16.mxu1 %v8046_v46 }
 0x8be   :  { %8049 = vmatpush3.bf16.msra.mxu0 %v8046_v46  ;;  %8065 = vmatpush3.bf16.msra.mxu1 %v8046_v46 }
 0x8bf   :  { %v8050_v52 = vpack.c.bf16 %v4781_v48, %v4780_v51  ;;  %v7591_v53 = vpop.f32.mrb[66].mxu0  ;;  %v7605_v54 = vpop.f32.mrb[178].mxu1 }
 0x8c0   :  { %v4783_v55 = vmax.f32 %v7591_v53, %v7605_v54  ;;  %v4660_v57 = vpop.f32.mrb[67].mxu0  ;;  %v4767_v58 = vpop.f32.mrb[179].mxu1 }
 0x8c1   :  { %v4782_v59 = vmax.f32 %v4660_v57, %v4767_v58  ;;  %8051 = vmatprep.subr.bf16.mxu0 %v8050_v52  ;;  %8067 = vmatprep.subr.bf16.mxu1 %v8050_v52 }
 0x8c2   :  { %8053 = vmatpush3.bf16.msra.mxu0 %v8050_v52  ;;  %8069 = vmatpush3.bf16.msra.mxu1 %v8050_v52 }
 0x8c3   :  { %v8054_v60 = vpack.c.bf16 %v4783_v55, %v4782_v59 }
 0x8c5   :  { %8055 = vmatprep.subr.bf16.mxu0 %v8054_v60  ;;  %8071 = vmatprep.subr.bf16.mxu1 %v8054_v60 }
 0x8c6   :  { %8057 = vmatpush3.bf16.msra.mxu0 %v8054_v60  ;;  %8073 = vmatpush3.bf16.msra.mxu1 %v8054_v60 }
 0x8c7   :  { %8075 = vmatprep.subr.bf16.mxu0 %v8042_v40  ;;  %8091 = vmatprep.subr.bf16.mxu1 %v8042_v40 }
 0x8c9   :  { %7623 = vmatmul.mubr.msk.f32.vlgmr.msra.gmra.mrb[68].mxu0 %vm4794_vm10, %v4787_v62  ;;  %7651 = vmatmul.mubr.msk.f32.vlgmr.msra.gmra.mrb[180].mxu1 %vm4794_vm10, %v6266_v63 }
 0x8ca   :  { %8077 = vmatpush3.bf16.msra.mxu0 %v8042_v40  ;;  %8093 = vmatpush3.bf16.msra.mxu1 %v8042_v40 }
 0x8cb   :  { %8079 = vmatprep.subr.bf16.mxu0 %v8046_v46  ;;  %8095 = vmatprep.subr.bf16.mxu1 %v8046_v46 }
 0x8cc   :  { %7625 = vmatprep.mubr.msk.f32.mxu0 %vm4794_vm10, %v4788_v0  ;;  %7653 = vmatprep.mubr.msk.f32.mxu1 %vm4794_vm10, %v6267_v1 }
 0x8cd   :  { %7626 = vmatmul.mubr.msk.f32.gmra.mrb[70].mxu0 %vm4794_vm10, %v4789_v4  ;;  %7654 = vmatmul.mubr.msk.f32.gmra.mrb[182].mxu1 %vm4794_vm10, %v6268_v56 }
 0x8ce   :  { %8081 = vmatpush3.bf16.msra.mxu0 %v8046_v46  ;;  %8097 = vmatpush3.bf16.msra.mxu1 %v8046_v46 }
 0x8cf   :  { %8083 = vmatprep.subr.bf16.mxu0 %v8050_v52  ;;  %8099 = vmatprep.subr.bf16.mxu1 %v8050_v52 }
 0x8d0   :  { %7628 = vmatprep.mubr.msk.f32.mxu0 %vm4794_vm10, %v4790_v5  ;;  %7656 = vmatprep.mubr.msk.f32.mxu1 %vm4794_vm10, %v6269_v6 }
 0x8d1   :  { %7629 = vmatmul.mubr.msk.f32.gmra.mrb[72].mxu0 %vm4794_vm10, %v4791_v9  ;;  %7657 = vmatmul.mubr.msk.f32.gmra.mrb[184].mxu1 %vm4794_vm10, %v6270_v10 }
 0x8d2   :  { %8085 = vmatpush3.bf16.msra.mxu0 %v8050_v52  ;;  %8101 = vmatpush3.bf16.msra.mxu1 %v8050_v52 }
 0x8d3   :  { %8087 = vmatprep.subr.bf16.mxu0 %v8054_v60  ;;  %8103 = vmatprep.subr.bf16.mxu1 %v8054_v60 }
 0x8d4   :  { %7631 = vmatprep.mubr.msk.f32.mxu0 %vm4794_vm10, %v4792_v61  ;;  %7659 = vmatprep.mubr.msk.f32.mxu1 %vm4794_vm10, %v6271_v11 }
 0x8d5   :  { %7632 = vmatmul.mubr.msk.f32.gmra.mrb[74].mxu0 %vm4794_vm10, %v4793_v12  ;;  %7660 = vmatmul.mubr.msk.f32.gmra.mrb[186].mxu1 %vm4794_vm10, %v6272_v13 }
 0x8d6   :  { %8089 = vmatpush3.bf16.msra.mxu0 %v8054_v60  ;;  %8105 = vmatpush3.bf16.msra.mxu1 %v8054_v60 }
 0x8d7   :  { %7678 = vmatprep.mubr.msk.f32.mxu0 %vm4794_vm10, %v6281_v14  ;;  %7706 = vmatprep.mubr.msk.f32.mxu1 %vm4794_vm10, %v6297_v15 }
 0x8d9   :  { %7679 = vmatmul.mubr.msk.f32.vlgmr.msra.gmra.mrb[76].mxu0 %vm4794_vm10, %v6282_v16  ;;  %7707 = vmatmul.mubr.msk.f32.vlgmr.msra.gmra.mrb[188].mxu1 %vm4794_vm10, %v6298_v17 }
 0x8da   :  { %7681 = vmatprep.mubr.msk.f32.mxu0 %vm4794_vm10, %v6283_v18  ;;  %7709 = vmatprep.mubr.msk.f32.mxu1 %vm4794_vm10, %v6299_v19 }
 0x8dd   :  { %7682 = vmatmul.mubr.msk.f32.gmra.mrb[78].mxu0 %vm4794_vm10, %v6284_v20  ;;  %7710 = vmatmul.mubr.msk.f32.gmra.mrb[190].mxu1 %vm4794_vm10, %v6300_v21 }
 0x8de   :  { %7684 = vmatprep.mubr.msk.f32.mxu0 %vm4794_vm10, %v6285_v23  ;;  %7712 = vmatprep.mubr.msk.f32.mxu1 %vm4794_vm10, %v6301_v24 }
 0x8e1   :  { %7685 = vmatmul.mubr.msk.f32.gmra.mrb[80].mxu0 %vm4794_vm10, %v6286_v25  ;;  %7713 = vmatmul.mubr.msk.f32.gmra.mrb[192].mxu1 %vm4794_vm10, %v6302_v26 }
 0x8e2   :  { %7687 = vmatprep.mubr.msk.f32.mxu0 %vm4794_vm10, %v6287_v27  ;;  %7715 = vmatprep.mubr.msk.f32.mxu1 %vm4794_vm10, %v6303_v28 }
 0x8e5   :  { %7688 = vmatmul.mubr.msk.f32.gmra.mrb[82].mxu0 %vm4794_vm10, %v6288_v22  ;;  %7716 = vmatmul.mubr.msk.f32.gmra.mrb[194].mxu1 %vm4794_vm10, %v6304_v29 }
 0x99c   :  { %v7624_v32 = vpop.f32.mrb[68].mxu0  ;;  %v7652_v33 = vpop.f32.mrb[180].mxu1 }
 0x99d   :  { %v4926_v34 = vsel %vm4924_vm11, %v7624_v32, 0.0  ;;  %v5073_v35 = vsel %vm5071_vm12, %v7652_v33, 0.0  ;;  %v4885_v2 = vpop.f32.mrb[69].mxu0  ;;  %v5032_v36 = vpop.f32.mrb[181].mxu1 }
 0x99e   :  { %v5081_v37 = vadd.f32 %v5073_v35, %v4926_v34  ;;  %v4925_v8 = vsel %vm4924_vm11, %v4885_v2, 0.0  ;;  %v5072_v38 = vsel %vm5071_vm12, %v5032_v36, 0.0 }
 0x99f   :  { %v5080_v39 = vadd.f32 %v5072_v38, %v4925_v8 }
 0x9a0   :  { %v7627_v40 = vpop.f32.mrb[70].mxu0  ;;  %v7655_v41 = vpop.f32.mrb[182].mxu1 }
 0x9a1   :  { %v4928_v42 = vsel %vm4924_vm11, %v7627_v40, 0.0  ;;  %v4895_v43 = vpop.f32.mrb[71].mxu0  ;;  %v5075_v44 = vsel %vm5071_vm12, %v7655_v41, 0.0  ;;  %v5042_v3 = vpop.f32.mrb[183].mxu1 }
 0x9a2   :  { %v4927_v45 = vsel %vm4924_vm11, %v4895_v43, 0.0  ;;  %v5083_v46 = vadd.f32 %v5075_v44, %v4928_v42  ;;  %v5074_v7 = vsel %vm5071_vm12, %v5042_v3, 0.0 }
 0x9a3   :  { %v5082_v47 = vadd.f32 %v5074_v7, %v4927_v45 }
 0x9a4   :  { %v7630_v48 = vpop.f32.mrb[72].mxu0  ;;  %v7658_v49 = vpop.f32.mrb[184].mxu1 }
 0x9a5   :  { %v4930_v50 = vsel %vm4924_vm11, %v7630_v48, 0.0  ;;  %v4905_v51 = vpop.f32.mrb[73].mxu0  ;;  %v5077_v52 = vsel %vm5071_vm12, %v7658_v49, 0.0  ;;  %v5052_v53 = vpop.f32.mrb[185].mxu1 }
 0x9a6   :  { %v4929_v54 = vsel %vm4924_vm11, %v4905_v51, 0.0  ;;  %v5085_v55 = vadd.f32 %v5077_v52, %v4930_v50  ;;  %v5076_v57 = vsel %vm5071_vm12, %v5052_v53, 0.0 }
 0x9a7   :  { %v5084_v58 = vadd.f32 %v5076_v57, %v4929_v54 }
 0x9a8   :  { %v7633_v59 = vpop.f32.mrb[74].mxu0  ;;  %v7661_v60 = vpop.f32.mrb[186].mxu1 }
 0x9a9   :  { %v4932_v62 = vsel %vm4924_vm11, %v7633_v59, 0.0  ;;  %v4915_v63 = vpop.f32.mrb[75].mxu0  ;;  %v5079_v0 = vsel %vm5071_vm12, %v7661_v60, 0.0  ;;  %v5062_v1 = vpop.f32.mrb[187].mxu1 }
 0x9aa   :  { %v4931_v4 = vsel %vm4924_vm11, %v4915_v63, 0.0  ;;  %v5087_v56 = vadd.f32 %v5079_v0, %v4932_v62  ;;  %v5078_v5 = vsel %vm5071_vm12, %v5062_v1, 0.0  ;;  %v5424_v63 = vld [vmem:[%s10307_s12 + $0x8] sm:$0xff]  ;;  %v5423_v0 = vld [vmem:[%s10307_s12] sm:$0xff] }
 0x9ab   :  { %v5086_v6 = vadd.f32 %v5078_v5, %v4931_v4  ;;  %v5448_v5 = vld [vmem:[%s10308_s13 + $0x8] sm:$0xff] }
 0x9ac   :  { %v7680_v9 = vpop.f32.mrb[76].mxu0  ;;  %v7708_v10 = vpop.f32.mrb[188].mxu1 }
 0x9ad   :  { %v5228_v61 = vsel %vm5226_vm13, %v7680_v9, 0.0  ;;  %v5187_v11 = vpop.f32.mrb[77].mxu0  ;;  %v5383_v12 = vsel %vm5381_vm14, %v7708_v10, 0.0  ;;  %v5342_v13 = vpop.f32.mrb[189].mxu1 }
 0x9ae   :  { %v5236_v14 = vadd.f32 %v5228_v61, %v5081_v37  ;;  %v5227_v15 = vsel %vm5226_vm13, %v5187_v11, 0.0  ;;  %v5382_v16 = vsel %vm5381_vm14, %v5342_v13, 0.0  ;;  %v5447_v61 = vld [vmem:[%s10308_s13] sm:$0xff] }
 0x9af   :  { %v5235_v17 = vadd.f32 %v5227_v15, %v5080_v39  ;;  %v6313_v11 = vld [vmem:[%s10308_s13 + $0x40] sm:$0xff] }
 0x9b0   :  { %v5391_v18 = vadd.f32 %v5383_v12, %v5236_v14  ;;  %v7683_v19 = vpop.f32.mrb[78].mxu0  ;;  %v7711_v20 = vpop.f32.mrb[190].mxu1  ;;  %v5425_v12 = vld [vmem:[%s10307_s12 + $0x10] sm:$0xff] }
 0x9b1   :  { %v5390_v21 = vadd.f32 %v5382_v16, %v5235_v17  ;;  %v5230_v23 = vsel %vm5226_vm13, %v7683_v19, 0.0  ;;  %v5197_v24 = vpop.f32.mrb[79].mxu0  ;;  %v5385_v25 = vsel %vm5381_vm14, %v7711_v20, 0.0  ;;  %v5352_v26 = vpop.f32.mrb[191].mxu1  ;;  %v5449_v19 = vld [vmem:[%s10308_s13 + $0x10] sm:$0xff] }
 0x9b2   :  { %v5238_v27 = vadd.f32 %v5230_v23, %v5083_v46  ;;  %v5229_v28 = vsel %vm5226_vm13, %v5197_v24, 0.0  ;;  %v5384_v22 = vsel %vm5381_vm14, %v5352_v26, 0.0  ;;  %v5402_v29 = vsel %vm5398_vm15, %v5391_v18, 0.0  ;;  %v5426_v23 = vld [vmem:[%s10307_s12 + $0x18] sm:$0xff]  ;;  %v5427_v24 = vld [vmem:[%s10307_s12 + $0x20] sm:$0xff] }
 0x9b3   :  { %v5237_v30 = vadd.f32 %v5229_v28, %v5082_v47  ;;  %5403 = vadd.xlane.f32.xlu1 %v5402_v29  ;;  %v5399_v32 = vsel %vm5398_vm15, %v5390_v21, 0.0  ;;  %v6315_v21 = vld [vmem:[%s10308_s13 + $0x50] sm:$0xff] }
 0x9b4   :  { %v5393_v33 = vadd.f32 %v5385_v25, %v5238_v27  ;;  %5400 = vadd.xlane.f32.xlu0 %v5399_v32  ;;  %v7686_v34 = vpop.f32.mrb[80].mxu0  ;;  %v7714_v35 = vpop.f32.mrb[192].mxu1 }
 0x9b5   :  { %v5392_v2 = vadd.f32 %v5384_v22, %v5237_v30  ;;  %v5232_v36 = vsel %vm5226_vm13, %v7686_v34, 0.0  ;;  %v5207_v37 = vpop.f32.mrb[81].mxu0  ;;  %v5387_v8 = vsel %vm5381_vm14, %v7714_v35, 0.0  ;;  %v5362_v38 = vpop.f32.mrb[193].mxu1  ;;  %v5450_v34 = vld [vmem:[%s10308_s13 + $0x18] sm:$0xff] }
 0x9b6   :  { %v5240_v39 = vadd.f32 %v5232_v36, %v5085_v55  ;;  %v5231_v40 = vsel %vm5226_vm13, %v5207_v37, 0.0  ;;  %v5386_v41 = vsel %vm5381_vm14, %v5362_v38, 0.0  ;;  %v5408_v54 = vsel %vm5398_vm15, %v5393_v33, 0.0  ;;  %v6316_v36 = vld [vmem:[%s10308_s13 + $0x58] sm:$0xff]  ;;  %v5451_v37 = vld [vmem:[%s10308_s13 + $0x20] sm:$0xff] }
 0x9b7   :  { %v5239_v42 = vadd.f32 %v5231_v40, %v5084_v58  ;;  %v5405_v43 = vsel %vm5398_vm15, %v5392_v2, 0.0 }
 0x9b8   :  { %v5395_v44 = vadd.f32 %v5387_v8, %v5240_v39  ;;  %5406 = vadd.xlane.f32.xlu0 %v5405_v43  ;;  %v7689_v3 = vpop.f32.mrb[82].mxu0  ;;  %v7717_v45 = vpop.f32.mrb[194].mxu1  ;;  %v6317_v8 = vld [vmem:[%s10308_s13 + $0x60] sm:$0xff]  ;;  %v5429_v43 = vld [vmem:[%s10307_s12 + $0x30] sm:$0xff] }
 0x9b9   :  { %v5394_v46 = vadd.f32 %v5386_v41, %v5239_v42  ;;  %v5234_v7 = vsel %vm5226_vm13, %v7689_v3, 0.0  ;;  %v5217_v47 = vpop.f32.mrb[83].mxu0  ;;  %v5389_v48 = vsel %vm5381_vm14, %v7717_v45, 0.0  ;;  %v5372_v49 = vpop.f32.mrb[195].mxu1  ;;  %v5428_v42 = vld [vmem:[%s10307_s12 + $0x28] sm:$0xff] }
 0x9ba   :  { %v5242_v50 = vadd.f32 %v5234_v7, %v5087_v56  ;;  %v5233_v51 = vsel %vm5226_vm13, %v5217_v47, 0.0  ;;  %v5388_v52 = vsel %vm5381_vm14, %v5372_v49, 0.0  ;;  %v5414_v59 = vsel %vm5398_vm15, %v5395_v44, 0.0 }
 0x9bb   :  { %v5241_v53 = vadd.f32 %v5233_v51, %v5086_v6  ;;  %v5411_v55 = vsel %vm5398_vm15, %v5394_v46, 0.0  ;;  %v6314_v6 = vld [vmem:[%s10308_s13 + $0x48] sm:$0xff] }
 0x9bc   :  { %v5397_v57 = vadd.f32 %v5389_v48, %v5242_v50  ;;  %5409 = vadd.xlane.f32.xlu0 %v5408_v54  ;;  %5412 = vadd.xlane.f32.xlu1 %v5411_v55  ;;  %v5430_v54 = vld [vmem:[%s10307_s12 + $0x38] sm:$0xff] }
 0x9bd   :  { %v5396_v58 = vadd.f32 %v5388_v52, %v5241_v53 }
 0x9be   :  { %v5420_v62 = vsel %vm5398_vm15, %v5397_v57, 0.0 }
 0x9bf   :  { %v5417_v60 = vsel %vm5398_vm15, %v5396_v58, 0.0  ;;  %v5452_v58 = vld [vmem:[%s10308_s13 + $0x28] sm:$0xff] }
 0x9c0   :  { %5415 = vadd.xlane.f32.xlu0 %v5414_v59  ;;  %5418 = vadd.xlane.f32.xlu1 %v5417_v60  ;;  %v6318_v59 = vld [vmem:[%s10308_s13 + $0x68] sm:$0xff] }
 0x9c4   :  { %5421 = vadd.xlane.f32.xlu0 %v5420_v62 }
 0xa40   :  { %v5404_v1 = vpop.xlane.xlu1 %5403 }
 0xa41   :  { %v5432_v4 = vadd.f32 %v5424_v63, %v5404_v1  ;;  %v5401_v56 = vpop.xlane.xlu0 %5400  ;;  %v6319_v1 = vld [vmem:[%s10308_s13 + $0x70] sm:$0xff] }
 0xa42   :  { %v5431_v9 = vadd.f32 %v5423_v0, %v5401_v56  ;;  %v5453_v0 = vld [vmem:[%s10308_s13 + $0x30] sm:$0xff] }
 0xa43   :  { %v5440_v10 = vmax.f32 %v5432_v4, 0.0 }
 0xa44   :  { %v5439_v13 = vmax.f32 %v5431_v9, 0.0 }
 0xa45   :  { %v5456_v14 = vmul.f32 %v5448_v5, %v5440_v10  ;;  %v5497_v15 = vmul.f32 %v6314_v6, %v5440_v10  ;;  %v5407_v16 = vpop.xlane.xlu0 %5406 }
 0xa46   :  { %v5455_v17 = vmul.f32 %v5447_v61, %v5439_v13  ;;  %v5496_v18 = vmul.f32 %v6313_v11, %v5439_v13  ;;  %v5433_v20 = vadd.f32 %v5425_v12, %v5407_v16  ;;  %v6320_v16 = vld [vmem:[%s10308_s13 + $0x78] sm:$0xff] }
 0xa47   :  { %v5465_v26 = vsel %vm5463_vm0, %v5456_v14, 0.0  ;;  %v5505_v27 = vsel %vm5463_vm0, %v5497_v15, 0.0  ;;  %v5454_v15 = vld [vmem:[%s10308_s13 + $0x38] sm:$0xff] }
 0xa48   :  { %v5441_v25 = vmax.f32 %v5433_v20, 0.0  ;;  %v5464_v28 = vsel %vm5463_vm0, %v5455_v17, 0.0  ;;  %v5504_v22 = vsel %vm5463_vm0, %v5496_v18, 0.0 }
 0xa49   :  { %v5410_v29 = vpop.xlane.xlu0 %5409  ;;  %v5413_v30 = vpop.xlane.xlu1 %5412  ;;  %v5466_v44 = vadd.f32 %v5465_v26, %v5464_v28  ;;  %v5506_v3 = vadd.f32 %v5505_v27, %v5504_v22 }
 0xa4a   :  { %v5457_v32 = vmul.f32 %v5449_v19, %v5441_v25  ;;  %v5498_v33 = vmul.f32 %v6315_v21, %v5441_v25  ;;  %v5434_v35 = vadd.f32 %v5426_v23, %v5410_v29  ;;  %v5435_v2 = vadd.f32 %v5427_v24, %v5413_v30 }
 0xa4c   :  { %v5467_v38 = vsel %vm5463_vm0, %v5457_v32, 0.0  ;;  %v5507_v39 = vsel %vm5463_vm0, %v5498_v33, 0.0  ;;  %v5442_v40 = vmax.f32 %v5434_v35, 0.0  ;;  %v5443_v41 = vmax.f32 %v5435_v2, 0.0 }
 0xa4d   :  { %v5416_v45 = vpop.xlane.xlu0 %5415  ;;  %v5419_v46 = vpop.xlane.xlu1 %5418  ;;  %v5468_v50 = vadd.f32 %v5467_v38, %v5466_v44  ;;  %v5508_v51 = vadd.f32 %v5507_v39, %v5506_v3 }
 0xa4e   :  { %v5458_v7 = vmul.f32 %v5450_v34, %v5442_v40  ;;  %v5499_v47 = vmul.f32 %v6316_v36, %v5442_v40  ;;  %v5459_v48 = vmul.f32 %v5451_v37, %v5443_v41  ;;  %v5500_v49 = vmul.f32 %v6317_v8, %v5443_v41  ;;  %v5485_v41 = vld [vmem:[%s10309_s14] sm:$0x1] }
 0xa4f   :  { %v5436_v52 = vadd.f32 %v5428_v42, %v5416_v45  ;;  %v5437_v53 = vadd.f32 %v5429_v43, %v5419_v46  ;;  %v6321_v42 = vld [vmem:[%s10309_s14 + $0x1] sm:$0x1]  ;;  %s8307_s14 = smov [#allocation2]  }
 0xa50   :  { %v5469_v55 = vsel %vm5463_vm0, %v5458_v7, 0.0  ;;  %v5509_v57 = vsel %vm5463_vm0, %v5499_v47, 0.0  ;;  %v5471_v5 = vsel %vm5463_vm0, %v5459_v48, 0.0  ;;  %v5511_v6 = vsel %vm5463_vm0, %v5500_v49, 0.0  ;;  %s5757_s29 = sshll.u32 %s8307_s14, 4  ;;  %s5758_s29 = int_to_ptr.vmem [resolvable:$true] %s5757_s29 }
 0xa51   :  { %v5470_v60 = vadd.f32 %v5469_v55, %v5468_v50  ;;  %v5510_v62 = vadd.f32 %v5509_v57, %v5508_v51  ;;  %v5444_v63 = vmax.f32 %v5436_v52, 0.0  ;;  %v5445_v4 = vmax.f32 %v5437_v53, 0.0  ;;  %v5422_v56 = vpop.xlane.xlu0 %5421  ;;  %s8272_s30 = scalar_lea.vmem %s5758_s29, 16  ;;  %s8276_s16 = scalar_lea.vmem %s5758_s29, 32 }
 0xa52   :  { %v5438_v9 = vadd.f32 %v5430_v54, %v5422_v56  ;;  %p8273_p0 = scmp.ne.s32.totalorder %s5758_s29, %s8272_s30  ;;  %p8277_p1 = scmp.lt.s32.totalorder %s5758_s29, %s5758_s29 }
 0xa53   :  { %v5472_v10 = vadd.f32 %v5471_v5, %v5470_v60  ;;  %v5512_v61 = vadd.f32 %v5511_v6, %v5510_v62  ;;  %v5460_v11 = vmul.f32 %v5452_v58, %v5444_v63  ;;  %v5501_v12 = vmul.f32 %v6318_v59, %v5444_v63  ;;  %p8278_p2 = scmp.lt.s32.totalorder %s8276_s16, %s8272_s30 }
 0xa54   :  { %v5461_v13 = vmul.f32 %v5453_v0, %v5445_v4  ;;  %v5502_v14 = vmul.f32 %v6319_v1, %v5445_v4  ;;  %v5446_v17 = vmax.f32 %v5438_v9, 0.0  ;;  %v8301_v6 = vmov 683565275  }
 0xa55   :  { %v5473_v18 = vsel %vm5463_vm0, %v5460_v11, 0.0  ;;  %v5513_v19 = vsel %vm5463_vm0, %v5501_v12, 0.0  ;;  %v8303_v11 = vmov 2131351028   ;;  %p8279_p3 = por %p8278_p2, %p8277_p1 }
 0xa56   :  { %v5474_v20 = vadd.f32 %v5473_v18, %v5472_v10  ;;  %v5514_v21 = vadd.f32 %v5513_v19, %v5512_v61  ;;  %v5475_v23 = vsel %vm5463_vm0, %v5461_v13, 0.0  ;;  %v5515_v24 = vsel %vm5463_vm0, %v5502_v14, 0.0 }
 0xa57   :  { %v5462_v25 = vmul.f32 %v5454_v15, %v5446_v17  ;;  %v5503_v26 = vmul.f32 %v6320_v16, %v5446_v17  ;;  %v8302_v10 = vmov 2475754826   ;;  %v8304_v13 = vmov 2102212464   ;;  %p8280_p4 = pnand %p8279_p3, %p8273_p0 }
 0xa58   :  { %v5476_v27 = vadd.f32 %v5475_v23, %v5474_v20  ;;  %v5516_v28 = vadd.f32 %v5515_v24, %v5514_v21  ;;  %v8305_v15 = vmov 920167782   ;;  %v8306_v23 = vmov 1326507024  }
 0xa59   :  { %v5477_v22 = vsel %vm5463_vm0, %v5462_v25, 0.0  ;;  %v5517_v29 = vsel %vm5463_vm0, %v5503_v26, 0.0 }
 0xa5a   :  { %v5478_v30 = vadd.f32 %v5477_v22, %v5476_v27  ;;  %v5518_v32 = vadd.f32 %v5517_v29, %v5516_v28 }
 0xa5c   :  { %v5479_v33 = vrot.slane %v5478_v30, 4  ;;  %v5519_v34 = vrot.slane %v5518_v32, 4 }
 0xa5e   :  { %v5480_v35 = vadd.f32 %v5479_v33, %v5478_v30  ;;  %v5520_v2 = vadd.f32 %v5519_v34, %v5518_v32 }
 0xa60   :  { %v5481_v36 = vrot.slane %v5480_v35, 2  ;;  %v5521_v37 = vrot.slane %v5520_v2, 2 }
 0xa62   :  { %v5482_v8 = vadd.f32 %v5481_v36, %v5480_v35  ;;  %v5522_v38 = vadd.f32 %v5521_v37, %v5520_v2 }
 0xa64   :  { %v5483_v39 = vrot.slane %v5482_v8, 1  ;;  %v5523_v40 = vrot.slane %v5522_v38, 1 }
 0xa66   :  { %v5484_v43 = vadd.f32 %v5483_v39, %v5482_v8  ;;  %v5524_v44 = vadd.f32 %v5523_v40, %v5522_v38 }
 0xa68   :  { %v10211_v3 = vadd.f32 %v5485_v41, %v5484_v43  ;;  %v10213_v45 = vadd.f32 %v6321_v42, %v5524_v44 }
 0xa6a   :  { %v5531_v46 = vand.u32 2139095040, %v10211_v3  ;;  %v5636_v7 = vand.u32 2139095040, %v10213_v45  ;;  %v5528_v47 = vand.u32 2147483647, %v10211_v3  ;;  %v5633_v51 = vand.u32 2147483647, %v10213_v45 }
 0xa6b   :  { %vm5530_vm0 = vcmp.lt.s32.totalorder %v10211_v3, 0 }
 0xa6c   :  { %v5532_v48 = vshrl.u32 %v5531_v46, 23  ;;  %v5637_v49 = vshrl.u32 %v5636_v7, 23  ;;  %v5535_v50 = vand.u32 8388607, %v5528_v47  ;;  %v10223_v58 = vand.u32 8388607, %v5633_v51 }
 0xa6e   :  { %v6322_v52 = vadd.s32 4294967169, %v5532_v48  ;;  %v6326_v53 = vadd.s32 4294967169, %v5637_v49  ;;  %v5536_v57 = vor.u32 8388608, %v5535_v50  ;;  %v5641_v1 = vor.u32 8388608, %v10223_v58 }
 0xa70   :  { %v5538_v54 = vadd.s32 1, %v6322_v52  ;;  %v5643_v55 = vadd.s32 1, %v6326_v53  ;;  %v10225_v0 = vshll.u32 %v5536_v57, 8 }
 0xa72   :  { %vm5539_vm1 = vcmp.gt.s32.totalorder %v5538_v54, 0  ;;  %vm5644_vm2 = vcmp.gt.s32.totalorder %v5643_v55, 0 }
 0xa73   :  { %v5540_v59 = vsel %vm5539_vm1, %v5538_v54, 0  ;;  %v5645_v60 = vsel %vm5644_vm2, %v5643_v55, 0  ;;  %vm5529_vm1 = vcmp.le.f32.partialorder %v5528_v47, 0.7853982  ;;  %vm5635_vm2 = vcmp.lt.s32.totalorder %v10213_v45, 0 }
 0xa74   :  { %v5541_v62 = vshrl.u32 %v5540_v59, 5  ;;  %v5542_v63 = vand.u32 31, %v5540_v59  ;;  %v10228_v56 = vshrl.u32 %v5645_v60, 5  ;;  %v5647_v5 = vand.u32 31, %v5645_v60 }
 0xa75   :  { %v5681_v59 = vshll.u32 %v5641_v1, 8 }
 0xa76   :  { %v5543_v4 = vsub.s32 32, %v5542_v63  ;;  %v5545_v9 = vshll.u32 %v8301_v6, %v5542_v63  ;;  %v5548_v61 = vshll.u32 %v8302_v10, %v5542_v63  ;;  %v5551_v12 = vshll.u32 %v8303_v11, %v5542_v63 }
 0xa77   :  { %v5554_v14 = vshll.u32 %v8304_v13, %v5542_v63  ;;  %v5557_v16 = vshll.u32 %v8305_v15, %v5542_v63  ;;  %vm5560_vm3 = vcmp.lt.s32.totalorder %v5541_v62, 1  ;;  %vm5561_vm4 = vcmp.lt.s32.totalorder %v5541_v62, 2 }
 0xa78   :  { %v5546_v17 = vshrl.u32 %v8302_v10, %v5543_v4  ;;  %v5549_v18 = vshrl.u32 %v8303_v11, %v5543_v4  ;;  %v5552_v19 = vshrl.u32 %v8304_v13, %v5543_v4  ;;  %v5544_v20 = vshrl.u32 %v8301_v6, %v5543_v4 }
 0xa79   :  { %v5555_v21 = vshrl.u32 %v8305_v15, %v5543_v4  ;;  %v5558_v24 = vshrl.u32 %v8306_v23, %v5543_v4  ;;  %v5648_v28 = vsub.s32 32, %v5647_v5  ;;  %vm5562_vm5 = vcmp.lt.s32.totalorder %v5541_v62, 3 }
 0xa7a   :  { %v5547_v25 = vor.u32 %v5546_v17, %v5545_v9  ;;  %v5550_v26 = vor.u32 %v5549_v18, %v5548_v61  ;;  %v5553_v27 = vor.u32 %v5552_v19, %v5551_v12  ;;  %vm5563_vm6 = vcmp.lt.s32.totalorder %v5541_v62, 4 }
 0xa7b   :  { %v5556_v22 = vor.u32 %v5555_v21, %v5554_v14  ;;  %v5559_v29 = vor.u32 %v5558_v24, %v5557_v16  ;;  %v5650_v37 = vshll.u32 %v8301_v6, %v5647_v5  ;;  %v5651_v39 = vshrl.u32 %v8302_v10, %v5648_v28 }
 0xa7c   :  { %v5564_v30 = vsel %vm5560_vm3, %v5544_v20, %v5547_v25  ;;  %v5565_v32 = vsel %vm5563_vm6, %v5553_v27, 2102212464  ;;  %v5568_v33 = vsel %vm5560_vm3, %v5547_v25, %v5550_v26  ;;  %v5572_v34 = vsel %vm5560_vm3, %v5550_v26, %v5553_v27 }
 0xa7d   :  { %v5566_v35 = vsel %vm5562_vm5, %v5550_v26, %v5565_v32  ;;  %v5569_v2 = vsel %vm5563_vm6, %v5556_v22, 920167782  ;;  %v5573_v36 = vsel %vm5563_vm6, %v5559_v29, 1326507024  ;;  %v5653_v40 = vshll.u32 %v8302_v10, %v5647_v5 }
 0xa7e   :  { %v5570_v8 = vsel %vm5562_vm5, %v5553_v27, %v5569_v2  ;;  %v5574_v38 = vsel %vm5562_vm5, %v5556_v22, %v5573_v36  ;;  %v5567_v41 = vsel %vm5561_vm4, %v5564_v30, %v5566_v35  ;;  %v5654_v44 = vshrl.u32 %v8303_v11, %v5648_v28 }
 0xa7f   :  { %v5571_v42 = vsel %vm5561_vm4, %v5568_v33, %v5570_v8  ;;  %v5575_v43 = vsel %vm5561_vm4, %v5572_v34, %v5574_v38  ;;  %v5652_v50 = vor.u32 %v5651_v39, %v5650_v37  ;;  %v5656_v53 = vshll.u32 %v8303_v11, %v5647_v5 }
 0xa80   :  { %v10237_v46 = vmul.u32.u64.low %v10225_v0, %v5575_v43  ;;  %v10238_v7 = vmul.u32.u64.high %v10225_v0, %v5575_v43, %v10237_v46  ;;  %v10241_v48 = vmul.u32.u64.low %v10225_v0, %v5571_v42  ;;  %v10242_v49 = vmul.u32.u64.high %v10225_v0, %v5571_v42, %v10241_v48 }
 0xa81   :  { %v5655_v52 = vor.u32 %v5654_v44, %v5653_v40  ;;  %v5657_v54 = vshrl.u32 %v8304_v13, %v5648_v28  ;;  %v5659_v55 = vshll.u32 %v8304_v13, %v5647_v5  ;;  %v5660_v57 = vshrl.u32 %v8305_v15, %v5648_v28 }
 0xa82   :  { %v5663_v58 = vshrl.u32 %v8306_v23, %v5648_v28  ;;  %v5583_v60 = vmul.u32 %v10225_v0, %v5567_v41  ;;  %v5649_v62 = vshrl.u32 %v8301_v6, %v5648_v28  ;;  %v5662_v4 = vshll.u32 %v8305_v15, %v5647_v5 }
 0xa83   :  { %v5658_v63 = vor.u32 %v5657_v54, %v5656_v53  ;;  %vm5585_vm7 = vc.u32 %v10238_v7, %v10241_v48  ;;  %v5586_v9 = vadd.s32 1, %v10242_v49  ;;  %v5661_v10 = vor.u32 %v5660_v57, %v5659_v55 }
 0xa84   :  { %vm5665_vm8 = vcmp.lt.s32.totalorder %v10228_v56, 1  ;;  %v5664_v61 = vor.u32 %v5663_v58, %v5662_v4  ;;  %vm5667_vm9 = vcmp.lt.s32.totalorder %v10228_v56, 3  ;;  %vm5668_vm10 = vcmp.lt.s32.totalorder %v10228_v56, 4 }
 0xa85   :  { %v5673_v11 = vsel %vm5665_vm8, %v5652_v50, %v5655_v52  ;;  %v5587_v1 = vsel %vm5585_vm7, %v5586_v9, %v10242_v49  ;;  %v5670_v12 = vsel %vm5668_vm10, %v5658_v63, 2102212464  ;;  %v5674_v0 = vsel %vm5668_vm10, %v5661_v10, 920167782 }
 0xa86   :  { %v5677_v6 = vsel %vm5665_vm8, %v5655_v52, %v5658_v63  ;;  %v5588_v13 = vadd.s32 %v5587_v1, %v5583_v60  ;;  %vm5666_vm12 = vcmp.lt.s32.totalorder %v10228_v56, 2  ;;  %v5675_v5 = vsel %vm5667_vm9, %v5658_v63, %v5674_v0 }
 0xa87   :  { %v5678_v14 = vsel %vm5668_vm10, %v5664_v61, 1326507024  ;;  %v5669_v15 = vsel %vm5665_vm8, %v5649_v62, %v5652_v50  ;;  %v5671_v16 = vsel %vm5667_vm9, %v5655_v52, %v5670_v12  ;;  %v5676_v17 = vsel %vm5666_vm12, %v5673_v11, %v5675_v5 }
 0xa88   :  { %v5679_v18 = vsel %vm5667_vm9, %v5661_v10, %v5678_v14  ;;  %v5589_v19 = vadd.s32 536870912, %v5588_v13  ;;  %v10252_v21 = vmul.u32.u64.low %v5681_v59, %v5676_v17  ;;  %v10253_v23 = vmul.u32.u64.high %v5681_v59, %v5676_v17, %v10252_v21 }
 0xa89   :  { %v5680_v20 = vsel %vm5666_vm12, %v5677_v6, %v5679_v18  ;;  %v5672_v27 = vsel %vm5666_vm12, %v5669_v15, %v5671_v16  ;;  %v5584_v41 = vadd.s32 %v10241_v48, %v10238_v7  ;;  %vm10270_vm3 = vcmp.le.f32.partialorder %v5633_v51, 0.7853982 }
 0xa8a   :  { %v10255_v24 = vmul.u32.u64.low %v5681_v59, %v5680_v20  ;;  %v10256_v25 = vmul.u32.u64.high %v5681_v59, %v5680_v20, %v10255_v24  ;;  %v5590_v26 = vshrl.u32 %v5589_v19, 30  ;;  %v5691_v22 = vadd.s32 1, %v10253_v23 }
 0xa8b   :  { %v5688_v56 = vmul.u32 %v5681_v59, %v5672_v27  ;;  %vm5620_vm7 = vweird.f32 %v10211_v3  ;;  %vm5725_vm12 = vweird.f32 %v10213_v45 }
 0xa8c   :  { %v5591_v28 = vshll.u32 %v5590_v26, 30  ;;  %vm5690_vm13 = vc.u32 %v10256_v25, %v10252_v21  ;;  %v5689_v62 = vadd.s32 %v10252_v21, %v10256_v25  ;;  %v5614_v48 = vsub.s32 4, %v5590_v26 }
 0xa8d   :  { %v5692_v30 = vsel %vm5690_vm13, %v5691_v22, %v10253_v23  ;;  %vm5749_vm13 = vcmask 8192  }
 0xa8e   :  { %v5592_v29 = vsub.s32 %v5588_v13, %v5591_v28  ;;  %v5693_v32 = vadd.s32 %v5692_v30, %v5688_v56  ;;  %v5615_v6 = vsel %vm5530_vm0, %v5614_v48, %v5590_v26 }
 0xa8f   :  { %v5617_v14 = vsel %vm5529_vm1, 0, %v5615_v6 }
 0xa90   :  { %v5594_v33 = vsub.s32 0, %v5592_v29  ;;  %v5694_v34 = vadd.s32 536870912, %v5693_v32  ;;  %v5621_v18 = vadd.s32 3, %v5617_v14 }
 0xa92   :  { %v6323_v35 = vmin.u32 %v5594_v33, %v5592_v29  ;;  %v5695_v2 = vshrl.u32 %v5694_v34, 30  ;;  %v5622_v23 = vand.u32 3, %v5621_v18 }
 0xa94   :  { %v5596_v36 = vclz %v6323_v35  ;;  %v5696_v37 = vshll.u32 %v5695_v2, 30  ;;  %v5719_v21 = vsub.s32 4, %v5695_v2  ;;  %vm5627_vm4 = vcmp.eq.s32.totalorder %v5622_v23, 2 }
 0xa95   :  { %vm5624_vm5 = vcmp.eq.s32.totalorder %v5622_v23, 0  ;;  %vm5623_vm6 = vcmp.lt.s32.totalorder %v5622_v23, 2 }
 0xa96   :  { %v6324_v8 = vadd.s32 4294967294, %v5596_v36  ;;  %v5697_v38 = vsub.s32 %v5693_v32, %v5696_v37  ;;  %v5720_v28 = vsel %vm5635_vm2, %v5719_v21, %v5695_v2 }
 0xa98   :  { %vm6325_vm14 = vcmp.lt.s32.totalorder %v6324_v8, 0  ;;  %v5699_v40 = vsub.s32 0, %v5697_v38 }
 0xa99   :  { %v5599_v39 = vsel %vm6325_vm14, 0, %v6324_v8 }
 0xa9a   :  { %v5600_v42 = vsub.s32 32, %v5599_v39  ;;  %v5604_v43 = vsub.s32 4294967266, %v5599_v39  ;;  %v6327_v44 = vmin.u32 %v5699_v40, %v5697_v38  ;;  %v5601_v46 = vshll.u32 %v5592_v29, %v5599_v39 }
 0xa9b   :  { %v5722_v29 = vsel %vm10270_vm3, 0, %v5720_v28 }
 0xa9c   :  { %v5602_v49 = vshrl.u32 %v5584_v41, %v5600_v42  ;;  %v5605_v50 = vadd.s32 127, %v5604_v43  ;;  %v5701_v52 = vclz %v6327_v44  ;;  %v5726_v32 = vand.u32 3, %v5722_v29 }
 0xa9e   :  { %v5603_v53 = vor.u32 %v5602_v49, %v5601_v46  ;;  %v5606_v54 = vshll.u32 %v5605_v50, 23  ;;  %v6328_v55 = vadd.s32 4294967294, %v5701_v52  ;;  %vm5731_vm8 = vcmp.eq.s32.totalorder %v5726_v32, 2 }
 0xa9f   :  { %vm5728_vm9 = vcmp.eq.s32.totalorder %v5726_v32, 0  ;;  %vm5727_vm10 = vcmp.lt.s32.totalorder %v5726_v32, 2 }
 0xaa0   :  { %v5607_v57 = vor.u32 4788187, %v5606_v54  ;;  %vm6329_vm15 = vcmp.lt.s32.totalorder %v6328_v55, 0  ;;  %v5610_v59 = vcvt.s32.f32 %v5603_v53 }
 0xaa1   :  { %v5704_v60 = vsel %vm6329_vm15, 0, %v6328_v55 }
 0xaa2   :  { %v5608_v58 = vand.u32 2147483647, %v5607_v57  ;;  %v5705_v63 = vsub.s32 32, %v5704_v60  ;;  %v5709_v4 = vsub.s32 4294967266, %v5704_v60  ;;  %v5706_v9 = vshll.u32 %v5697_v38, %v5704_v60 }
 0xaa4   :  { %v5611_v7 = vmul.f32 %v5610_v59, %v5608_v58  ;;  %v5707_v10 = vshrl.u32 %v5689_v62, %v5705_v63  ;;  %v5710_v61 = vadd.s32 127, %v5709_v4 }
 0xaa6   :  { %v5612_v11 = vxor.u32 2147483648, %v5611_v7  ;;  %v5708_v1 = vor.u32 %v5707_v10, %v5706_v9  ;;  %v5711_v12 = vshll.u32 %v5710_v61, 23 }
 0xaa8   :  { %v5613_v0 = vsel %vm5530_vm0, %v5612_v11, %v5611_v7  ;;  %v5712_v5 = vor.u32 4788187, %v5711_v12  ;;  %v5715_v16 = vcvt.s32.f32 %v5708_v1 }
 0xaa9   :  { %v5616_v13 = vsel %vm5529_vm1, %v10211_v3, %v5613_v0 }
 0xaaa   :  { %8264 = vcosq.f32 %v5616_v13  ;;  %v5713_v15 = vand.u32 2147483647, %v5712_v5 }
 0xaab   :  { %8266 = vsinq.f32 %v5616_v13 }
 0xaac   :  { %v5716_v17 = vmul.f32 %v5715_v16, %v5713_v15 }
 0xaae   :  { %v5717_v19 = vxor.u32 2147483648, %v5716_v17 }
 0xab0   :  { %v5718_v47 = vsel %vm5635_vm2, %v5717_v19, %v5716_v17 }
 0xab1   :  { %v5721_v24 = vsel %vm10270_vm3, %v10213_v45, %v5718_v47 }
 0xab2   :  { %8268 = vcosq.f32 %v5721_v24 }
 0xab3   :  { %8270 = vsinq.f32 %v5721_v24 }
 0xab4   :  { %v8265_v25 = vpop.eup %8264 }
 0xab5   :  { %v8267_v26 = vpop.eup %8266  ;;  %v5628_v27 = vxor.u32 2147483648, %v8265_v25 }
 0xab6   :  { %v5625_v22 = vxor.u32 2147483648, %v8267_v26 }
 0xab7   :  { %v5629_v51 = vsel %vm5627_vm4, %v5628_v27, %v8267_v26 }
 0xab8   :  { %v5626_v56 = vsel %vm5624_vm5, %v8265_v25, %v5625_v22 }
 0xab9   :  { %v5630_v30 = vsel %vm5623_vm6, %v5626_v56, %v5629_v51 }
 0xaba   :  { %v5631_v34 = vsel %vm5620_vm7, nan, %v5630_v30 }
 0xabb   :  { %v5632_v2 = vsub.f32 0.0, %v5631_v34 }
 0xabc   :  { %v8269_v33 = vpop.eup %8268 }
 0xabd   :  { %v8271_v35 = vpop.eup %8270  ;;  %v5732_v36 = vxor.u32 2147483648, %v8269_v33 }
 0xabe   :  { %v5729_v37 = vxor.u32 2147483648, %v8271_v35 }
 0xabf   :  { %v5733_v8 = vsel %vm5731_vm8, %v5732_v36, %v8271_v35 }
 0xac0   :  { %v5730_v38 = vsel %vm5728_vm9, %v8269_v33, %v5729_v37 }
 0xac1   :  { %v5734_v39 = vsel %vm5727_vm10, %v5730_v38, %v5733_v8 }
 0xac2   :  { %v5735_v40 = vsel %vm5725_vm12, nan, %v5734_v39 }
 0xac3   :  { %v5736_v41 = vmul.f32 %v5735_v40, %v5632_v2 }
 0xac5   :  { %5740 = vperm.xlu1 %8263, %v5736_v41   ;;  %v5737_v42 = vsub.f32 1.0, %v5736_v41 }
 0xac7   :  { %5745 = vperm.xlu0 %8262, %v5737_v42  }
 0xb44   :  { %v5741_v3 = vpop.permute.xlu1 %5740 }
 0xb46   :  { %v5746_v43 = vpop.permute.xlu0 %5745 }
 0xb47   :  { %v5748_v44 = vsel %vm4924_vm11, %v5741_v3, %v5746_v43 }
 0xb48   :  { %5750 = vst.msk [vmem:[#allocation2] sm:$0x1] %vm5749_vm13, %v5748_v44 }
 0xb49   :  { %8283 = shalt.err (!%p8280_p4)
}
 0xb4a   :  { %s8284_s17 = scalar_lea.hbm %s10310_s15, 16 }
 0xb4b   :  { %p8285_p5 = scmp.ne.s32.totalorder %s10310_s15, %s8284_s17  ;;  %p8288_p6 = scmp.lt.u32.totalorder %s8284_s17, %s10310_s15 }
 0xb4d   :  { %p8290_p7 = pnand %p8288_p6, %p8285_p5 }
 0xb4f   :  { %8293 = shalt.err (!%p8290_p7)
}
 0xb50   :  { %5760 = dma.vmem_to_hbm [thread:$0]  %s5758_s29, 16, %s10310_s15, [#allocation3]  }
 0xb51   :  { %8294 = dma.done.wait [#allocation3], 16  }
 0xb52   :  { %8295 = vsyncadd [#allocation3], 4294967280 }
 0xb53   :  { %5764 = vsyncpa [#allocation3], 1 }

</bundles_post_ra>
